<compile_context>
chip_gen: v7x
topology: tpu7x:2x2x1
jax: 0.10.0
libtpu: 0.0.40
codegen_flags: <defaults>
</compile_context>

<pallas_src>
import functools

import numpy as np
import jax
import jax.numpy as jnp
from jax import lax
from jax.experimental import pallas as pl
from jax.experimental.pallas import tpu as pltpu

LRELU_SLOPE = 0.2
BN_EPS = 1e-5


def _round_up(x, m):
    return (x + m - 1) // m * m


# ----------------------------- Pallas kernels -----------------------------

def _conv_matmul_kernel(a_ref, w_ref, b_ref, o_ref, sum_ref, ssq_ref, *,
                        apply_lrelu, emit_stats):
    """K-tiled matmul accumulating into o_ref (f32), fused bias (+LeakyReLU)
    epilogue, plus (optionally) per-M-tile sum / sum-of-squares of the
    pre-activation for BatchNorm statistics."""
    k = pl.program_id(1)

    @pl.when(k == 0)
    def _():
        o_ref[...] = jnp.zeros_like(o_ref)

    o_ref[...] += jnp.dot(a_ref[...], w_ref[...],
                          preferred_element_type=jnp.float32)

    @pl.when(k == pl.num_programs(1) - 1)
    def _():
        y = o_ref[...] + b_ref[...]
        if emit_stats:
            s = jnp.sum(y, axis=0, keepdims=True)
            s2 = jnp.sum(y * y, axis=0, keepdims=True)
            sum_ref[...] = jnp.broadcast_to(s, sum_ref.shape)
            ssq_ref[...] = jnp.broadcast_to(s2, ssq_ref.shape)
        else:
            sum_ref[...] = jnp.zeros_like(sum_ref)
            ssq_ref[...] = jnp.zeros_like(ssq_ref)
        if apply_lrelu:
            y = jnp.where(y >= 0.0, y, LRELU_SLOPE * y)
        o_ref[...] = y


def _affine_lrelu_kernel(x_ref, s_ref, b_ref, o_ref):
    """o = leaky_relu(x * s + b, 0.2); s, b broadcast per-column."""
    y = x_ref[...] * s_ref[...] + b_ref[...]
    o_ref[...] = jnp.where(y >= 0.0, y, LRELU_SLOPE * y)


def _avgpool_kernel(t0, t1, t2, t3, t4, t5, t6, t7, t8, inv_ref, o_ref):
    """Per-plane 3x3/stride-2 pool: sum 9 shifted taps, scale by 1/valid_count."""
    acc = t0[0]
    for t in (t1, t2, t3, t4, t5, t6, t7, t8):
        acc = acc + t[0]
    o_ref[0] = acc * inv_ref[...]


# ----------------------------- kernel wrappers -----------------------------

def conv_matmul(a_bf16, w_bf16, bias, *, apply_lrelu, emit_stats):
    """(M,K)bf16 @ (K,Cout)bf16 + bias, f32 accumulate, tiled over M and K.

    Returns (y[M,Cout] f32, sum_over_rows[Cout], sumsq_over_rows[Cout]) where
    the sums are over the *valid* M rows of the pre-activation (conv + bias).
    When emit_stats=False the stats are returned as None.
    """
    M, K = a_bf16.shape
    Cout = w_bf16.shape[1]

    Kp = _round_up(K, 128)
    if Kp % 512 == 0:                           # biggest K tile that divides Kp
        tk = 512
    elif Kp % 256 == 0:
        tk = 256
    else:
        tk = 128
    Np = _round_up(Cout, 128)
    tm = min(512, _round_up(M, 8))
    Mp = _round_up(M, tm)
    n_mt = Mp // tm

    a = jnp.pad(a_bf16, ((0, Mp - M), (0, Kp - K)))
    w = jnp.pad(w_bf16, ((0, Kp - K), (0, Np - Cout)))
    b32 = bias.astype(jnp.float32)
    b = jnp.pad(b32.reshape(1, Cout), ((0, 0), (0, Np - Cout)))

    out, sums, ssqs = pl.pallas_call(
        functools.partial(_conv_matmul_kernel,
                          apply_lrelu=apply_lrelu, emit_stats=emit_stats),
        out_shape=(jax.ShapeDtypeStruct((Mp, Np), jnp.float32),
                   jax.ShapeDtypeStruct((8 * n_mt, Np), jnp.float32),
                   jax.ShapeDtypeStruct((8 * n_mt, Np), jnp.float32)),
        grid_spec=pltpu.PrefetchScalarGridSpec(
            num_scalar_prefetch=0,
            grid=(n_mt, Kp // tk),
            in_specs=[
                pl.BlockSpec((tm, tk), lambda i, k: (i, k)),
                pl.BlockSpec((tk, Np), lambda i, k: (k, 0)),
                pl.BlockSpec((1, Np), lambda i, k: (0, 0)),
            ],
            out_specs=(
                pl.BlockSpec((tm, Np), lambda i, k: (i, 0)),
                pl.BlockSpec((8, Np), lambda i, k: (i, 0)),
                pl.BlockSpec((8, Np), lambda i, k: (i, 0)),
            ),
        ),
        compiler_params=pltpu.CompilerParams(
            dimension_semantics=("parallel", "arbitrary")),
    )(a, w, b)

    if not emit_stats:
        return out[:M, :Cout], None, None

    # Remove the contribution of zero-padded M rows (each equals `bias`).
    pad_rows = float(Mp - M)
    tot_s = jnp.sum(sums[::8, :Cout], axis=0) - pad_rows * b32
    tot_s2 = jnp.sum(ssqs[::8, :Cout], axis=0) - pad_rows * b32 * b32
    return out[:M, :Cout], tot_s, tot_s2


def _affine_lrelu_pallas(x2d, scale, shift):
    """x2d (M,C) f32, scale/shift (C,) broadcast per column."""
    M, C = x2d.shape
    Cp = _round_up(C, 128)
    tm = min(1024, _round_up(M, 8))
    Mp = _round_up(M, tm)

    xp = jnp.pad(x2d, ((0, Mp - M), (0, Cp - C)))
    sp = jnp.pad(scale.reshape(1, C), ((0, 0), (0, Cp - C)))
    bp = jnp.pad(shift.reshape(1, C), ((0, 0), (0, Cp - C)))

    out = pl.pallas_call(
        _affine_lrelu_kernel,
        out_shape=jax.ShapeDtypeStruct((Mp, Cp), jnp.float32),
        grid_spec=pltpu.PrefetchScalarGridSpec(
            num_scalar_prefetch=0,
            grid=(Mp // tm,),
            in_specs=[pl.BlockSpec((tm, Cp), lambda i: (i, 0)),
                      pl.BlockSpec((1, Cp), lambda i: (0, 0)),
                      pl.BlockSpec((1, Cp), lambda i: (0, 0))],
            out_specs=pl.BlockSpec((tm, Cp), lambda i: (i, 0)),
        ),
        compiler_params=pltpu.CompilerParams(
            dimension_semantics=("parallel",)),
    )(xp, sp, bp)
    return out[:M, :C]


def affine_leaky_relu(x_flat, scale, shift):
    """leaky_relu(x*scale + shift) with per-channel scale/shift.

    For small channel counts, fold g = 128//C consecutive rows into the lane
    dim so all 128 lanes are live (avoids C->128 zero-padding waste).
    """
    M, C = x_flat.shape
    if C < 128 and 128 % C == 0:
        g = 128 // C
        Mg = _round_up(M, g)
        xg = jnp.pad(x_flat, ((0, Mg - M), (0, 0))).reshape(Mg // g, g * C)
        out = _affine_lrelu_pallas(xg, jnp.tile(scale, g), jnp.tile(shift, g))
        return out.reshape(Mg, C)[:M]
    return _affine_lrelu_pallas(x_flat, scale, shift)


def conv4x4(x, w, b, stride, *, apply_lrelu, emit_stats):
    """Conv2d(k=4, stride, pad=2) via bf16 im2col + Pallas matmul. x NHWC f32."""
    N, H, W, C = x.shape
    Cout = w.shape[-1]
    OH = (H + 4 - 4) // stride + 1
    OW = (W + 4 - 4) // stride + 1

    xp = jnp.pad(x.astype(jnp.bfloat16), ((0, 0), (2, 2), (2, 2), (0, 0)))
    cols = []
    for kh in range(4):
        for kw in range(4):
            cols.append(lax.slice(
                xp, (0, kh, kw, 0),
                (N, kh + stride * (OH - 1) + 1, kw + stride * (OW - 1) + 1, C),
                (1, stride, stride, 1)))
    patches = jnp.concatenate(cols, axis=-1)          # (N, OH, OW, 16*C) bf16

    M = N * OH * OW
    K = 16 * C
    a = patches.reshape(M, K)
    wm = w.reshape(K, Cout).astype(jnp.bfloat16)
    y, s, s2 = conv_matmul(a, wm, b, apply_lrelu=apply_lrelu,
                           emit_stats=emit_stats)
    return y, s, s2, (N, OH, OW, Cout)


def avgpool3x3_s2(x):
    """AvgPool2d(3, stride=2, padding=1, count_include_pad=False). x NHWC f32."""
    N, H, W, C = x.shape
    OH = (H + 2 - 3) // 2 + 1
    OW = (W + 2 - 3) // 2 + 1
    P = N * C

    def taps3x3(img):          # img (B, H, W) -> 9 tensors of (B, OH, OW)
        ip = jnp.pad(img, ((0, 0), (1, 1), (1, 1)))
        out = []
        for kh in range(3):
            for kw in range(3):
                out.append(lax.slice(
                    ip, (0, kh, kw),
                    (img.shape[0], kh + 2 * (OH - 1) + 1, kw + 2 * (OW - 1) + 1),
                    (1, 2, 2)))
        return out

    planes = jnp.transpose(x, (0, 3, 1, 2)).reshape(P, H, W)
    taps = taps3x3(planes)                                       # 9 x (P,OH,OW)
    cnt = sum(taps3x3(jnp.ones((1, H, W), jnp.float32)))[0]      # (OH, OW)

    toh = min(64, _round_up(OH, 8))
    OHp = _round_up(OH, toh)
    taps = [jnp.pad(t, ((0, 0), (0, OHp - OH), (0, 0))) for t in taps]
    inv = 1.0 / jnp.pad(cnt, ((0, OHp - OH), (0, 0)), constant_values=1.0)

    tap_spec = pl.BlockSpec((1, toh, OW), lambda p, i: (p, i, 0))
    out = pl.pallas_call(
        _avgpool_kernel,
        out_shape=jax.ShapeDtypeStruct((P, OHp, OW), jnp.float32),
        grid_spec=pltpu.PrefetchScalarGridSpec(
            num_scalar_prefetch=0,
            grid=(P, OHp // toh),
            in_specs=[tap_spec] * 9 + [pl.BlockSpec((toh, OW),
                                                    lambda p, i: (i, 0))],
            out_specs=pl.BlockSpec((1, toh, OW), lambda p, i: (p, i, 0)),
        ),
        compiler_params=pltpu.CompilerParams(
            dimension_semantics=("parallel", "arbitrary")),
    )(*taps, inv)

    out = out[:, :OH, :].reshape(N, C, OH, OW)
    return jnp.transpose(out, (0, 2, 3, 1))          # back to NHWC


# ----------------------------- model definition -----------------------------

def nlayer_configs(input_nc, ndf, n_layers):
    cfgs = [dict(cin=input_nc, cout=ndf, stride=2, norm=False, act=True)]
    nf = ndf
    for _ in range(1, n_layers):
        nf_prev, nf = nf, min(nf * 2, 512)
        cfgs.append(dict(cin=nf_prev, cout=nf, stride=2, norm=True, act=True))
    nf_prev, nf = nf, min(nf * 2, 512)
    cfgs.append(dict(cin=nf_prev, cout=nf, stride=1, norm=True, act=True))
    cfgs.append(dict(cin=nf, cout=1, stride=1, norm=False, act=False))
    return cfgs


def init_params(key, cfgs, num_D):
    params = []
    for _ in range(num_D):
        layers = []
        for cfg in cfgs:
            key, k1, k2, k3, k4 = jax.random.split(key, 5)
            fan_in = 16 * cfg['cin']
            layer = {
                'w': jax.random.normal(k1, (4, 4, cfg['cin'], cfg['cout']),
                                       jnp.float32) / np.sqrt(fan_in),
                'b': 0.01 * jax.random.normal(k2, (cfg['cout'],), jnp.float32),
            }
            if cfg['norm']:
                layer['gamma'] = 1.0 + 0.01 * jax.random.normal(
                    k3, (cfg['cout'],), jnp.float32)
                layer['beta'] = 0.01 * jax.random.normal(
                    k4, (cfg['cout'],), jnp.float32)
            layers.append(layer)
        params.append(layers)
    return params


def single_d_forward(cfgs, layers, x):
    """NLayerDiscriminator.forward: list of all intermediate outputs (NHWC)."""
    outs = []
    for cfg, layer in zip(cfgs, layers):
        # Layer-0 has LeakyReLU fused into the matmul epilogue; BN layers get
        # their LeakyReLU after normalization; the final layer has neither.
        apply_lrelu = cfg['act'] and not cfg['norm']
        y_flat, s, s2, (N, OH, OW, Cout) = conv4x4(
            x, layer['w'], layer['b'], cfg['stride'],
            apply_lrelu=apply_lrelu, emit_stats=cfg['norm'])
        M = N * OH * OW
        if cfg['norm']:
            # Training-mode BatchNorm2d (batch statistics, biased variance) —
            # mean/var from the fused per-tile partial sums of the conv kernel.
            mean = s / M
            var = jnp.maximum(s2 / M - mean * mean, 0.0)
            scale = layer['gamma'] * lax.rsqrt(var + BN_EPS)
            shift = layer['beta'] - mean * scale
            y_flat = affine_leaky_relu(y_flat, scale, shift)
        y = y_flat.reshape(N, OH, OW, Cout)
        outs.append(y)
        x = y
    return outs


def multiscale_forward(cfgs, params, x_nchw):
    """MultiscaleDiscriminator.forward. Input NCHW, outputs NCHW (like torch)."""
    num_D = len(params)
    x = jnp.transpose(x_nchw, (0, 2, 3, 1)).astype(jnp.float32)   # -> NHWC
    results = []
    for i in range(num_D):
        layers = params[num_D - 1 - i]   # scale(num_D-1-i) on i-times-downsampled input
        outs = single_d_forward(cfgs, layers, x)
        results.append([jnp.transpose(o, (0, 3, 1, 2)) for o in outs])
        if i != num_D - 1:
            x = avgpool3x3_s2(x)
    return results


# ----------------------------- demo -----------------------------

if __name__ == "__main__":
    input_nc, ndf, n_layers, num_D = 4, 8, 3, 3
    key = jax.random.PRNGKey(0)
    kp, kx = jax.random.split(key)
    cfgs = nlayer_configs(input_nc, ndf, n_layers)
    params = init_params(kp, cfgs, num_D)

    x = jax.random.normal(kx, (2, input_nc, 16, 16), jnp.float32)  # NCHW

    fwd = jax.jit(functools.partial(multiscale_forward, cfgs))
    results = fwd(params, x)
    results = jax.block_until_ready(results)

    # light sanity checks on structure / finiteness
    assert len(results) == num_D
    for scale_outs in results:
        assert len(scale_outs) == n_layers + 2
        for o in scale_outs:
            assert bool(jnp.all(jnp.isfinite(o)))
    # final map of each scale has 1 output channel
    assert all(scale_outs[-1].shape[1] == 1 for scale_outs in results)

    print("KERNEL_OK")
</pallas_src>

<mosaic_0001>
module attributes {stable_mosaic.version = 11 : i64} {
  func.func @_conv_matmul_kernel(%arg0: i32, %arg1: i32, %arg2: memref<168x128xbf16, #tpu.memory_space<vmem>>, %arg3: memref<128x128xbf16, #tpu.memory_space<vmem>>, %arg4: memref<1x128xf32, #tpu.memory_space<vmem>>, %arg5: memref<168x128xf32, #tpu.memory_space<vmem>>, %arg6: memref<8x128xf32, #tpu.memory_space<vmem>>, %arg7: memref<8x128xf32, #tpu.memory_space<vmem>>) attributes {dimension_semantics = [#tpu.dimension_semantics<parallel>, #tpu.dimension_semantics<arbitrary>], iteration_bounds = array<i64: 1, 1>, scalar_prefetch = 0 : i64, scratch_operands = 0 : i64, tpu.core_type = #tpu.core_type<tc>, window_params = [{transform_indices = @transform_0, window_bounds = array<i64: 168, 128>}, {transform_indices = @transform_1, window_bounds = array<i64: 128, 128>}, {pipeline_mode = #tpu.pipeline_mode<synchronous>, transform_indices = @transform_2, window_bounds = array<i64: 1, 128>}, {transform_indices = @transform_3, window_bounds = array<i64: 168, 128>}, {transform_indices = @transform_4, window_bounds = array<i64: 8, 128>}, {transform_indices = @transform_5, window_bounds = array<i64: 8, 128>}]} {
    %c0_i32 = arith.constant 0 : i32
    %0 = arith.cmpi eq, %arg1, %c0_i32 : i32
    %1 = arith.extui %0 : i1 to i32
    %c0_i32_0 = arith.constant 0 : i32
    %2 = arith.cmpi ne, %1, %c0_i32_0 : i32
    scf.if %2 {
      %cst_10 = arith.constant 0.000000e+00 : f32
      %12 = vector.broadcast %cst_10 : f32 to vector<168x128xf32>
      %c0_11 = arith.constant 0 : index
      %c0_12 = arith.constant 0 : index
      %13 = vector.load %arg5[%c0_11, %c0_12] : memref<168x128xf32, #tpu.memory_space<vmem>>, vector<168x128xf32>
      tpu.vector_store %arg5[%c0_11, %c0_12], %12 {strides = array<i32>} : memref<168x128xf32, #tpu.memory_space<vmem>>, vector<168x128xf32>,
    } else {
    }
    %c0 = arith.constant 0 : index
    %c0_1 = arith.constant 0 : index
    %3 = vector.load %arg5[%c0, %c0_1] : memref<168x128xf32, #tpu.memory_space<vmem>>, vector<168x128xf32>
    %c0_2 = arith.constant 0 : index
    %c0_3 = arith.constant 0 : index
    %4 = vector.load %arg2[%c0_2, %c0_3] : memref<168x128xbf16, #tpu.memory_space<vmem>>, vector<168x128xbf16>
    %c0_4 = arith.constant 0 : index
    %c0_5 = arith.constant 0 : index
    %5 = vector.load %arg3[%c0_4, %c0_5] : memref<128x128xbf16, #tpu.memory_space<vmem>>, vector<128x128xbf16>
    %cst = arith.constant dense<0.000000e+00> : vector<168x128xf32>
    %6 = tpu.matmul %4, %5, %cst {dimension_numbers = #tpu.dot_dimension_numbers<[1], [0], [0], [1], [0, 0, 1, 1], [], []>} : vector<168x128xbf16>, vector<128x128xbf16>, vector<168x128xf32> -> vector<168x128xf32>
    %7 = arith.addf %3, %6 : vector<168x128xf32>
    %c0_6 = arith.constant 0 : index
    %c0_7 = arith.constant 0 : index
    %8 = vector.load %arg5[%c0_6, %c0_7] : memref<168x128xf32, #tpu.memory_space<vmem>>, vector<168x128xf32>
    tpu.vector_store %arg5[%c0_6, %c0_7], %7 {strides = array<i32>} : memref<168x128xf32, #tpu.memory_space<vmem>>, vector<168x128xf32>,
    %c0_i32_8 = arith.constant 0 : i32
    %9 = arith.cmpi eq, %arg1, %c0_i32_8 : i32
    %10 = arith.extui %9 : i1 to i32
    %c0_i32_9 = arith.constant 0 : i32
    %11 = arith.cmpi ne, %10, %c0_i32_9 : i32
    scf.if %11 {
      %c0_10 = arith.constant 0 : index
      %c0_11 = arith.constant 0 : index
      %12 = vector.load %arg5[%c0_10, %c0_11] : memref<168x128xf32, #tpu.memory_space<vmem>>, vector<168x128xf32>
      %c0_12 = arith.constant 0 : index
      %c0_13 = arith.constant 0 : index
      %13 = vector.load %arg4[%c0_12, %c0_13] : memref<1x128xf32, #tpu.memory_space<vmem>>, vector<1x128xf32>
      %14 = vector.broadcast %13 : vector<1x128xf32> to vector<168x128xf32>
      %15 = arith.addf %12, %14 : vector<168x128xf32>
      %cst_14 = arith.constant 0.000000e+00 : f32
      %16 = vector.broadcast %cst_14 : f32 to vector<8x128xf32>
      %c0_15 = arith.constant 0 : index
      %c0_16 = arith.constant 0 : index
      %17 = vector.load %arg6[%c0_15, %c0_16] : memref<8x128xf32, #tpu.memory_space<vmem>>, vector<8x128xf32>
      tpu.vector_store %arg6[%c0_15, %c0_16], %16 {strides = array<i32>} : memref<8x128xf32, #tpu.memory_space<vmem>>, vector<8x128xf32>,
      %cst_17 = arith.constant 0.000000e+00 : f32
      %18 = vector.broadcast %cst_17 : f32 to vector<8x128xf32>
      %c0_18 = arith.constant 0 : index
      %c0_19 = arith.constant 0 : index
      %19 = vector.load %arg7[%c0_18, %c0_19] : memref<8x128xf32, #tpu.memory_space<vmem>>, vector<8x128xf32>
      tpu.vector_store %arg7[%c0_18, %c0_19], %18 {strides = array<i32>} : memref<8x128xf32, #tpu.memory_space<vmem>>, vector<8x128xf32>,
      %cst_20 = arith.constant 0.000000e+00 : f32
      %20 = vector.broadcast %cst_20 : f32 to vector<168x128xf32>
      %21 = arith.cmpf oge, %15, %20 : vector<168x128xf32>
      %cst_21 = arith.constant 2.000000e-01 : f32
      %22 = vector.broadcast %cst_21 : f32 to vector<168x128xf32>
      %23 = arith.mulf %22, %15 : vector<168x128xf32>
      %24 = arith.select %21, %15, %23 : vector<168x128xi1>, vector<168x128xf32>
      %c0_22 = arith.constant 0 : index
      %c0_23 = arith.constant 0 : index
      %25 = vector.load %arg5[%c0_22, %c0_23] : memref<168x128xf32, #tpu.memory_space<vmem>>, vector<168x128xf32>
      tpu.vector_store %arg5[%c0_22, %c0_23], %24 {strides = array<i32>} : memref<168x128xf32, #tpu.memory_space<vmem>>, vector<168x128xf32>,
    } else {
    }
    return
  }
  func.func @transform_0(%arg0: i32, %arg1: i32) -> (i32, i32) {
    %c0_i32 = arith.constant 0 : i32
    return %arg0, %arg1 : i32, i32
  }
  func.func @transform_1(%arg0: i32, %arg1: i32) -> (i32, i32) {
    %c0_i32 = arith.constant 0 : i32
    %c0_i32_0 = arith.constant 0 : i32
    return %arg1, %c0_i32 : i32, i32
  }
  func.func @transform_2(%arg0: i32, %arg1: i32) -> (i32, i32) {
    %c0_i32 = arith.constant 0 : i32
    %c0_i32_0 = arith.constant 0 : i32
    %c0_i32_1 = arith.constant 0 : i32
    return %c0_i32, %c0_i32_0 : i32, i32
  }
  func.func @transform_3(%arg0: i32, %arg1: i32) -> (i32, i32) {
    %c0_i32 = arith.constant 0 : i32
    %c0_i32_0 = arith.constant 0 : i32
    return %arg0, %c0_i32 : i32, i32
  }
  func.func @transform_4(%arg0: i32, %arg1: i32) -> (i32, i32) {
    %c0_i32 = arith.constant 0 : i32
    %c0_i32_0 = arith.constant 0 : i32
    return %arg0, %c0_i32 : i32, i32
  }
  func.func @transform_5(%arg0: i32, %arg1: i32) -> (i32, i32) {
    %c0_i32 = arith.constant 0 : i32
    %c0_i32_0 = arith.constant 0 : i32
    return %arg0, %c0_i32 : i32, i32
  }
}

module attributes {stable_mosaic.version = 11 : i64} {
  func.func @_conv_matmul_kernel(%arg0: i32, %arg1: i32, %arg2: memref<56x128xbf16, #tpu.memory_space<vmem>>, %arg3: memref<128x128xbf16, #tpu.memory_space<vmem>>, %arg4: memref<1x128xf32, #tpu.memory_space<vmem>>, %arg5: memref<56x128xf32, #tpu.memory_space<vmem>>, %arg6: memref<8x128xf32, #tpu.memory_space<vmem>>, %arg7: memref<8x128xf32, #tpu.memory_space<vmem>>) attributes {dimension_semantics = [#tpu.dimension_semantics<parallel>, #tpu.dimension_semantics<arbitrary>], iteration_bounds = array<i64: 1, 1>, scalar_prefetch = 0 : i64, scratch_operands = 0 : i64, tpu.core_type = #tpu.core_type<tc>, window_params = [{transform_indices = @transform_0, window_bounds = array<i64: 56, 128>}, {transform_indices = @transform_1, window_bounds = array<i64: 128, 128>}, {pipeline_mode = #tpu.pipeline_mode<synchronous>, transform_indices = @transform_2, window_bounds = array<i64: 1, 128>}, {transform_indices = @transform_3, window_bounds = array<i64: 56, 128>}, {transform_indices = @transform_4, window_bounds = array<i64: 8, 128>}, {transform_indices = @transform_5, window_bounds = array<i64: 8, 128>}]} {
    %c0_i32 = arith.constant 0 : i32
    %0 = arith.cmpi eq, %arg1, %c0_i32 : i32
    %1 = arith.extui %0 : i1 to i32
    %c0_i32_0 = arith.constant 0 : i32
    %2 = arith.cmpi ne, %1, %c0_i32_0 : i32
    scf.if %2 {
      %cst_10 = arith.constant 0.000000e+00 : f32
      %12 = vector.broadcast %cst_10 : f32 to vector<56x128xf32>
      %c0_11 = arith.constant 0 : index
      %c0_12 = arith.constant 0 : index
      %13 = vector.load %arg5[%c0_11, %c0_12] : memref<56x128xf32, #tpu.memory_space<vmem>>, vector<56x128xf32>
      tpu.vector_store %arg5[%c0_11, %c0_12], %12 {strides = array<i32>} : memref<56x128xf32, #tpu.memory_space<vmem>>, vector<56x128xf32>,
    } else {
    }
    %c0 = arith.constant 0 : index
    %c0_1 = arith.constant 0 : index
    %3 = vector.load %arg5[%c0, %c0_1] : memref<56x128xf32, #tpu.memory_space<vmem>>, vector<56x128xf32>
    %c0_2 = arith.constant 0 : index
    %c0_3 = arith.constant 0 : index
    %4 = vector.load %arg2[%c0_2, %c0_3] : memref<56x128xbf16, #tpu.memory_space<vmem>>, vector<56x128xbf16>
    %c0_4 = arith.constant 0 : index
    %c0_5 = arith.constant 0 : index
    %5 = vector.load %arg3[%c0_4, %c0_5] : memref<128x128xbf16, #tpu.memory_space<vmem>>, vector<128x128xbf16>
    %cst = arith.constant dense<0.000000e+00> : vector<56x128xf32>
    %6 = tpu.matmul %4, %5, %cst {dimension_numbers = #tpu.dot_dimension_numbers<[1], [0], [0], [1], [0, 0, 1, 1], [], []>} : vector<56x128xbf16>, vector<128x128xbf16>, vector<56x128xf32> -> vector<56x128xf32>
    %7 = arith.addf %3, %6 : vector<56x128xf32>
    %c0_6 = arith.constant 0 : index
    %c0_7 = arith.constant 0 : index
    %8 = vector.load %arg5[%c0_6, %c0_7] : memref<56x128xf32, #tpu.memory_space<vmem>>, vector<56x128xf32>
    tpu.vector_store %arg5[%c0_6, %c0_7], %7 {strides = array<i32>} : memref<56x128xf32, #tpu.memory_space<vmem>>, vector<56x128xf32>,
    %c0_i32_8 = arith.constant 0 : i32
    %9 = arith.cmpi eq, %arg1, %c0_i32_8 : i32
    %10 = arith.extui %9 : i1 to i32
    %c0_i32_9 = arith.constant 0 : i32
    %11 = arith.cmpi ne, %10, %c0_i32_9 : i32
    scf.if %11 {
      %c0_10 = arith.constant 0 : index
      %c0_11 = arith.constant 0 : index
      %12 = vector.load %arg5[%c0_10, %c0_11] : memref<56x128xf32, #tpu.memory_space<vmem>>, vector<56x128xf32>
      %c0_12 = arith.constant 0 : index
      %c0_13 = arith.constant 0 : index
      %13 = vector.load %arg4[%c0_12, %c0_13] : memref<1x128xf32, #tpu.memory_space<vmem>>, vector<1x128xf32>
      %14 = vector.broadcast %13 : vector<1x128xf32> to vector<56x128xf32>
      %15 = arith.addf %12, %14 : vector<56x128xf32>
      %cst_14 = arith.constant dense<0.000000e+00> : vector<128xf32>
      %16 = vector.multi_reduction <add>, %15, %cst_14 [0] : vector<56x128xf32> to vector<128xf32>
      %17 = vector.shape_cast %16 : vector<128xf32> to vector<1x128xf32>
      %18 = arith.mulf %15, %15 : vector<56x128xf32>
      %cst_15 = arith.constant dense<0.000000e+00> : vector<128xf32>
      %19 = vector.multi_reduction <add>, %18, %cst_15 [0] : vector<56x128xf32> to vector<128xf32>
      %20 = vector.shape_cast %19 : vector<128xf32> to vector<1x128xf32>
      %21 = vector.shape_cast %17 : vector<1x128xf32> to vector<1x128xf32>
      %22 = vector.broadcast %21 : vector<1x128xf32> to vector<8x128xf32>
      %c0_16 = arith.constant 0 : index
      %c0_17 = arith.constant 0 : index
      %23 = vector.load %arg6[%c0_16, %c0_17] : memref<8x128xf32, #tpu.memory_space<vmem>>, vector<8x128xf32>
      tpu.vector_store %arg6[%c0_16, %c0_17], %22 {strides = array<i32>} : memref<8x128xf32, #tpu.memory_space<vmem>>, vector<8x128xf32>,
      %24 = vector.shape_cast %20 : vector<1x128xf32> to vector<1x128xf32>
      %25 = vector.broadcast %24 : vector<1x128xf32> to vector<8x128xf32>
      %c0_18 = arith.constant 0 : index
      %c0_19 = arith.constant 0 : index
      %26 = vector.load %arg7[%c0_18, %c0_19] : memref<8x128xf32, #tpu.memory_space<vmem>>, vector<8x128xf32>
      tpu.vector_store %arg7[%c0_18, %c0_19], %25 {strides = array<i32>} : memref<8x128xf32, #tpu.memory_space<vmem>>, vector<8x128xf32>,
      %c0_20 = arith.constant 0 : index
      %c0_21 = arith.constant 0 : index
      %27 = vector.load %arg5[%c0_20, %c0_21] : memref<56x128xf32, #tpu.memory_space<vmem>>, vector<56x128xf32>
      tpu.vector_store %arg5[%c0_20, %c0_21], %15 {strides = array<i32>} : memref<56x128xf32, #tpu.memory_space<vmem>>, vector<56x128xf32>,
    } else {
    }
    return
  }
  func.func @transform_0(%arg0: i32, %arg1: i32) -> (i32, i32) {
    %c0_i32 = arith.constant 0 : i32
    return %arg0, %arg1 : i32, i32
  }
  func.func @transform_1(%arg0: i32, %arg1: i32) -> (i32, i32) {
    %c0_i32 = arith.constant 0 : i32
    %c0_i32_0 = arith.constant 0 : i32
    return %arg1, %c0_i32 : i32, i32
  }
  func.func @transform_2(%arg0: i32, %arg1: i32) -> (i32, i32) {
    %c0_i32 = arith.constant 0 : i32
    %c0_i32_0 = arith.constant 0 : i32
    %c0_i32_1 = arith.constant 0 : i32
    return %c0_i32, %c0_i32_0 : i32, i32
  }
  func.func @transform_3(%arg0: i32, %arg1: i32) -> (i32, i32) {
    %c0_i32 = arith.constant 0 : i32
    %c0_i32_0 = arith.constant 0 : i32
    return %arg0, %c0_i32 : i32, i32
  }
  func.func @transform_4(%arg0: i32, %arg1: i32) -> (i32, i32) {
    %c0_i32 = arith.constant 0 : i32
    %c0_i32_0 = arith.constant 0 : i32
    return %arg0, %c0_i32 : i32, i32
  }
  func.func @transform_5(%arg0: i32, %arg1: i32) -> (i32, i32) {
    %c0_i32 = arith.constant 0 : i32
    %c0_i32_0 = arith.constant 0 : i32
    return %arg0, %c0_i32 : i32, i32
  }
}

module attributes {stable_mosaic.version = 11 : i64} {
  func.func @_affine_lrelu_kernel(%arg0: i32, %arg1: memref<8x128xf32, #tpu.memory_space<vmem>>, %arg2: memref<1x128xf32, #tpu.memory_space<vmem>>, %arg3: memref<1x128xf32, #tpu.memory_space<vmem>>, %arg4: memref<8x128xf32, #tpu.memory_space<vmem>>) attributes {dimension_semantics = [#tpu.dimension_semantics<parallel>], iteration_bounds = array<i64: 1>, scalar_prefetch = 0 : i64, scratch_operands = 0 : i64, tpu.core_type = #tpu.core_type<tc>, window_params = [{transform_indices = @transform_0, window_bounds = array<i64: 8, 128>}, {pipeline_mode = #tpu.pipeline_mode<synchronous>, transform_indices = @transform_1, window_bounds = array<i64: 1, 128>}, {pipeline_mode = #tpu.pipeline_mode<synchronous>, transform_indices = @transform_2, window_bounds = array<i64: 1, 128>}, {transform_indices = @transform_3, window_bounds = array<i64: 8, 128>}]} {
    %c0 = arith.constant 0 : index
    %c0_0 = arith.constant 0 : index
    %0 = vector.load %arg1[%c0, %c0_0] : memref<8x128xf32, #tpu.memory_space<vmem>>, vector<8x128xf32>
    %c0_1 = arith.constant 0 : index
    %c0_2 = arith.constant 0 : index
    %1 = vector.load %arg2[%c0_1, %c0_2] : memref<1x128xf32, #tpu.memory_space<vmem>>, vector<1x128xf32>
    %2 = vector.broadcast %1 : vector<1x128xf32> to vector<8x128xf32>
    %3 = arith.mulf %0, %2 : vector<8x128xf32>
    %c0_3 = arith.constant 0 : index
    %c0_4 = arith.constant 0 : index
    %4 = vector.load %arg3[%c0_3, %c0_4] : memref<1x128xf32, #tpu.memory_space<vmem>>, vector<1x128xf32>
    %5 = vector.broadcast %4 : vector<1x128xf32> to vector<8x128xf32>
    %6 = arith.addf %3, %5 : vector<8x128xf32>
    %cst = arith.constant 0.000000e+00 : f32
    %7 = vector.broadcast %cst : f32 to vector<8x128xf32>
    %8 = arith.cmpf oge, %6, %7 : vector<8x128xf32>
    %cst_5 = arith.constant 2.000000e-01 : f32
    %9 = vector.broadcast %cst_5 : f32 to vector<8x128xf32>
    %10 = arith.mulf %9, %6 : vector<8x128xf32>
    %11 = arith.select %8, %6, %10 : vector<8x128xi1>, vector<8x128xf32>
    %c0_6 = arith.constant 0 : index
    %c0_7 = arith.constant 0 : index
    %12 = vector.load %arg4[%c0_6, %c0_7] : memref<8x128xf32, #tpu.memory_space<vmem>>, vector<8x128xf32>
    tpu.vector_store %arg4[%c0_6, %c0_7], %11 {strides = array<i32>} : memref<8x128xf32, #tpu.memory_space<vmem>>, vector<8x128xf32>,
    return
  }
  func.func @transform_0(%arg0: i32) -> (i32, i32) {
    %c0_i32 = arith.constant 0 : i32
    %c0_i32_0 = arith.constant 0 : i32
    return %arg0, %c0_i32 : i32, i32
  }
  func.func @transform_1(%arg0: i32) -> (i32, i32) {
    %c0_i32 = arith.constant 0 : i32
    %c0_i32_0 = arith.constant 0 : i32
    %c0_i32_1 = arith.constant 0 : i32
    return %c0_i32, %c0_i32_0 : i32, i32
  }
  func.func @transform_2(%arg0: i32) -> (i32, i32) {
    %c0_i32 = arith.constant 0 : i32
    %c0_i32_0 = arith.constant 0 : i32
    %c0_i32_1 = arith.constant 0 : i32
    return %c0_i32, %c0_i32_0 : i32, i32
  }
  func.func @transform_3(%arg0: i32) -> (i32, i32) {
    %c0_i32 = arith.constant 0 : i32
    %c0_i32_0 = arith.constant 0 : i32
    return %arg0, %c0_i32 : i32, i32
  }
}

module attributes {stable_mosaic.version = 11 : i64} {
  func.func @_conv_matmul_kernel(%arg0: i32, %arg1: i32, %arg2: memref<24x256xbf16, #tpu.memory_space<vmem>>, %arg3: memref<256x128xbf16, #tpu.memory_space<vmem>>, %arg4: memref<1x128xf32, #tpu.memory_space<vmem>>, %arg5: memref<24x128xf32, #tpu.memory_space<vmem>>, %arg6: memref<8x128xf32, #tpu.memory_space<vmem>>, %arg7: memref<8x128xf32, #tpu.memory_space<vmem>>) attributes {dimension_semantics = [#tpu.dimension_semantics<parallel>, #tpu.dimension_semantics<arbitrary>], iteration_bounds = array<i64: 1, 1>, scalar_prefetch = 0 : i64, scratch_operands = 0 : i64, tpu.core_type = #tpu.core_type<tc>, window_params = [{transform_indices = @transform_0, window_bounds = array<i64: 24, 256>}, {transform_indices = @transform_1, window_bounds = array<i64: 256, 128>}, {pipeline_mode = #tpu.pipeline_mode<synchronous>, transform_indices = @transform_2, window_bounds = array<i64: 1, 128>}, {transform_indices = @transform_3, window_bounds = array<i64: 24, 128>}, {transform_indices = @transform_4, window_bounds = array<i64: 8, 128>}, {transform_indices = @transform_5, window_bounds = array<i64: 8, 128>}]} {
    %c0_i32 = arith.constant 0 : i32
    %0 = arith.cmpi eq, %arg1, %c0_i32 : i32
    %1 = arith.extui %0 : i1 to i32
    %c0_i32_0 = arith.constant 0 : i32
    %2 = arith.cmpi ne, %1, %c0_i32_0 : i32
    scf.if %2 {
      %cst_10 = arith.constant 0.000000e+00 : f32
      %12 = vector.broadcast %cst_10 : f32 to vector<24x128xf32>
      %c0_11 = arith.constant 0 : index
      %c0_12 = arith.constant 0 : index
      %13 = vector.load %arg5[%c0_11, %c0_12] : memref<24x128xf32, #tpu.memory_space<vmem>>, vector<24x128xf32>
      tpu.vector_store %arg5[%c0_11, %c0_12], %12 {strides = array<i32>} : memref<24x128xf32, #tpu.memory_space<vmem>>, vector<24x128xf32>,
    } else {
    }
    %c0 = arith.constant 0 : index
    %c0_1 = arith.constant 0 : index
    %3 = vector.load %arg5[%c0, %c0_1] : memref<24x128xf32, #tpu.memory_space<vmem>>, vector<24x128xf32>
    %c0_2 = arith.constant 0 : index
    %c0_3 = arith.constant 0 : index
    %4 = vector.load %arg2[%c0_2, %c0_3] : memref<24x256xbf16, #tpu.memory_space<vmem>>, vector<24x256xbf16>
    %c0_4 = arith.constant 0 : index
    %c0_5 = arith.constant 0 : index
    %5 = vector.load %arg3[%c0_4, %c0_5] : memref<256x128xbf16, #tpu.memory_space<vmem>>, vector<256x128xbf16>
    %cst = arith.constant dense<0.000000e+00> : vector<24x128xf32>
    %6 = tpu.matmul %4, %5, %cst {dimension_numbers = #tpu.dot_dimension_numbers<[1], [0], [0], [1], [0, 0, 1, 1], [], []>} : vector<24x256xbf16>, vector<256x128xbf16>, vector<24x128xf32> -> vector<24x128xf32>
    %7 = arith.addf %3, %6 : vector<24x128xf32>
    %c0_6 = arith.constant 0 : index
    %c0_7 = arith.constant 0 : index
    %8 = vector.load %arg5[%c0_6, %c0_7] : memref<24x128xf32, #tpu.memory_space<vmem>>, vector<24x128xf32>
    tpu.vector_store %arg5[%c0_6, %c0_7], %7 {strides = array<i32>} : memref<24x128xf32, #tpu.memory_space<vmem>>, vector<24x128xf32>,
    %c0_i32_8 = arith.constant 0 : i32
    %9 = arith.cmpi eq, %arg1, %c0_i32_8 : i32
    %10 = arith.extui %9 : i1 to i32
    %c0_i32_9 = arith.constant 0 : i32
    %11 = arith.cmpi ne, %10, %c0_i32_9 : i32
    scf.if %11 {
      %c0_10 = arith.constant 0 : index
      %c0_11 = arith.constant 0 : index
      %12 = vector.load %arg5[%c0_10, %c0_11] : memref<24x128xf32, #tpu.memory_space<vmem>>, vector<24x128xf32>
      %c0_12 = arith.constant 0 : index
      %c0_13 = arith.constant 0 : index
      %13 = vector.load %arg4[%c0_12, %c0_13] : memref<1x128xf32, #tpu.memory_space<vmem>>, vector<1x128xf32>
      %14 = vector.broadcast %13 : vector<1x128xf32> to vector<24x128xf32>
      %15 = arith.addf %12, %14 : vector<24x128xf32>
      %cst_14 = arith.constant dense<0.000000e+00> : vector<128xf32>
      %16 = vector.multi_reduction <add>, %15, %cst_14 [0] : vector<24x128xf32> to vector<128xf32>
      %17 = vector.shape_cast %16 : vector<128xf32> to vector<1x128xf32>
      %18 = arith.mulf %15, %15 : vector<24x128xf32>
      %cst_15 = arith.constant dense<0.000000e+00> : vector<128xf32>
      %19 = vector.multi_reduction <add>, %18, %cst_15 [0] : vector<24x128xf32> to vector<128xf32>
      %20 = vector.shape_cast %19 : vector<128xf32> to vector<1x128xf32>
      %21 = vector.shape_cast %17 : vector<1x128xf32> to vector<1x128xf32>
      %22 = vector.broadcast %21 : vector<1x128xf32> to vector<8x128xf32>
      %c0_16 = arith.constant 0 : index
      %c0_17 = arith.constant 0 : index
      %23 = vector.load %arg6[%c0_16, %c0_17] : memref<8x128xf32, #tpu.memory_space<vmem>>, vector<8x128xf32>
      tpu.vector_store %arg6[%c0_16, %c0_17], %22 {strides = array<i32>} : memref<8x128xf32, #tpu.memory_space<vmem>>, vector<8x128xf32>,
      %24 = vector.shape_cast %20 : vector<1x128xf32> to vector<1x128xf32>
      %25 = vector.broadcast %24 : vector<1x128xf32> to vector<8x128xf32>
      %c0_18 = arith.constant 0 : index
      %c0_19 = arith.constant 0 : index
      %26 = vector.load %arg7[%c0_18, %c0_19] : memref<8x128xf32, #tpu.memory_space<vmem>>, vector<8x128xf32>
      tpu.vector_store %arg7[%c0_18, %c0_19], %25 {strides = array<i32>} : memref<8x128xf32, #tpu.memory_space<vmem>>, vector<8x128xf32>,
      %c0_20 = arith.constant 0 : index
      %c0_21 = arith.constant 0 : index
      %27 = vector.load %arg5[%c0_20, %c0_21] : memref<24x128xf32, #tpu.memory_space<vmem>>, vector<24x128xf32>
      tpu.vector_store %arg5[%c0_20, %c0_21], %15 {strides = array<i32>} : memref<24x128xf32, #tpu.memory_space<vmem>>, vector<24x128xf32>,
    } else {
    }
    return
  }
  func.func @transform_0(%arg0: i32, %arg1: i32) -> (i32, i32) {
    %c0_i32 = arith.constant 0 : i32
    return %arg0, %arg1 : i32, i32
  }
  func.func @transform_1(%arg0: i32, %arg1: i32) -> (i32, i32) {
    %c0_i32 = arith.constant 0 : i32
    %c0_i32_0 = arith.constant 0 : i32
    return %arg1, %c0_i32 : i32, i32
  }
  func.func @transform_2(%arg0: i32, %arg1: i32) -> (i32, i32) {
    %c0_i32 = arith.constant 0 : i32
    %c0_i32_0 = arith.constant 0 : i32
    %c0_i32_1 = arith.constant 0 : i32
    return %c0_i32, %c0_i32_0 : i32, i32
  }
  func.func @transform_3(%arg0: i32, %arg1: i32) -> (i32, i32) {
    %c0_i32 = arith.constant 0 : i32
    %c0_i32_0 = arith.constant 0 : i32
    return %arg0, %c0_i32 : i32, i32
  }
  func.func @transform_4(%arg0: i32, %arg1: i32) -> (i32, i32) {
    %c0_i32 = arith.constant 0 : i32
    %c0_i32_0 = arith.constant 0 : i32
    return %arg0, %c0_i32 : i32, i32
  }
  func.func @transform_5(%arg0: i32, %arg1: i32) -> (i32, i32) {
    %c0_i32 = arith.constant 0 : i32
    %c0_i32_0 = arith.constant 0 : i32
    return %arg0, %c0_i32 : i32, i32
  }
}

module attributes {stable_mosaic.version = 11 : i64} {
  func.func @_conv_matmul_kernel(%arg0: i32, %arg1: i32, %arg2: memref<32x512xbf16, #tpu.memory_space<vmem>>, %arg3: memref<512x128xbf16, #tpu.memory_space<vmem>>, %arg4: memref<1x128xf32, #tpu.memory_space<vmem>>, %arg5: memref<32x128xf32, #tpu.memory_space<vmem>>, %arg6: memref<8x128xf32, #tpu.memory_space<vmem>>, %arg7: memref<8x128xf32, #tpu.memory_space<vmem>>) attributes {dimension_semantics = [#tpu.dimension_semantics<parallel>, #tpu.dimension_semantics<arbitrary>], iteration_bounds = array<i64: 1, 1>, scalar_prefetch = 0 : i64, scratch_operands = 0 : i64, tpu.core_type = #tpu.core_type<tc>, window_params = [{transform_indices = @transform_0, window_bounds = array<i64: 32, 512>}, {transform_indices = @transform_1, window_bounds = array<i64: 512, 128>}, {pipeline_mode = #tpu.pipeline_mode<synchronous>, transform_indices = @transform_2, window_bounds = array<i64: 1, 128>}, {transform_indices = @transform_3, window_bounds = array<i64: 32, 128>}, {transform_indices = @transform_4, window_bounds = array<i64: 8, 128>}, {transform_indices = @transform_5, window_bounds = array<i64: 8, 128>}]} {
    %c0_i32 = arith.constant 0 : i32
    %0 = arith.cmpi eq, %arg1, %c0_i32 : i32
    %1 = arith.extui %0 : i1 to i32
    %c0_i32_0 = arith.constant 0 : i32
    %2 = arith.cmpi ne, %1, %c0_i32_0 : i32
    scf.if %2 {
      %cst_10 = arith.constant 0.000000e+00 : f32
      %12 = vector.broadcast %cst_10 : f32 to vector<32x128xf32>
      %c0_11 = arith.constant 0 : index
      %c0_12 = arith.constant 0 : index
      %13 = vector.load %arg5[%c0_11, %c0_12] : memref<32x128xf32, #tpu.memory_space<vmem>>, vector<32x128xf32>
      tpu.vector_store %arg5[%c0_11, %c0_12], %12 {strides = array<i32>} : memref<32x128xf32, #tpu.memory_space<vmem>>, vector<32x128xf32>,
    } else {
    }
    %c0 = arith.constant 0 : index
    %c0_1 = arith.constant 0 : index
    %3 = vector.load %arg5[%c0, %c0_1] : memref<32x128xf32, #tpu.memory_space<vmem>>, vector<32x128xf32>
    %c0_2 = arith.constant 0 : index
    %c0_3 = arith.constant 0 : index
    %4 = vector.load %arg2[%c0_2, %c0_3] : memref<32x512xbf16, #tpu.memory_space<vmem>>, vector<32x512xbf16>
    %c0_4 = arith.constant 0 : index
    %c0_5 = arith.constant 0 : index
    %5 = vector.load %arg3[%c0_4, %c0_5] : memref<512x128xbf16, #tpu.memory_space<vmem>>, vector<512x128xbf16>
    %cst = arith.constant dense<0.000000e+00> : vector<32x128xf32>
    %6 = tpu.matmul %4, %5, %cst {dimension_numbers = #tpu.dot_dimension_numbers<[1], [0], [0], [1], [0, 0, 1, 1], [], []>} : vector<32x512xbf16>, vector<512x128xbf16>, vector<32x128xf32> -> vector<32x128xf32>
    %7 = arith.addf %3, %6 : vector<32x128xf32>
    %c0_6 = arith.constant 0 : index
    %c0_7 = arith.constant 0 : index
    %8 = vector.load %arg5[%c0_6, %c0_7] : memref<32x128xf32, #tpu.memory_space<vmem>>, vector<32x128xf32>
    tpu.vector_store %arg5[%c0_6, %c0_7], %7 {strides = array<i32>} : memref<32x128xf32, #tpu.memory_space<vmem>>, vector<32x128xf32>,
    %c0_i32_8 = arith.constant 0 : i32
    %9 = arith.cmpi eq, %arg1, %c0_i32_8 : i32
    %10 = arith.extui %9 : i1 to i32
    %c0_i32_9 = arith.constant 0 : i32
    %11 = arith.cmpi ne, %10, %c0_i32_9 : i32
    scf.if %11 {
      %c0_10 = arith.constant 0 : index
      %c0_11 = arith.constant 0 : index
      %12 = vector.load %arg5[%c0_10, %c0_11] : memref<32x128xf32, #tpu.memory_space<vmem>>, vector<32x128xf32>
      %c0_12 = arith.constant 0 : index
      %c0_13 = arith.constant 0 : index
      %13 = vector.load %arg4[%c0_12, %c0_13] : memref<1x128xf32, #tpu.memory_space<vmem>>, vector<1x128xf32>
      %14 = vector.broadcast %13 : vector<1x128xf32> to vector<32x128xf32>
      %15 = arith.addf %12, %14 : vector<32x128xf32>
      %cst_14 = arith.constant dense<0.000000e+00> : vector<128xf32>
      %16 = vector.multi_reduction <add>, %15, %cst_14 [0] : vector<32x128xf32> to vector<128xf32>
      %17 = vector.shape_cast %16 : vector<128xf32> to vector<1x128xf32>
      %18 = arith.mulf %15, %15 : vector<32x128xf32>
      %cst_15 = arith.constant dense<0.000000e+00> : vector<128xf32>
      %19 = vector.multi_reduction <add>, %18, %cst_15 [0] : vector<32x128xf32> to vector<128xf32>
      %20 = vector.shape_cast %19 : vector<128xf32> to vector<1x128xf32>
      %21 = vector.shape_cast %17 : vector<1x128xf32> to vector<1x128xf32>
      %22 = vector.broadcast %21 : vector<1x128xf32> to vector<8x128xf32>
      %c0_16 = arith.constant 0 : index
      %c0_17 = arith.constant 0 : index
      %23 = vector.load %arg6[%c0_16, %c0_17] : memref<8x128xf32, #tpu.memory_space<vmem>>, vector<8x128xf32>
      tpu.vector_store %arg6[%c0_16, %c0_17], %22 {strides = array<i32>} : memref<8x128xf32, #tpu.memory_space<vmem>>, vector<8x128xf32>,
      %24 = vector.shape_cast %20 : vector<1x128xf32> to vector<1x128xf32>
      %25 = vector.broadcast %24 : vector<1x128xf32> to vector<8x128xf32>
      %c0_18 = arith.constant 0 : index
      %c0_19 = arith.constant 0 : index
      %26 = vector.load %arg7[%c0_18, %c0_19] : memref<8x128xf32, #tpu.memory_space<vmem>>, vector<8x128xf32>
      tpu.vector_store %arg7[%c0_18, %c0_19], %25 {strides = array<i32>} : memref<8x128xf32, #tpu.memory_space<vmem>>, vector<8x128xf32>,
      %c0_20 = arith.constant 0 : index
      %c0_21 = arith.constant 0 : index
      %27 = vector.load %arg5[%c0_20, %c0_21] : memref<32x128xf32, #tpu.memory_space<vmem>>, vector<32x128xf32>
      tpu.vector_store %arg5[%c0_20, %c0_21], %15 {strides = array<i32>} : memref<32x128xf32, #tpu.memory_space<vmem>>, vector<32x128xf32>,
    } else {
    }
    return
  }
  func.func @transform_0(%arg0: i32, %arg1: i32) -> (i32, i32) {
    %c0_i32 = arith.constant 0 : i32
    return %arg0, %arg1 : i32, i32
  }
  func.func @transform_1(%arg0: i32, %arg1: i32) -> (i32, i32) {
    %c0_i32 = arith.constant 0 : i32
    %c0_i32_0 = arith.constant 0 : i32
    return %arg1, %c0_i32 : i32, i32
  }
  func.func @transform_2(%arg0: i32, %arg1: i32) -> (i32, i32) {
    %c0_i32 = arith.constant 0 : i32
    %c0_i32_0 = arith.constant 0 : i32
    %c0_i32_1 = arith.constant 0 : i32
    return %c0_i32, %c0_i32_0 : i32, i32
  }
  func.func @transform_3(%arg0: i32, %arg1: i32) -> (i32, i32) {
    %c0_i32 = arith.constant 0 : i32
    %c0_i32_0 = arith.constant 0 : i32
    return %arg0, %c0_i32 : i32, i32
  }
  func.func @transform_4(%arg0: i32, %arg1: i32) -> (i32, i32) {
    %c0_i32 = arith.constant 0 : i32
    %c0_i32_0 = arith.constant 0 : i32
    return %arg0, %c0_i32 : i32, i32
  }
  func.func @transform_5(%arg0: i32, %arg1: i32) -> (i32, i32) {
    %c0_i32 = arith.constant 0 : i32
    %c0_i32_0 = arith.constant 0 : i32
    return %arg0, %c0_i32 : i32, i32
  }
}

module attributes {stable_mosaic.version = 11 : i64} {
  func.func @_affine_lrelu_kernel(%arg0: i32, %arg1: memref<16x128xf32, #tpu.memory_space<vmem>>, %arg2: memref<1x128xf32, #tpu.memory_space<vmem>>, %arg3: memref<1x128xf32, #tpu.memory_space<vmem>>, %arg4: memref<16x128xf32, #tpu.memory_space<vmem>>) attributes {dimension_semantics = [#tpu.dimension_semantics<parallel>], iteration_bounds = array<i64: 1>, scalar_prefetch = 0 : i64, scratch_operands = 0 : i64, tpu.core_type = #tpu.core_type<tc>, window_params = [{transform_indices = @transform_0, window_bounds = array<i64: 16, 128>}, {pipeline_mode = #tpu.pipeline_mode<synchronous>, transform_indices = @transform_1, window_bounds = array<i64: 1, 128>}, {pipeline_mode = #tpu.pipeline_mode<synchronous>, transform_indices = @transform_2, window_bounds = array<i64: 1, 128>}, {transform_indices = @transform_3, window_bounds = array<i64: 16, 128>}]} {
    %c0 = arith.constant 0 : index
    %c0_0 = arith.constant 0 : index
    %0 = vector.load %arg1[%c0, %c0_0] : memref<16x128xf32, #tpu.memory_space<vmem>>, vector<16x128xf32>
    %c0_1 = arith.constant 0 : index
    %c0_2 = arith.constant 0 : index
    %1 = vector.load %arg2[%c0_1, %c0_2] : memref<1x128xf32, #tpu.memory_space<vmem>>, vector<1x128xf32>
    %2 = vector.broadcast %1 : vector<1x128xf32> to vector<16x128xf32>
    %3 = arith.mulf %0, %2 : vector<16x128xf32>
    %c0_3 = arith.constant 0 : index
    %c0_4 = arith.constant 0 : index
    %4 = vector.load %arg3[%c0_3, %c0_4] : memref<1x128xf32, #tpu.memory_space<vmem>>, vector<1x128xf32>
    %5 = vector.broadcast %4 : vector<1x128xf32> to vector<16x128xf32>
    %6 = arith.addf %3, %5 : vector<16x128xf32>
    %cst = arith.constant 0.000000e+00 : f32
    %7 = vector.broadcast %cst : f32 to vector<16x128xf32>
    %8 = arith.cmpf oge, %6, %7 : vector<16x128xf32>
    %cst_5 = arith.constant 2.000000e-01 : f32
    %9 = vector.broadcast %cst_5 : f32 to vector<16x128xf32>
    %10 = arith.mulf %9, %6 : vector<16x128xf32>
    %11 = arith.select %8, %6, %10 : vector<16x128xi1>, vector<16x128xf32>
    %c0_6 = arith.constant 0 : index
    %c0_7 = arith.constant 0 : index
    %12 = vector.load %arg4[%c0_6, %c0_7] : memref<16x128xf32, #tpu.memory_space<vmem>>, vector<16x128xf32>
    tpu.vector_store %arg4[%c0_6, %c0_7], %11 {strides = array<i32>} : memref<16x128xf32, #tpu.memory_space<vmem>>, vector<16x128xf32>,
    return
  }
  func.func @transform_0(%arg0: i32) -> (i32, i32) {
    %c0_i32 = arith.constant 0 : i32
    %c0_i32_0 = arith.constant 0 : i32
    return %arg0, %c0_i32 : i32, i32
  }
  func.func @transform_1(%arg0: i32) -> (i32, i32) {
    %c0_i32 = arith.constant 0 : i32
    %c0_i32_0 = arith.constant 0 : i32
    %c0_i32_1 = arith.constant 0 : i32
    return %c0_i32, %c0_i32_0 : i32, i32
  }
  func.func @transform_2(%arg0: i32) -> (i32, i32) {
    %c0_i32 = arith.constant 0 : i32
    %c0_i32_0 = arith.constant 0 : i32
    %c0_i32_1 = arith.constant 0 : i32
    return %c0_i32, %c0_i32_0 : i32, i32
  }
  func.func @transform_3(%arg0: i32) -> (i32, i32) {
    %c0_i32 = arith.constant 0 : i32
    %c0_i32_0 = arith.constant 0 : i32
    return %arg0, %c0_i32 : i32, i32
  }
}

module attributes {stable_mosaic.version = 11 : i64} {
  func.func @_conv_matmul_kernel(%arg0: i32, %arg1: i32, %arg2: memref<56x512xbf16, #tpu.memory_space<vmem>>, %arg3: memref<512x128xbf16, #tpu.memory_space<vmem>>, %arg4: memref<1x128xf32, #tpu.memory_space<vmem>>, %arg5: memref<56x128xf32, #tpu.memory_space<vmem>>, %arg6: memref<8x128xf32, #tpu.memory_space<vmem>>, %arg7: memref<8x128xf32, #tpu.memory_space<vmem>>) attributes {dimension_semantics = [#tpu.dimension_semantics<parallel>, #tpu.dimension_semantics<arbitrary>], iteration_bounds = array<i64: 1, 2>, scalar_prefetch = 0 : i64, scratch_operands = 0 : i64, tpu.core_type = #tpu.core_type<tc>, window_params = [{transform_indices = @transform_0, window_bounds = array<i64: 56, 512>}, {transform_indices = @transform_1, window_bounds = array<i64: 512, 128>}, {pipeline_mode = #tpu.pipeline_mode<synchronous>, transform_indices = @transform_2, window_bounds = array<i64: 1, 128>}, {transform_indices = @transform_3, window_bounds = array<i64: 56, 128>}, {transform_indices = @transform_4, window_bounds = array<i64: 8, 128>}, {transform_indices = @transform_5, window_bounds = array<i64: 8, 128>}]} {
    %c0_i32 = arith.constant 0 : i32
    %0 = arith.cmpi eq, %arg1, %c0_i32 : i32
    %1 = arith.extui %0 : i1 to i32
    %c0_i32_0 = arith.constant 0 : i32
    %2 = arith.cmpi ne, %1, %c0_i32_0 : i32
    scf.if %2 {
      %cst_9 = arith.constant 0.000000e+00 : f32
      %12 = vector.broadcast %cst_9 : f32 to vector<56x128xf32>
      %c0_10 = arith.constant 0 : index
      %c0_11 = arith.constant 0 : index
      %13 = vector.load %arg5[%c0_10, %c0_11] : memref<56x128xf32, #tpu.memory_space<vmem>>, vector<56x128xf32>
      tpu.vector_store %arg5[%c0_10, %c0_11], %12 {strides = array<i32>} : memref<56x128xf32, #tpu.memory_space<vmem>>, vector<56x128xf32>,
    } else {
    }
    %c0 = arith.constant 0 : index
    %c0_1 = arith.constant 0 : index
    %3 = vector.load %arg5[%c0, %c0_1] : memref<56x128xf32, #tpu.memory_space<vmem>>, vector<56x128xf32>
    %c0_2 = arith.constant 0 : index
    %c0_3 = arith.constant 0 : index
    %4 = vector.load %arg2[%c0_2, %c0_3] : memref<56x512xbf16, #tpu.memory_space<vmem>>, vector<56x512xbf16>
    %c0_4 = arith.constant 0 : index
    %c0_5 = arith.constant 0 : index
    %5 = vector.load %arg3[%c0_4, %c0_5] : memref<512x128xbf16, #tpu.memory_space<vmem>>, vector<512x128xbf16>
    %cst = arith.constant dense<0.000000e+00> : vector<56x128xf32>
    %6 = tpu.matmul %4, %5, %cst {dimension_numbers = #tpu.dot_dimension_numbers<[1], [0], [0], [1], [0, 0, 1, 1], [], []>} : vector<56x512xbf16>, vector<512x128xbf16>, vector<56x128xf32> -> vector<56x128xf32>
    %7 = arith.addf %3, %6 : vector<56x128xf32>
    %c0_6 = arith.constant 0 : index
    %c0_7 = arith.constant 0 : index
    %8 = vector.load %arg5[%c0_6, %c0_7] : memref<56x128xf32, #tpu.memory_space<vmem>>, vector<56x128xf32>
    tpu.vector_store %arg5[%c0_6, %c0_7], %7 {strides = array<i32>} : memref<56x128xf32, #tpu.memory_space<vmem>>, vector<56x128xf32>,
    %c1_i32 = arith.constant 1 : i32
    %9 = arith.cmpi eq, %arg1, %c1_i32 : i32
    %10 = arith.extui %9 : i1 to i32
    %c0_i32_8 = arith.constant 0 : i32
    %11 = arith.cmpi ne, %10, %c0_i32_8 : i32
    scf.if %11 {
      %c0_9 = arith.constant 0 : index
      %c0_10 = arith.constant 0 : index
      %12 = vector.load %arg5[%c0_9, %c0_10] : memref<56x128xf32, #tpu.memory_space<vmem>>, vector<56x128xf32>
      %c0_11 = arith.constant 0 : index
      %c0_12 = arith.constant 0 : index
      %13 = vector.load %arg4[%c0_11, %c0_12] : memref<1x128xf32, #tpu.memory_space<vmem>>, vector<1x128xf32>
      %14 = vector.broadcast %13 : vector<1x128xf32> to vector<56x128xf32>
      %15 = arith.addf %12, %14 : vector<56x128xf32>
      %cst_13 = arith.constant 0.000000e+00 : f32
      %16 = vector.broadcast %cst_13 : f32 to vector<8x128xf32>
      %c0_14 = arith.constant 0 : index
      %c0_15 = arith.constant 0 : index
      %17 = vector.load %arg6[%c0_14, %c0_15] : memref<8x128xf32, #tpu.memory_space<vmem>>, vector<8x128xf32>
      tpu.vector_store %arg6[%c0_14, %c0_15], %16 {strides = array<i32>} : memref<8x128xf32, #tpu.memory_space<vmem>>, vector<8x128xf32>,
      %cst_16 = arith.constant 0.000000e+00 : f32
      %18 = vector.broadcast %cst_16 : f32 to vector<8x128xf32>
      %c0_17 = arith.constant 0 : index
      %c0_18 = arith.constant 0 : index
      %19 = vector.load %arg7[%c0_17, %c0_18] : memref<8x128xf32, #tpu.memory_space<vmem>>, vector<8x128xf32>
      tpu.vector_store %arg7[%c0_17, %c0_18], %18 {strides = array<i32>} : memref<8x128xf32, #tpu.memory_space<vmem>>, vector<8x128xf32>,
      %c0_19 = arith.constant 0 : index
      %c0_20 = arith.constant 0 : index
      %20 = vector.load %arg5[%c0_19, %c0_20] : memref<56x128xf32, #tpu.memory_space<vmem>>, vector<56x128xf32>
      tpu.vector_store %arg5[%c0_19, %c0_20], %15 {strides = array<i32>} : memref<56x128xf32, #tpu.memory_space<vmem>>, vector<56x128xf32>,
    } else {
    }
    return
  }
  func.func @transform_0(%arg0: i32, %arg1: i32) -> (i32, i32) {
    %c0_i32 = arith.constant 0 : i32
    return %arg0, %arg1 : i32, i32
  }
  func.func @transform_1(%arg0: i32, %arg1: i32) -> (i32, i32) {
    %c0_i32 = arith.constant 0 : i32
    %c0_i32_0 = arith.constant 0 : i32
    return %arg1, %c0_i32 : i32, i32
  }
  func.func @transform_2(%arg0: i32, %arg1: i32) -> (i32, i32) {
    %c0_i32 = arith.constant 0 : i32
    %c0_i32_0 = arith.constant 0 : i32
    %c0_i32_1 = arith.constant 0 : i32
    return %c0_i32, %c0_i32_0 : i32, i32
  }
  func.func @transform_3(%arg0: i32, %arg1: i32) -> (i32, i32) {
    %c0_i32 = arith.constant 0 : i32
    %c0_i32_0 = arith.constant 0 : i32
    return %arg0, %c0_i32 : i32, i32
  }
  func.func @transform_4(%arg0: i32, %arg1: i32) -> (i32, i32) {
    %c0_i32 = arith.constant 0 : i32
    %c0_i32_0 = arith.constant 0 : i32
    return %arg0, %c0_i32 : i32, i32
  }
  func.func @transform_5(%arg0: i32, %arg1: i32) -> (i32, i32) {
    %c0_i32 = arith.constant 0 : i32
    %c0_i32_0 = arith.constant 0 : i32
    return %arg0, %c0_i32 : i32, i32
  }
}

module attributes {stable_mosaic.version = 11 : i64} {
  func.func @_avgpool_kernel(%arg0: i32, %arg1: i32, %arg2: memref<1x8x8xf32, #tpu.memory_space<vmem>>, %arg3: memref<1x8x8xf32, #tpu.memory_space<vmem>>, %arg4: memref<1x8x8xf32, #tpu.memory_space<vmem>>, %arg5: memref<1x8x8xf32, #tpu.memory_space<vmem>>, %arg6: memref<1x8x8xf32, #tpu.memory_space<vmem>>, %arg7: memref<1x8x8xf32, #tpu.memory_space<vmem>>, %arg8: memref<1x8x8xf32, #tpu.memory_space<vmem>>, %arg9: memref<1x8x8xf32, #tpu.memory_space<vmem>>, %arg10: memref<1x8x8xf32, #tpu.memory_space<vmem>>, %arg11: memref<8x8xf32, #tpu.memory_space<vmem>>, %arg12: memref<1x8x8xf32, #tpu.memory_space<vmem>>) attributes {dimension_semantics = [#tpu.dimension_semantics<parallel>, #tpu.dimension_semantics<arbitrary>], iteration_bounds = array<i64: 8, 1>, scalar_prefetch = 0 : i64, scratch_operands = 0 : i64, tpu.core_type = #tpu.core_type<tc>, window_params = [{transform_indices = @transform_0, window_bounds = array<i64: 1, 8, 8>}, {transform_indices = @transform_1, window_bounds = array<i64: 1, 8, 8>}, {transform_indices = @transform_2, window_bounds = array<i64: 1, 8, 8>}, {transform_indices = @transform_3, window_bounds = array<i64: 1, 8, 8>}, {transform_indices = @transform_4, window_bounds = array<i64: 1, 8, 8>}, {transform_indices = @transform_5, window_bounds = array<i64: 1, 8, 8>}, {transform_indices = @transform_6, window_bounds = array<i64: 1, 8, 8>}, {transform_indices = @transform_7, window_bounds = array<i64: 1, 8, 8>}, {transform_indices = @transform_8, window_bounds = array<i64: 1, 8, 8>}, {transform_indices = @transform_9, window_bounds = array<i64: 8, 8>}, {transform_indices = @transform_10, window_bounds = array<i64: 1, 8, 8>}]} {
    %c0 = arith.constant 0 : index
    %c0_0 = arith.constant 0 : index
    %c0_1 = arith.constant 0 : index
    %0 = vector.load %arg2[%c0, %c0_0, %c0_1] : memref<1x8x8xf32, #tpu.memory_space<vmem>>, vector<1x8x8xf32>
    %1 = vector.shape_cast %0 : vector<1x8x8xf32> to vector<8x8xf32>
    %c0_2 = arith.constant 0 : index
    %c0_3 = arith.constant 0 : index
    %c0_4 = arith.constant 0 : index
    %2 = vector.load %arg3[%c0_2, %c0_3, %c0_4] : memref<1x8x8xf32, #tpu.memory_space<vmem>>, vector<1x8x8xf32>
    %3 = vector.shape_cast %2 : vector<1x8x8xf32> to vector<8x8xf32>
    %4 = arith.addf %1, %3 : vector<8x8xf32>
    %c0_5 = arith.constant 0 : index
    %c0_6 = arith.constant 0 : index
    %c0_7 = arith.constant 0 : index
    %5 = vector.load %arg4[%c0_5, %c0_6, %c0_7] : memref<1x8x8xf32, #tpu.memory_space<vmem>>, vector<1x8x8xf32>
    %6 = vector.shape_cast %5 : vector<1x8x8xf32> to vector<8x8xf32>
    %7 = arith.addf %4, %6 : vector<8x8xf32>
    %c0_8 = arith.constant 0 : index
    %c0_9 = arith.constant 0 : index
    %c0_10 = arith.constant 0 : index
    %8 = vector.load %arg5[%c0_8, %c0_9, %c0_10] : memref<1x8x8xf32, #tpu.memory_space<vmem>>, vector<1x8x8xf32>
    %9 = vector.shape_cast %8 : vector<1x8x8xf32> to vector<8x8xf32>
    %10 = arith.addf %7, %9 : vector<8x8xf32>
    %c0_11 = arith.constant 0 : index
    %c0_12 = arith.constant 0 : index
    %c0_13 = arith.constant 0 : index
    %11 = vector.load %arg6[%c0_11, %c0_12, %c0_13] : memref<1x8x8xf32, #tpu.memory_space<vmem>>, vector<1x8x8xf32>
    %12 = vector.shape_cast %11 : vector<1x8x8xf32> to vector<8x8xf32>
    %13 = arith.addf %10, %12 : vector<8x8xf32>
    %c0_14 = arith.constant 0 : index
    %c0_15 = arith.constant 0 : index
    %c0_16 = arith.constant 0 : index
    %14 = vector.load %arg7[%c0_14, %c0_15, %c0_16] : memref<1x8x8xf32, #tpu.memory_space<vmem>>, vector<1x8x8xf32>
    %15 = vector.shape_cast %14 : vector<1x8x8xf32> to vector<8x8xf32>
    %16 = arith.addf %13, %15 : vector<8x8xf32>
    %c0_17 = arith.constant 0 : index
    %c0_18 = arith.constant 0 : index
    %c0_19 = arith.constant 0 : index
    %17 = vector.load %arg8[%c0_17, %c0_18, %c0_19] : memref<1x8x8xf32, #tpu.memory_space<vmem>>, vector<1x8x8xf32>
    %18 = vector.shape_cast %17 : vector<1x8x8xf32> to vector<8x8xf32>
    %19 = arith.addf %16, %18 : vector<8x8xf32>
    %c0_20 = arith.constant 0 : index
    %c0_21 = arith.constant 0 : index
    %c0_22 = arith.constant 0 : index
    %20 = vector.load %arg9[%c0_20, %c0_21, %c0_22] : memref<1x8x8xf32, #tpu.memory_space<vmem>>, vector<1x8x8xf32>
    %21 = vector.shape_cast %20 : vector<1x8x8xf32> to vector<8x8xf32>
    %22 = arith.addf %19, %21 : vector<8x8xf32>
    %c0_23 = arith.constant 0 : index
    %c0_24 = arith.constant 0 : index
    %c0_25 = arith.constant 0 : index
    %23 = vector.load %arg10[%c0_23, %c0_24, %c0_25] : memref<1x8x8xf32, #tpu.memory_space<vmem>>, vector<1x8x8xf32>
    %24 = vector.shape_cast %23 : vector<1x8x8xf32> to vector<8x8xf32>
    %25 = arith.addf %22, %24 : vector<8x8xf32>
    %c0_26 = arith.constant 0 : index
    %c0_27 = arith.constant 0 : index
    %26 = vector.load %arg11[%c0_26, %c0_27] : memref<8x8xf32, #tpu.memory_space<vmem>>, vector<8x8xf32>
    %27 = arith.mulf %25, %26 : vector<8x8xf32>
    %c0_28 = arith.constant 0 : index
    %c0_29 = arith.constant 0 : index
    %c0_30 = arith.constant 0 : index
    %28 = vector.load %arg12[%c0_28, %c0_29, %c0_30] : memref<1x8x8xf32, #tpu.memory_space<vmem>>, vector<1x8x8xf32>
    %29 = vector.shape_cast %28 : vector<1x8x8xf32> to vector<8x8xf32>
    %30 = vector.shape_cast %27 : vector<8x8xf32> to vector<1x8x8xf32>
    tpu.vector_store %arg12[%c0_28, %c0_29, %c0_30], %30 {strides = array<i32>} : memref<1x8x8xf32, #tpu.memory_space<vmem>>, vector<1x8x8xf32>,
    return
  }
  func.func @transform_0(%arg0: i32, %arg1: i32) -> (i32, i32, i32) {
    %c0_i32 = arith.constant 0 : i32
    %c0_i32_0 = arith.constant 0 : i32
    return %arg0, %arg1, %c0_i32 : i32, i32, i32
  }
  func.func @transform_1(%arg0: i32, %arg1: i32) -> (i32, i32, i32) {
    %c0_i32 = arith.constant 0 : i32
    %c0_i32_0 = arith.constant 0 : i32
    return %arg0, %arg1, %c0_i32 : i32, i32, i32
  }
  func.func @transform_2(%arg0: i32, %arg1: i32) -> (i32, i32, i32) {
    %c0_i32 = arith.constant 0 : i32
    %c0_i32_0 = arith.constant 0 : i32
    return %arg0, %arg1, %c0_i32 : i32, i32, i32
  }
  func.func @transform_3(%arg0: i32, %arg1: i32) -> (i32, i32, i32) {
    %c0_i32 = arith.constant 0 : i32
    %c0_i32_0 = arith.constant 0 : i32
    return %arg0, %arg1, %c0_i32 : i32, i32, i32
  }
  func.func @transform_4(%arg0: i32, %arg1: i32) -> (i32, i32, i32) {
    %c0_i32 = arith.constant 0 : i32
    %c0_i32_0 = arith.constant 0 : i32
    return %arg0, %arg1, %c0_i32 : i32, i32, i32
  }
  func.func @transform_5(%arg0: i32, %arg1: i32) -> (i32, i32, i32) {
    %c0_i32 = arith.constant 0 : i32
    %c0_i32_0 = arith.constant 0 : i32
    return %arg0, %arg1, %c0_i32 : i32, i32, i32
  }
  func.func @transform_6(%arg0: i32, %arg1: i32) -> (i32, i32, i32) {
    %c0_i32 = arith.constant 0 : i32
    %c0_i32_0 = arith.constant 0 : i32
    return %arg0, %arg1, %c0_i32 : i32, i32, i32
  }
  func.func @transform_7(%arg0: i32, %arg1: i32) -> (i32, i32, i32) {
    %c0_i32 = arith.constant 0 : i32
    %c0_i32_0 = arith.constant 0 : i32
    return %arg0, %arg1, %c0_i32 : i32, i32, i32
  }
  func.func @transform_8(%arg0: i32, %arg1: i32) -> (i32, i32, i32) {
    %c0_i32 = arith.constant 0 : i32
    %c0_i32_0 = arith.constant 0 : i32
    return %arg0, %arg1, %c0_i32 : i32, i32, i32
  }
  func.func @transform_9(%arg0: i32, %arg1: i32) -> (i32, i32) {
    %c0_i32 = arith.constant 0 : i32
    %c0_i32_0 = arith.constant 0 : i32
    return %arg1, %c0_i32 : i32, i32
  }
  func.func @transform_10(%arg0: i32, %arg1: i32) -> (i32, i32, i32) {
    %c0_i32 = arith.constant 0 : i32
    %c0_i32_0 = arith.constant 0 : i32
    return %arg0, %arg1, %c0_i32 : i32, i32, i32
  }
}

module attributes {stable_mosaic.version = 11 : i64} {
  func.func @_conv_matmul_kernel(%arg0: i32, %arg1: i32, %arg2: memref<56x128xbf16, #tpu.memory_space<vmem>>, %arg3: memref<128x128xbf16, #tpu.memory_space<vmem>>, %arg4: memref<1x128xf32, #tpu.memory_space<vmem>>, %arg5: memref<56x128xf32, #tpu.memory_space<vmem>>, %arg6: memref<8x128xf32, #tpu.memory_space<vmem>>, %arg7: memref<8x128xf32, #tpu.memory_space<vmem>>) attributes {dimension_semantics = [#tpu.dimension_semantics<parallel>, #tpu.dimension_semantics<arbitrary>], iteration_bounds = array<i64: 1, 1>, scalar_prefetch = 0 : i64, scratch_operands = 0 : i64, tpu.core_type = #tpu.core_type<tc>, window_params = [{transform_indices = @transform_0, window_bounds = array<i64: 56, 128>}, {transform_indices = @transform_1, window_bounds = array<i64: 128, 128>}, {pipeline_mode = #tpu.pipeline_mode<synchronous>, transform_indices = @transform_2, window_bounds = array<i64: 1, 128>}, {transform_indices = @transform_3, window_bounds = array<i64: 56, 128>}, {transform_indices = @transform_4, window_bounds = array<i64: 8, 128>}, {transform_indices = @transform_5, window_bounds = array<i64: 8, 128>}]} {
    %c0_i32 = arith.constant 0 : i32
    %0 = arith.cmpi eq, %arg1, %c0_i32 : i32
    %1 = arith.extui %0 : i1 to i32
    %c0_i32_0 = arith.constant 0 : i32
    %2 = arith.cmpi ne, %1, %c0_i32_0 : i32
    scf.if %2 {
      %cst_10 = arith.constant 0.000000e+00 : f32
      %12 = vector.broadcast %cst_10 : f32 to vector<56x128xf32>
      %c0_11 = arith.constant 0 : index
      %c0_12 = arith.constant 0 : index
      %13 = vector.load %arg5[%c0_11, %c0_12] : memref<56x128xf32, #tpu.memory_space<vmem>>, vector<56x128xf32>
      tpu.vector_store %arg5[%c0_11, %c0_12], %12 {strides = array<i32>} : memref<56x128xf32, #tpu.memory_space<vmem>>, vector<56x128xf32>,
    } else {
    }
    %c0 = arith.constant 0 : index
    %c0_1 = arith.constant 0 : index
    %3 = vector.load %arg5[%c0, %c0_1] : memref<56x128xf32, #tpu.memory_space<vmem>>, vector<56x128xf32>
    %c0_2 = arith.constant 0 : index
    %c0_3 = arith.constant 0 : index
    %4 = vector.load %arg2[%c0_2, %c0_3] : memref<56x128xbf16, #tpu.memory_space<vmem>>, vector<56x128xbf16>
    %c0_4 = arith.constant 0 : index
    %c0_5 = arith.constant 0 : index
    %5 = vector.load %arg3[%c0_4, %c0_5] : memref<128x128xbf16, #tpu.memory_space<vmem>>, vector<128x128xbf16>
    %cst = arith.constant dense<0.000000e+00> : vector<56x128xf32>
    %6 = tpu.matmul %4, %5, %cst {dimension_numbers = #tpu.dot_dimension_numbers<[1], [0], [0], [1], [0, 0, 1, 1], [], []>} : vector<56x128xbf16>, vector<128x128xbf16>, vector<56x128xf32> -> vector<56x128xf32>
    %7 = arith.addf %3, %6 : vector<56x128xf32>
    %c0_6 = arith.constant 0 : index
    %c0_7 = arith.constant 0 : index
    %8 = vector.load %arg5[%c0_6, %c0_7] : memref<56x128xf32, #tpu.memory_space<vmem>>, vector<56x128xf32>
    tpu.vector_store %arg5[%c0_6, %c0_7], %7 {strides = array<i32>} : memref<56x128xf32, #tpu.memory_space<vmem>>, vector<56x128xf32>,
    %c0_i32_8 = arith.constant 0 : i32
    %9 = arith.cmpi eq, %arg1, %c0_i32_8 : i32
    %10 = arith.extui %9 : i1 to i32
    %c0_i32_9 = arith.constant 0 : i32
    %11 = arith.cmpi ne, %10, %c0_i32_9 : i32
    scf.if %11 {
      %c0_10 = arith.constant 0 : index
      %c0_11 = arith.constant 0 : index
      %12 = vector.load %arg5[%c0_10, %c0_11] : memref<56x128xf32, #tpu.memory_space<vmem>>, vector<56x128xf32>
      %c0_12 = arith.constant 0 : index
      %c0_13 = arith.constant 0 : index
      %13 = vector.load %arg4[%c0_12, %c0_13] : memref<1x128xf32, #tpu.memory_space<vmem>>, vector<1x128xf32>
      %14 = vector.broadcast %13 : vector<1x128xf32> to vector<56x128xf32>
      %15 = arith.addf %12, %14 : vector<56x128xf32>
      %cst_14 = arith.constant 0.000000e+00 : f32
      %16 = vector.broadcast %cst_14 : f32 to vector<8x128xf32>
      %c0_15 = arith.constant 0 : index
      %c0_16 = arith.constant 0 : index
      %17 = vector.load %arg6[%c0_15, %c0_16] : memref<8x128xf32, #tpu.memory_space<vmem>>, vector<8x128xf32>
      tpu.vector_store %arg6[%c0_15, %c0_16], %16 {strides = array<i32>} : memref<8x128xf32, #tpu.memory_space<vmem>>, vector<8x128xf32>,
      %cst_17 = arith.constant 0.000000e+00 : f32
      %18 = vector.broadcast %cst_17 : f32 to vector<8x128xf32>
      %c0_18 = arith.constant 0 : index
      %c0_19 = arith.constant 0 : index
      %19 = vector.load %arg7[%c0_18, %c0_19] : memref<8x128xf32, #tpu.memory_space<vmem>>, vector<8x128xf32>
      tpu.vector_store %arg7[%c0_18, %c0_19], %18 {strides = array<i32>} : memref<8x128xf32, #tpu.memory_space<vmem>>, vector<8x128xf32>,
      %cst_20 = arith.constant 0.000000e+00 : f32
      %20 = vector.broadcast %cst_20 : f32 to vector<56x128xf32>
      %21 = arith.cmpf oge, %15, %20 : vector<56x128xf32>
      %cst_21 = arith.constant 2.000000e-01 : f32
      %22 = vector.broadcast %cst_21 : f32 to vector<56x128xf32>
      %23 = arith.mulf %22, %15 : vector<56x128xf32>
      %24 = arith.select %21, %15, %23 : vector<56x128xi1>, vector<56x128xf32>
      %c0_22 = arith.constant 0 : index
      %c0_23 = arith.constant 0 : index
      %25 = vector.load %arg5[%c0_22, %c0_23] : memref<56x128xf32, #tpu.memory_space<vmem>>, vector<56x128xf32>
      tpu.vector_store %arg5[%c0_22, %c0_23], %24 {strides = array<i32>} : memref<56x128xf32, #tpu.memory_space<vmem>>, vector<56x128xf32>,
    } else {
    }
    return
  }
  func.func @transform_0(%arg0: i32, %arg1: i32) -> (i32, i32) {
    %c0_i32 = arith.constant 0 : i32
    return %arg0, %arg1 : i32, i32
  }
  func.func @transform_1(%arg0: i32, %arg1: i32) -> (i32, i32) {
    %c0_i32 = arith.constant 0 : i32
    %c0_i32_0 = arith.constant 0 : i32
    return %arg1, %c0_i32 : i32, i32
  }
  func.func @transform_2(%arg0: i32, %arg1: i32) -> (i32, i32) {
    %c0_i32 = arith.constant 0 : i32
    %c0_i32_0 = arith.constant 0 : i32
    %c0_i32_1 = arith.constant 0 : i32
    return %c0_i32, %c0_i32_0 : i32, i32
  }
  func.func @transform_3(%arg0: i32, %arg1: i32) -> (i32, i32) {
    %c0_i32 = arith.constant 0 : i32
    %c0_i32_0 = arith.constant 0 : i32
    return %arg0, %c0_i32 : i32, i32
  }
  func.func @transform_4(%arg0: i32, %arg1: i32) -> (i32, i32) {
    %c0_i32 = arith.constant 0 : i32
    %c0_i32_0 = arith.constant 0 : i32
    return %arg0, %c0_i32 : i32, i32
  }
  func.func @transform_5(%arg0: i32, %arg1: i32) -> (i32, i32) {
    %c0_i32 = arith.constant 0 : i32
    %c0_i32_0 = arith.constant 0 : i32
    return %arg0, %c0_i32 : i32, i32
  }
}

module attributes {stable_mosaic.version = 11 : i64} {
  func.func @_conv_matmul_kernel(%arg0: i32, %arg1: i32, %arg2: memref<24x128xbf16, #tpu.memory_space<vmem>>, %arg3: memref<128x128xbf16, #tpu.memory_space<vmem>>, %arg4: memref<1x128xf32, #tpu.memory_space<vmem>>, %arg5: memref<24x128xf32, #tpu.memory_space<vmem>>, %arg6: memref<8x128xf32, #tpu.memory_space<vmem>>, %arg7: memref<8x128xf32, #tpu.memory_space<vmem>>) attributes {dimension_semantics = [#tpu.dimension_semantics<parallel>, #tpu.dimension_semantics<arbitrary>], iteration_bounds = array<i64: 1, 1>, scalar_prefetch = 0 : i64, scratch_operands = 0 : i64, tpu.core_type = #tpu.core_type<tc>, window_params = [{transform_indices = @transform_0, window_bounds = array<i64: 24, 128>}, {transform_indices = @transform_1, window_bounds = array<i64: 128, 128>}, {pipeline_mode = #tpu.pipeline_mode<synchronous>, transform_indices = @transform_2, window_bounds = array<i64: 1, 128>}, {transform_indices = @transform_3, window_bounds = array<i64: 24, 128>}, {transform_indices = @transform_4, window_bounds = array<i64: 8, 128>}, {transform_indices = @transform_5, window_bounds = array<i64: 8, 128>}]} {
    %c0_i32 = arith.constant 0 : i32
    %0 = arith.cmpi eq, %arg1, %c0_i32 : i32
    %1 = arith.extui %0 : i1 to i32
    %c0_i32_0 = arith.constant 0 : i32
    %2 = arith.cmpi ne, %1, %c0_i32_0 : i32
    scf.if %2 {
      %cst_10 = arith.constant 0.000000e+00 : f32
      %12 = vector.broadcast %cst_10 : f32 to vector<24x128xf32>
      %c0_11 = arith.constant 0 : index
      %c0_12 = arith.constant 0 : index
      %13 = vector.load %arg5[%c0_11, %c0_12] : memref<24x128xf32, #tpu.memory_space<vmem>>, vector<24x128xf32>
      tpu.vector_store %arg5[%c0_11, %c0_12], %12 {strides = array<i32>} : memref<24x128xf32, #tpu.memory_space<vmem>>, vector<24x128xf32>,
    } else {
    }
    %c0 = arith.constant 0 : index
    %c0_1 = arith.constant 0 : index
    %3 = vector.load %arg5[%c0, %c0_1] : memref<24x128xf32, #tpu.memory_space<vmem>>, vector<24x128xf32>
    %c0_2 = arith.constant 0 : index
    %c0_3 = arith.constant 0 : index
    %4 = vector.load %arg2[%c0_2, %c0_3] : memref<24x128xbf16, #tpu.memory_space<vmem>>, vector<24x128xbf16>
    %c0_4 = arith.constant 0 : index
    %c0_5 = arith.constant 0 : index
    %5 = vector.load %arg3[%c0_4, %c0_5] : memref<128x128xbf16, #tpu.memory_space<vmem>>, vector<128x128xbf16>
    %cst = arith.constant dense<0.000000e+00> : vector<24x128xf32>
    %6 = tpu.matmul %4, %5, %cst {dimension_numbers = #tpu.dot_dimension_numbers<[1], [0], [0], [1], [0, 0, 1, 1], [], []>} : vector<24x128xbf16>, vector<128x128xbf16>, vector<24x128xf32> -> vector<24x128xf32>
    %7 = arith.addf %3, %6 : vector<24x128xf32>
    %c0_6 = arith.constant 0 : index
    %c0_7 = arith.constant 0 : index
    %8 = vector.load %arg5[%c0_6, %c0_7] : memref<24x128xf32, #tpu.memory_space<vmem>>, vector<24x128xf32>
    tpu.vector_store %arg5[%c0_6, %c0_7], %7 {strides = array<i32>} : memref<24x128xf32, #tpu.memory_space<vmem>>, vector<24x128xf32>,
    %c0_i32_8 = arith.constant 0 : i32
    %9 = arith.cmpi eq, %arg1, %c0_i32_8 : i32
    %10 = arith.extui %9 : i1 to i32
    %c0_i32_9 = arith.constant 0 : i32
    %11 = arith.cmpi ne, %10, %c0_i32_9 : i32
    scf.if %11 {
      %c0_10 = arith.constant 0 : index
      %c0_11 = arith.constant 0 : index
      %12 = vector.load %arg5[%c0_10, %c0_11] : memref<24x128xf32, #tpu.memory_space<vmem>>, vector<24x128xf32>
      %c0_12 = arith.constant 0 : index
      %c0_13 = arith.constant 0 : index
      %13 = vector.load %arg4[%c0_12, %c0_13] : memref<1x128xf32, #tpu.memory_space<vmem>>, vector<1x128xf32>
      %14 = vector.broadcast %13 : vector<1x128xf32> to vector<24x128xf32>
      %15 = arith.addf %12, %14 : vector<24x128xf32>
      %cst_14 = arith.constant dense<0.000000e+00> : vector<128xf32>
      %16 = vector.multi_reduction <add>, %15, %cst_14 [0] : vector<24x128xf32> to vector<128xf32>
      %17 = vector.shape_cast %16 : vector<128xf32> to vector<1x128xf32>
      %18 = arith.mulf %15, %15 : vector<24x128xf32>
      %cst_15 = arith.constant dense<0.000000e+00> : vector<128xf32>
      %19 = vector.multi_reduction <add>, %18, %cst_15 [0] : vector<24x128xf32> to vector<128xf32>
      %20 = vector.shape_cast %19 : vector<128xf32> to vector<1x128xf32>
      %21 = vector.shape_cast %17 : vector<1x128xf32> to vector<1x128xf32>
      %22 = vector.broadcast %21 : vector<1x128xf32> to vector<8x128xf32>
      %c0_16 = arith.constant 0 : index
      %c0_17 = arith.constant 0 : index
      %23 = vector.load %arg6[%c0_16, %c0_17] : memref<8x128xf32, #tpu.memory_space<vmem>>, vector<8x128xf32>
      tpu.vector_store %arg6[%c0_16, %c0_17], %22 {strides = array<i32>} : memref<8x128xf32, #tpu.memory_space<vmem>>, vector<8x128xf32>,
      %24 = vector.shape_cast %20 : vector<1x128xf32> to vector<1x128xf32>
      %25 = vector.broadcast %24 : vector<1x128xf32> to vector<8x128xf32>
      %c0_18 = arith.constant 0 : index
      %c0_19 = arith.constant 0 : index
      %26 = vector.load %arg7[%c0_18, %c0_19] : memref<8x128xf32, #tpu.memory_space<vmem>>, vector<8x128xf32>
      tpu.vector_store %arg7[%c0_18, %c0_19], %25 {strides = array<i32>} : memref<8x128xf32, #tpu.memory_space<vmem>>, vector<8x128xf32>,
      %c0_20 = arith.constant 0 : index
      %c0_21 = arith.constant 0 : index
      %27 = vector.load %arg5[%c0_20, %c0_21] : memref<24x128xf32, #tpu.memory_space<vmem>>, vector<24x128xf32>
      tpu.vector_store %arg5[%c0_20, %c0_21], %15 {strides = array<i32>} : memref<24x128xf32, #tpu.memory_space<vmem>>, vector<24x128xf32>,
    } else {
    }
    return
  }
  func.func @transform_0(%arg0: i32, %arg1: i32) -> (i32, i32) {
    %c0_i32 = arith.constant 0 : i32
    return %arg0, %arg1 : i32, i32
  }
  func.func @transform_1(%arg0: i32, %arg1: i32) -> (i32, i32) {
    %c0_i32 = arith.constant 0 : i32
    %c0_i32_0 = arith.constant 0 : i32
    return %arg1, %c0_i32 : i32, i32
  }
  func.func @transform_2(%arg0: i32, %arg1: i32) -> (i32, i32) {
    %c0_i32 = arith.constant 0 : i32
    %c0_i32_0 = arith.constant 0 : i32
    %c0_i32_1 = arith.constant 0 : i32
    return %c0_i32, %c0_i32_0 : i32, i32
  }
  func.func @transform_3(%arg0: i32, %arg1: i32) -> (i32, i32) {
    %c0_i32 = arith.constant 0 : i32
    %c0_i32_0 = arith.constant 0 : i32
    return %arg0, %c0_i32 : i32, i32
  }
  func.func @transform_4(%arg0: i32, %arg1: i32) -> (i32, i32) {
    %c0_i32 = arith.constant 0 : i32
    %c0_i32_0 = arith.constant 0 : i32
    return %arg0, %c0_i32 : i32, i32
  }
  func.func @transform_5(%arg0: i32, %arg1: i32) -> (i32, i32) {
    %c0_i32 = arith.constant 0 : i32
    %c0_i32_0 = arith.constant 0 : i32
    return %arg0, %c0_i32 : i32, i32
  }
}

module attributes {stable_mosaic.version = 11 : i64} {
  func.func @_conv_matmul_kernel(%arg0: i32, %arg1: i32, %arg2: memref<8x256xbf16, #tpu.memory_space<vmem>>, %arg3: memref<256x128xbf16, #tpu.memory_space<vmem>>, %arg4: memref<1x128xf32, #tpu.memory_space<vmem>>, %arg5: memref<8x128xf32, #tpu.memory_space<vmem>>, %arg6: memref<8x128xf32, #tpu.memory_space<vmem>>, %arg7: memref<8x128xf32, #tpu.memory_space<vmem>>) attributes {dimension_semantics = [#tpu.dimension_semantics<parallel>, #tpu.dimension_semantics<arbitrary>], iteration_bounds = array<i64: 1, 1>, scalar_prefetch = 0 : i64, scratch_operands = 0 : i64, tpu.core_type = #tpu.core_type<tc>, window_params = [{transform_indices = @transform_0, window_bounds = array<i64: 8, 256>}, {transform_indices = @transform_1, window_bounds = array<i64: 256, 128>}, {pipeline_mode = #tpu.pipeline_mode<synchronous>, transform_indices = @transform_2, window_bounds = array<i64: 1, 128>}, {transform_indices = @transform_3, window_bounds = array<i64: 8, 128>}, {transform_indices = @transform_4, window_bounds = array<i64: 8, 128>}, {transform_indices = @transform_5, window_bounds = array<i64: 8, 128>}]} {
    %c0_i32 = arith.constant 0 : i32
    %0 = arith.cmpi eq, %arg1, %c0_i32 : i32
    %1 = arith.extui %0 : i1 to i32
    %c0_i32_0 = arith.constant 0 : i32
    %2 = arith.cmpi ne, %1, %c0_i32_0 : i32
    scf.if %2 {
      %cst_10 = arith.constant 0.000000e+00 : f32
      %12 = vector.broadcast %cst_10 : f32 to vector<8x128xf32>
      %c0_11 = arith.constant 0 : index
      %c0_12 = arith.constant 0 : index
      %13 = vector.load %arg5[%c0_11, %c0_12] : memref<8x128xf32, #tpu.memory_space<vmem>>, vector<8x128xf32>
      tpu.vector_store %arg5[%c0_11, %c0_12], %12 {strides = array<i32>} : memref<8x128xf32, #tpu.memory_space<vmem>>, vector<8x128xf32>,
    } else {
    }
    %c0 = arith.constant 0 : index
    %c0_1 = arith.constant 0 : index
    %3 = vector.load %arg5[%c0, %c0_1] : memref<8x128xf32, #tpu.memory_space<vmem>>, vector<8x128xf32>
    %c0_2 = arith.constant 0 : index
    %c0_3 = arith.constant 0 : index
    %4 = vector.load %arg2[%c0_2, %c0_3] : memref<8x256xbf16, #tpu.memory_space<vmem>>, vector<8x256xbf16>
    %c0_4 = arith.constant 0 : index
    %c0_5 = arith.constant 0 : index
    %5 = vector.load %arg3[%c0_4, %c0_5] : memref<256x128xbf16, #tpu.memory_space<vmem>>, vector<256x128xbf16>
    %cst = arith.constant dense<0.000000e+00> : vector<8x128xf32>
    %6 = tpu.matmul %4, %5, %cst {dimension_numbers = #tpu.dot_dimension_numbers<[1], [0], [0], [1], [0, 0, 1, 1], [], []>} : vector<8x256xbf16>, vector<256x128xbf16>, vector<8x128xf32> -> vector<8x128xf32>
    %7 = arith.addf %3, %6 : vector<8x128xf32>
    %c0_6 = arith.constant 0 : index
    %c0_7 = arith.constant 0 : index
    %8 = vector.load %arg5[%c0_6, %c0_7] : memref<8x128xf32, #tpu.memory_space<vmem>>, vector<8x128xf32>
    tpu.vector_store %arg5[%c0_6, %c0_7], %7 {strides = array<i32>} : memref<8x128xf32, #tpu.memory_space<vmem>>, vector<8x128xf32>,
    %c0_i32_8 = arith.constant 0 : i32
    %9 = arith.cmpi eq, %arg1, %c0_i32_8 : i32
    %10 = arith.extui %9 : i1 to i32
    %c0_i32_9 = arith.constant 0 : i32
    %11 = arith.cmpi ne, %10, %c0_i32_9 : i32
    scf.if %11 {
      %c0_10 = arith.constant 0 : index
      %c0_11 = arith.constant 0 : index
      %12 = vector.load %arg5[%c0_10, %c0_11] : memref<8x128xf32, #tpu.memory_space<vmem>>, vector<8x128xf32>
      %c0_12 = arith.constant 0 : index
      %c0_13 = arith.constant 0 : index
      %13 = vector.load %arg4[%c0_12, %c0_13] : memref<1x128xf32, #tpu.memory_space<vmem>>, vector<1x128xf32>
      %14 = vector.broadcast %13 : vector<1x128xf32> to vector<8x128xf32>
      %15 = arith.addf %12, %14 : vector<8x128xf32>
      %cst_14 = arith.constant dense<0.000000e+00> : vector<128xf32>
      %16 = vector.multi_reduction <add>, %15, %cst_14 [0] : vector<8x128xf32> to vector<128xf32>
      %17 = vector.shape_cast %16 : vector<128xf32> to vector<1x128xf32>
      %18 = arith.mulf %15, %15 : vector<8x128xf32>
      %cst_15 = arith.constant dense<0.000000e+00> : vector<128xf32>
      %19 = vector.multi_reduction <add>, %18, %cst_15 [0] : vector<8x128xf32> to vector<128xf32>
      %20 = vector.shape_cast %19 : vector<128xf32> to vector<1x128xf32>
      %21 = vector.shape_cast %17 : vector<1x128xf32> to vector<1x128xf32>
      %22 = vector.broadcast %21 : vector<1x128xf32> to vector<8x128xf32>
      %c0_16 = arith.constant 0 : index
      %c0_17 = arith.constant 0 : index
      %23 = vector.load %arg6[%c0_16, %c0_17] : memref<8x128xf32, #tpu.memory_space<vmem>>, vector<8x128xf32>
      tpu.vector_store %arg6[%c0_16, %c0_17], %22 {strides = array<i32>} : memref<8x128xf32, #tpu.memory_space<vmem>>, vector<8x128xf32>,
      %24 = vector.shape_cast %20 : vector<1x128xf32> to vector<1x128xf32>
      %25 = vector.broadcast %24 : vector<1x128xf32> to vector<8x128xf32>
      %c0_18 = arith.constant 0 : index
      %c0_19 = arith.constant 0 : index
      %26 = vector.load %arg7[%c0_18, %c0_19] : memref<8x128xf32, #tpu.memory_space<vmem>>, vector<8x128xf32>
      tpu.vector_store %arg7[%c0_18, %c0_19], %25 {strides = array<i32>} : memref<8x128xf32, #tpu.memory_space<vmem>>, vector<8x128xf32>,
      %c0_20 = arith.constant 0 : index
      %c0_21 = arith.constant 0 : index
      %27 = vector.load %arg5[%c0_20, %c0_21] : memref<8x128xf32, #tpu.memory_space<vmem>>, vector<8x128xf32>
      tpu.vector_store %arg5[%c0_20, %c0_21], %15 {strides = array<i32>} : memref<8x128xf32, #tpu.memory_space<vmem>>, vector<8x128xf32>,
    } else {
    }
    return
  }
  func.func @transform_0(%arg0: i32, %arg1: i32) -> (i32, i32) {
    %c0_i32 = arith.constant 0 : i32
    return %arg0, %arg1 : i32, i32
  }
  func.func @transform_1(%arg0: i32, %arg1: i32) -> (i32, i32) {
    %c0_i32 = arith.constant 0 : i32
    %c0_i32_0 = arith.constant 0 : i32
    return %arg1, %c0_i32 : i32, i32
  }
  func.func @transform_2(%arg0: i32, %arg1: i32) -> (i32, i32) {
    %c0_i32 = arith.constant 0 : i32
    %c0_i32_0 = arith.constant 0 : i32
    %c0_i32_1 = arith.constant 0 : i32
    return %c0_i32, %c0_i32_0 : i32, i32
  }
  func.func @transform_3(%arg0: i32, %arg1: i32) -> (i32, i32) {
    %c0_i32 = arith.constant 0 : i32
    %c0_i32_0 = arith.constant 0 : i32
    return %arg0, %c0_i32 : i32, i32
  }
  func.func @transform_4(%arg0: i32, %arg1: i32) -> (i32, i32) {
    %c0_i32 = arith.constant 0 : i32
    %c0_i32_0 = arith.constant 0 : i32
    return %arg0, %c0_i32 : i32, i32
  }
  func.func @transform_5(%arg0: i32, %arg1: i32) -> (i32, i32) {
    %c0_i32 = arith.constant 0 : i32
    %c0_i32_0 = arith.constant 0 : i32
    return %arg0, %c0_i32 : i32, i32
  }
}

module attributes {stable_mosaic.version = 11 : i64} {
  func.func @_conv_matmul_kernel(%arg0: i32, %arg1: i32, %arg2: memref<24x512xbf16, #tpu.memory_space<vmem>>, %arg3: memref<512x128xbf16, #tpu.memory_space<vmem>>, %arg4: memref<1x128xf32, #tpu.memory_space<vmem>>, %arg5: memref<24x128xf32, #tpu.memory_space<vmem>>, %arg6: memref<8x128xf32, #tpu.memory_space<vmem>>, %arg7: memref<8x128xf32, #tpu.memory_space<vmem>>) attributes {dimension_semantics = [#tpu.dimension_semantics<parallel>, #tpu.dimension_semantics<arbitrary>], iteration_bounds = array<i64: 1, 1>, scalar_prefetch = 0 : i64, scratch_operands = 0 : i64, tpu.core_type = #tpu.core_type<tc>, window_params = [{transform_indices = @transform_0, window_bounds = array<i64: 24, 512>}, {transform_indices = @transform_1, window_bounds = array<i64: 512, 128>}, {pipeline_mode = #tpu.pipeline_mode<synchronous>, transform_indices = @transform_2, window_bounds = array<i64: 1, 128>}, {transform_indices = @transform_3, window_bounds = array<i64: 24, 128>}, {transform_indices = @transform_4, window_bounds = array<i64: 8, 128>}, {transform_indices = @transform_5, window_bounds = array<i64: 8, 128>}]} {
    %c0_i32 = arith.constant 0 : i32
    %0 = arith.cmpi eq, %arg1, %c0_i32 : i32
    %1 = arith.extui %0 : i1 to i32
    %c0_i32_0 = arith.constant 0 : i32
    %2 = arith.cmpi ne, %1, %c0_i32_0 : i32
    scf.if %2 {
      %cst_10 = arith.constant 0.000000e+00 : f32
      %12 = vector.broadcast %cst_10 : f32 to vector<24x128xf32>
      %c0_11 = arith.constant 0 : index
      %c0_12 = arith.constant 0 : index
      %13 = vector.load %arg5[%c0_11, %c0_12] : memref<24x128xf32, #tpu.memory_space<vmem>>, vector<24x128xf32>
      tpu.vector_store %arg5[%c0_11, %c0_12], %12 {strides = array<i32>} : memref<24x128xf32, #tpu.memory_space<vmem>>, vector<24x128xf32>,
    } else {
    }
    %c0 = arith.constant 0 : index
    %c0_1 = arith.constant 0 : index
    %3 = vector.load %arg5[%c0, %c0_1] : memref<24x128xf32, #tpu.memory_space<vmem>>, vector<24x128xf32>
    %c0_2 = arith.constant 0 : index
    %c0_3 = arith.constant 0 : index
    %4 = vector.load %arg2[%c0_2, %c0_3] : memref<24x512xbf16, #tpu.memory_space<vmem>>, vector<24x512xbf16>
    %c0_4 = arith.constant 0 : index
    %c0_5 = arith.constant 0 : index
    %5 = vector.load %arg3[%c0_4, %c0_5] : memref<512x128xbf16, #tpu.memory_space<vmem>>, vector<512x128xbf16>
    %cst = arith.constant dense<0.000000e+00> : vector<24x128xf32>
    %6 = tpu.matmul %4, %5, %cst {dimension_numbers = #tpu.dot_dimension_numbers<[1], [0], [0], [1], [0, 0, 1, 1], [], []>} : vector<24x512xbf16>, vector<512x128xbf16>, vector<24x128xf32> -> vector<24x128xf32>
    %7 = arith.addf %3, %6 : vector<24x128xf32>
    %c0_6 = arith.constant 0 : index
    %c0_7 = arith.constant 0 : index
    %8 = vector.load %arg5[%c0_6, %c0_7] : memref<24x128xf32, #tpu.memory_space<vmem>>, vector<24x128xf32>
    tpu.vector_store %arg5[%c0_6, %c0_7], %7 {strides = array<i32>} : memref<24x128xf32, #tpu.memory_space<vmem>>, vector<24x128xf32>,
    %c0_i32_8 = arith.constant 0 : i32
    %9 = arith.cmpi eq, %arg1, %c0_i32_8 : i32
    %10 = arith.extui %9 : i1 to i32
    %c0_i32_9 = arith.constant 0 : i32
    %11 = arith.cmpi ne, %10, %c0_i32_9 : i32
    scf.if %11 {
      %c0_10 = arith.constant 0 : index
      %c0_11 = arith.constant 0 : index
      %12 = vector.load %arg5[%c0_10, %c0_11] : memref<24x128xf32, #tpu.memory_space<vmem>>, vector<24x128xf32>
      %c0_12 = arith.constant 0 : index
      %c0_13 = arith.constant 0 : index
      %13 = vector.load %arg4[%c0_12, %c0_13] : memref<1x128xf32, #tpu.memory_space<vmem>>, vector<1x128xf32>
      %14 = vector.broadcast %13 : vector<1x128xf32> to vector<24x128xf32>
      %15 = arith.addf %12, %14 : vector<24x128xf32>
      %cst_14 = arith.constant dense<0.000000e+00> : vector<128xf32>
      %16 = vector.multi_reduction <add>, %15, %cst_14 [0] : vector<24x128xf32> to vector<128xf32>
      %17 = vector.shape_cast %16 : vector<128xf32> to vector<1x128xf32>
      %18 = arith.mulf %15, %15 : vector<24x128xf32>
      %cst_15 = arith.constant dense<0.000000e+00> : vector<128xf32>
      %19 = vector.multi_reduction <add>, %18, %cst_15 [0] : vector<24x128xf32> to vector<128xf32>
      %20 = vector.shape_cast %19 : vector<128xf32> to vector<1x128xf32>
      %21 = vector.shape_cast %17 : vector<1x128xf32> to vector<1x128xf32>
      %22 = vector.broadcast %21 : vector<1x128xf32> to vector<8x128xf32>
      %c0_16 = arith.constant 0 : index
      %c0_17 = arith.constant 0 : index
      %23 = vector.load %arg6[%c0_16, %c0_17] : memref<8x128xf32, #tpu.memory_space<vmem>>, vector<8x128xf32>
      tpu.vector_store %arg6[%c0_16, %c0_17], %22 {strides = array<i32>} : memref<8x128xf32, #tpu.memory_space<vmem>>, vector<8x128xf32>,
      %24 = vector.shape_cast %20 : vector<1x128xf32> to vector<1x128xf32>
      %25 = vector.broadcast %24 : vector<1x128xf32> to vector<8x128xf32>
      %c0_18 = arith.constant 0 : index
      %c0_19 = arith.constant 0 : index
      %26 = vector.load %arg7[%c0_18, %c0_19] : memref<8x128xf32, #tpu.memory_space<vmem>>, vector<8x128xf32>
      tpu.vector_store %arg7[%c0_18, %c0_19], %25 {strides = array<i32>} : memref<8x128xf32, #tpu.memory_space<vmem>>, vector<8x128xf32>,
      %c0_20 = arith.constant 0 : index
      %c0_21 = arith.constant 0 : index
      %27 = vector.load %arg5[%c0_20, %c0_21] : memref<24x128xf32, #tpu.memory_space<vmem>>, vector<24x128xf32>
      tpu.vector_store %arg5[%c0_20, %c0_21], %15 {strides = array<i32>} : memref<24x128xf32, #tpu.memory_space<vmem>>, vector<24x128xf32>,
    } else {
    }
    return
  }
  func.func @transform_0(%arg0: i32, %arg1: i32) -> (i32, i32) {
    %c0_i32 = arith.constant 0 : i32
    return %arg0, %arg1 : i32, i32
  }
  func.func @transform_1(%arg0: i32, %arg1: i32) -> (i32, i32) {
    %c0_i32 = arith.constant 0 : i32
    %c0_i32_0 = arith.constant 0 : i32
    return %arg1, %c0_i32 : i32, i32
  }
  func.func @transform_2(%arg0: i32, %arg1: i32) -> (i32, i32) {
    %c0_i32 = arith.constant 0 : i32
    %c0_i32_0 = arith.constant 0 : i32
    %c0_i32_1 = arith.constant 0 : i32
    return %c0_i32, %c0_i32_0 : i32, i32
  }
  func.func @transform_3(%arg0: i32, %arg1: i32) -> (i32, i32) {
    %c0_i32 = arith.constant 0 : i32
    %c0_i32_0 = arith.constant 0 : i32
    return %arg0, %c0_i32 : i32, i32
  }
  func.func @transform_4(%arg0: i32, %arg1: i32) -> (i32, i32) {
    %c0_i32 = arith.constant 0 : i32
    %c0_i32_0 = arith.constant 0 : i32
    return %arg0, %c0_i32 : i32, i32
  }
  func.func @transform_5(%arg0: i32, %arg1: i32) -> (i32, i32) {
    %c0_i32 = arith.constant 0 : i32
    %c0_i32_0 = arith.constant 0 : i32
    return %arg0, %c0_i32 : i32, i32
  }
}

module attributes {stable_mosaic.version = 11 : i64} {
  func.func @_conv_matmul_kernel(%arg0: i32, %arg1: i32, %arg2: memref<32x512xbf16, #tpu.memory_space<vmem>>, %arg3: memref<512x128xbf16, #tpu.memory_space<vmem>>, %arg4: memref<1x128xf32, #tpu.memory_space<vmem>>, %arg5: memref<32x128xf32, #tpu.memory_space<vmem>>, %arg6: memref<8x128xf32, #tpu.memory_space<vmem>>, %arg7: memref<8x128xf32, #tpu.memory_space<vmem>>) attributes {dimension_semantics = [#tpu.dimension_semantics<parallel>, #tpu.dimension_semantics<arbitrary>], iteration_bounds = array<i64: 1, 2>, scalar_prefetch = 0 : i64, scratch_operands = 0 : i64, tpu.core_type = #tpu.core_type<tc>, window_params = [{transform_indices = @transform_0, window_bounds = array<i64: 32, 512>}, {transform_indices = @transform_1, window_bounds = array<i64: 512, 128>}, {pipeline_mode = #tpu.pipeline_mode<synchronous>, transform_indices = @transform_2, window_bounds = array<i64: 1, 128>}, {transform_indices = @transform_3, window_bounds = array<i64: 32, 128>}, {transform_indices = @transform_4, window_bounds = array<i64: 8, 128>}, {transform_indices = @transform_5, window_bounds = array<i64: 8, 128>}]} {
    %c0_i32 = arith.constant 0 : i32
    %0 = arith.cmpi eq, %arg1, %c0_i32 : i32
    %1 = arith.extui %0 : i1 to i32
    %c0_i32_0 = arith.constant 0 : i32
    %2 = arith.cmpi ne, %1, %c0_i32_0 : i32
    scf.if %2 {
      %cst_9 = arith.constant 0.000000e+00 : f32
      %12 = vector.broadcast %cst_9 : f32 to vector<32x128xf32>
      %c0_10 = arith.constant 0 : index
      %c0_11 = arith.constant 0 : index
      %13 = vector.load %arg5[%c0_10, %c0_11] : memref<32x128xf32, #tpu.memory_space<vmem>>, vector<32x128xf32>
      tpu.vector_store %arg5[%c0_10, %c0_11], %12 {strides = array<i32>} : memref<32x128xf32, #tpu.memory_space<vmem>>, vector<32x128xf32>,
    } else {
    }
    %c0 = arith.constant 0 : index
    %c0_1 = arith.constant 0 : index
    %3 = vector.load %arg5[%c0, %c0_1] : memref<32x128xf32, #tpu.memory_space<vmem>>, vector<32x128xf32>
    %c0_2 = arith.constant 0 : index
    %c0_3 = arith.constant 0 : index
    %4 = vector.load %arg2[%c0_2, %c0_3] : memref<32x512xbf16, #tpu.memory_space<vmem>>, vector<32x512xbf16>
    %c0_4 = arith.constant 0 : index
    %c0_5 = arith.constant 0 : index
    %5 = vector.load %arg3[%c0_4, %c0_5] : memref<512x128xbf16, #tpu.memory_space<vmem>>, vector<512x128xbf16>
    %cst = arith.constant dense<0.000000e+00> : vector<32x128xf32>
    %6 = tpu.matmul %4, %5, %cst {dimension_numbers = #tpu.dot_dimension_numbers<[1], [0], [0], [1], [0, 0, 1, 1], [], []>} : vector<32x512xbf16>, vector<512x128xbf16>, vector<32x128xf32> -> vector<32x128xf32>
    %7 = arith.addf %3, %6 : vector<32x128xf32>
    %c0_6 = arith.constant 0 : index
    %c0_7 = arith.constant 0 : index
    %8 = vector.load %arg5[%c0_6, %c0_7] : memref<32x128xf32, #tpu.memory_space<vmem>>, vector<32x128xf32>
    tpu.vector_store %arg5[%c0_6, %c0_7], %7 {strides = array<i32>} : memref<32x128xf32, #tpu.memory_space<vmem>>, vector<32x128xf32>,
    %c1_i32 = arith.constant 1 : i32
    %9 = arith.cmpi eq, %arg1, %c1_i32 : i32
    %10 = arith.extui %9 : i1 to i32
    %c0_i32_8 = arith.constant 0 : i32
    %11 = arith.cmpi ne, %10, %c0_i32_8 : i32
    scf.if %11 {
      %c0_9 = arith.constant 0 : index
      %c0_10 = arith.constant 0 : index
      %12 = vector.load %arg5[%c0_9, %c0_10] : memref<32x128xf32, #tpu.memory_space<vmem>>, vector<32x128xf32>
      %c0_11 = arith.constant 0 : index
      %c0_12 = arith.constant 0 : index
      %13 = vector.load %arg4[%c0_11, %c0_12] : memref<1x128xf32, #tpu.memory_space<vmem>>, vector<1x128xf32>
      %14 = vector.broadcast %13 : vector<1x128xf32> to vector<32x128xf32>
      %15 = arith.addf %12, %14 : vector<32x128xf32>
      %cst_13 = arith.constant 0.000000e+00 : f32
      %16 = vector.broadcast %cst_13 : f32 to vector<8x128xf32>
      %c0_14 = arith.constant 0 : index
      %c0_15 = arith.constant 0 : index
      %17 = vector.load %arg6[%c0_14, %c0_15] : memref<8x128xf32, #tpu.memory_space<vmem>>, vector<8x128xf32>
      tpu.vector_store %arg6[%c0_14, %c0_15], %16 {strides = array<i32>} : memref<8x128xf32, #tpu.memory_space<vmem>>, vector<8x128xf32>,
      %cst_16 = arith.constant 0.000000e+00 : f32
      %18 = vector.broadcast %cst_16 : f32 to vector<8x128xf32>
      %c0_17 = arith.constant 0 : index
      %c0_18 = arith.constant 0 : index
      %19 = vector.load %arg7[%c0_17, %c0_18] : memref<8x128xf32, #tpu.memory_space<vmem>>, vector<8x128xf32>
      tpu.vector_store %arg7[%c0_17, %c0_18], %18 {strides = array<i32>} : memref<8x128xf32, #tpu.memory_space<vmem>>, vector<8x128xf32>,
      %c0_19 = arith.constant 0 : index
      %c0_20 = arith.constant 0 : index
      %20 = vector.load %arg5[%c0_19, %c0_20] : memref<32x128xf32, #tpu.memory_space<vmem>>, vector<32x128xf32>
      tpu.vector_store %arg5[%c0_19, %c0_20], %15 {strides = array<i32>} : memref<32x128xf32, #tpu.memory_space<vmem>>, vector<32x128xf32>,
    } else {
    }
    return
  }
  func.func @transform_0(%arg0: i32, %arg1: i32) -> (i32, i32) {
    %c0_i32 = arith.constant 0 : i32
    return %arg0, %arg1 : i32, i32
  }
  func.func @transform_1(%arg0: i32, %arg1: i32) -> (i32, i32) {
    %c0_i32 = arith.constant 0 : i32
    %c0_i32_0 = arith.constant 0 : i32
    return %arg1, %c0_i32 : i32, i32
  }
  func.func @transform_2(%arg0: i32, %arg1: i32) -> (i32, i32) {
    %c0_i32 = arith.constant 0 : i32
    %c0_i32_0 = arith.constant 0 : i32
    %c0_i32_1 = arith.constant 0 : i32
    return %c0_i32, %c0_i32_0 : i32, i32
  }
  func.func @transform_3(%arg0: i32, %arg1: i32) -> (i32, i32) {
    %c0_i32 = arith.constant 0 : i32
    %c0_i32_0 = arith.constant 0 : i32
    return %arg0, %c0_i32 : i32, i32
  }
  func.func @transform_4(%arg0: i32, %arg1: i32) -> (i32, i32) {
    %c0_i32 = arith.constant 0 : i32
    %c0_i32_0 = arith.constant 0 : i32
    return %arg0, %c0_i32 : i32, i32
  }
  func.func @transform_5(%arg0: i32, %arg1: i32) -> (i32, i32) {
    %c0_i32 = arith.constant 0 : i32
    %c0_i32_0 = arith.constant 0 : i32
    return %arg0, %c0_i32 : i32, i32
  }
}

module attributes {stable_mosaic.version = 11 : i64} {
  func.func @_avgpool_kernel(%arg0: i32, %arg1: i32, %arg2: memref<1x8x4xf32, #tpu.memory_space<vmem>>, %arg3: memref<1x8x4xf32, #tpu.memory_space<vmem>>, %arg4: memref<1x8x4xf32, #tpu.memory_space<vmem>>, %arg5: memref<1x8x4xf32, #tpu.memory_space<vmem>>, %arg6: memref<1x8x4xf32, #tpu.memory_space<vmem>>, %arg7: memref<1x8x4xf32, #tpu.memory_space<vmem>>, %arg8: memref<1x8x4xf32, #tpu.memory_space<vmem>>, %arg9: memref<1x8x4xf32, #tpu.memory_space<vmem>>, %arg10: memref<1x8x4xf32, #tpu.memory_space<vmem>>, %arg11: memref<8x4xf32, #tpu.memory_space<vmem>>, %arg12: memref<1x8x4xf32, #tpu.memory_space<vmem>>) attributes {dimension_semantics = [#tpu.dimension_semantics<parallel>, #tpu.dimension_semantics<arbitrary>], iteration_bounds = array<i64: 8, 1>, scalar_prefetch = 0 : i64, scratch_operands = 0 : i64, tpu.core_type = #tpu.core_type<tc>, window_params = [{transform_indices = @transform_0, window_bounds = array<i64: 1, 8, 4>}, {transform_indices = @transform_1, window_bounds = array<i64: 1, 8, 4>}, {transform_indices = @transform_2, window_bounds = array<i64: 1, 8, 4>}, {transform_indices = @transform_3, window_bounds = array<i64: 1, 8, 4>}, {transform_indices = @transform_4, window_bounds = array<i64: 1, 8, 4>}, {transform_indices = @transform_5, window_bounds = array<i64: 1, 8, 4>}, {transform_indices = @transform_6, window_bounds = array<i64: 1, 8, 4>}, {transform_indices = @transform_7, window_bounds = array<i64: 1, 8, 4>}, {transform_indices = @transform_8, window_bounds = array<i64: 1, 8, 4>}, {transform_indices = @transform_9, window_bounds = array<i64: 8, 4>}, {transform_indices = @transform_10, window_bounds = array<i64: 1, 8, 4>}]} {
    %c0 = arith.constant 0 : index
    %c0_0 = arith.constant 0 : index
    %c0_1 = arith.constant 0 : index
    %0 = vector.load %arg2[%c0, %c0_0, %c0_1] : memref<1x8x4xf32, #tpu.memory_space<vmem>>, vector<1x8x4xf32>
    %1 = vector.shape_cast %0 : vector<1x8x4xf32> to vector<8x4xf32>
    %c0_2 = arith.constant 0 : index
    %c0_3 = arith.constant 0 : index
    %c0_4 = arith.constant 0 : index
    %2 = vector.load %arg3[%c0_2, %c0_3, %c0_4] : memref<1x8x4xf32, #tpu.memory_space<vmem>>, vector<1x8x4xf32>
    %3 = vector.shape_cast %2 : vector<1x8x4xf32> to vector<8x4xf32>
    %4 = arith.addf %1, %3 : vector<8x4xf32>
    %c0_5 = arith.constant 0 : index
    %c0_6 = arith.constant 0 : index
    %c0_7 = arith.constant 0 : index
    %5 = vector.load %arg4[%c0_5, %c0_6, %c0_7] : memref<1x8x4xf32, #tpu.memory_space<vmem>>, vector<1x8x4xf32>
    %6 = vector.shape_cast %5 : vector<1x8x4xf32> to vector<8x4xf32>
    %7 = arith.addf %4, %6 : vector<8x4xf32>
    %c0_8 = arith.constant 0 : index
    %c0_9 = arith.constant 0 : index
    %c0_10 = arith.constant 0 : index
    %8 = vector.load %arg5[%c0_8, %c0_9, %c0_10] : memref<1x8x4xf32, #tpu.memory_space<vmem>>, vector<1x8x4xf32>
    %9 = vector.shape_cast %8 : vector<1x8x4xf32> to vector<8x4xf32>
    %10 = arith.addf %7, %9 : vector<8x4xf32>
    %c0_11 = arith.constant 0 : index
    %c0_12 = arith.constant 0 : index
    %c0_13 = arith.constant 0 : index
    %11 = vector.load %arg6[%c0_11, %c0_12, %c0_13] : memref<1x8x4xf32, #tpu.memory_space<vmem>>, vector<1x8x4xf32>
    %12 = vector.shape_cast %11 : vector<1x8x4xf32> to vector<8x4xf32>
    %13 = arith.addf %10, %12 : vector<8x4xf32>
    %c0_14 = arith.constant 0 : index
    %c0_15 = arith.constant 0 : index
    %c0_16 = arith.constant 0 : index
    %14 = vector.load %arg7[%c0_14, %c0_15, %c0_16] : memref<1x8x4xf32, #tpu.memory_space<vmem>>, vector<1x8x4xf32>
    %15 = vector.shape_cast %14 : vector<1x8x4xf32> to vector<8x4xf32>
    %16 = arith.addf %13, %15 : vector<8x4xf32>
    %c0_17 = arith.constant 0 : index
    %c0_18 = arith.constant 0 : index
    %c0_19 = arith.constant 0 : index
    %17 = vector.load %arg8[%c0_17, %c0_18, %c0_19] : memref<1x8x4xf32, #tpu.memory_space<vmem>>, vector<1x8x4xf32>
    %18 = vector.shape_cast %17 : vector<1x8x4xf32> to vector<8x4xf32>
    %19 = arith.addf %16, %18 : vector<8x4xf32>
    %c0_20 = arith.constant 0 : index
    %c0_21 = arith.constant 0 : index
    %c0_22 = arith.constant 0 : index
    %20 = vector.load %arg9[%c0_20, %c0_21, %c0_22] : memref<1x8x4xf32, #tpu.memory_space<vmem>>, vector<1x8x4xf32>
    %21 = vector.shape_cast %20 : vector<1x8x4xf32> to vector<8x4xf32>
    %22 = arith.addf %19, %21 : vector<8x4xf32>
    %c0_23 = arith.constant 0 : index
    %c0_24 = arith.constant 0 : index
    %c0_25 = arith.constant 0 : index
    %23 = vector.load %arg10[%c0_23, %c0_24, %c0_25] : memref<1x8x4xf32, #tpu.memory_space<vmem>>, vector<1x8x4xf32>
    %24 = vector.shape_cast %23 : vector<1x8x4xf32> to vector<8x4xf32>
    %25 = arith.addf %22, %24 : vector<8x4xf32>
    %c0_26 = arith.constant 0 : index
    %c0_27 = arith.constant 0 : index
    %26 = vector.load %arg11[%c0_26, %c0_27] : memref<8x4xf32, #tpu.memory_space<vmem>>, vector<8x4xf32>
    %27 = arith.mulf %25, %26 : vector<8x4xf32>
    %c0_28 = arith.constant 0 : index
    %c0_29 = arith.constant 0 : index
    %c0_30 = arith.constant 0 : index
    %28 = vector.load %arg12[%c0_28, %c0_29, %c0_30] : memref<1x8x4xf32, #tpu.memory_space<vmem>>, vector<1x8x4xf32>
    %29 = vector.shape_cast %28 : vector<1x8x4xf32> to vector<8x4xf32>
    %30 = vector.shape_cast %27 : vector<8x4xf32> to vector<1x8x4xf32>
    tpu.vector_store %arg12[%c0_28, %c0_29, %c0_30], %30 {strides = array<i32>} : memref<1x8x4xf32, #tpu.memory_space<vmem>>, vector<1x8x4xf32>,
    return
  }
  func.func @transform_0(%arg0: i32, %arg1: i32) -> (i32, i32, i32) {
    %c0_i32 = arith.constant 0 : i32
    %c0_i32_0 = arith.constant 0 : i32
    return %arg0, %arg1, %c0_i32 : i32, i32, i32
  }
  func.func @transform_1(%arg0: i32, %arg1: i32) -> (i32, i32, i32) {
    %c0_i32 = arith.constant 0 : i32
    %c0_i32_0 = arith.constant 0 : i32
    return %arg0, %arg1, %c0_i32 : i32, i32, i32
  }
  func.func @transform_2(%arg0: i32, %arg1: i32) -> (i32, i32, i32) {
    %c0_i32 = arith.constant 0 : i32
    %c0_i32_0 = arith.constant 0 : i32
    return %arg0, %arg1, %c0_i32 : i32, i32, i32
  }
  func.func @transform_3(%arg0: i32, %arg1: i32) -> (i32, i32, i32) {
    %c0_i32 = arith.constant 0 : i32
    %c0_i32_0 = arith.constant 0 : i32
    return %arg0, %arg1, %c0_i32 : i32, i32, i32
  }
  func.func @transform_4(%arg0: i32, %arg1: i32) -> (i32, i32, i32) {
    %c0_i32 = arith.constant 0 : i32
    %c0_i32_0 = arith.constant 0 : i32
    return %arg0, %arg1, %c0_i32 : i32, i32, i32
  }
  func.func @transform_5(%arg0: i32, %arg1: i32) -> (i32, i32, i32) {
    %c0_i32 = arith.constant 0 : i32
    %c0_i32_0 = arith.constant 0 : i32
    return %arg0, %arg1, %c0_i32 : i32, i32, i32
  }
  func.func @transform_6(%arg0: i32, %arg1: i32) -> (i32, i32, i32) {
    %c0_i32 = arith.constant 0 : i32
    %c0_i32_0 = arith.constant 0 : i32
    return %arg0, %arg1, %c0_i32 : i32, i32, i32
  }
  func.func @transform_7(%arg0: i32, %arg1: i32) -> (i32, i32, i32) {
    %c0_i32 = arith.constant 0 : i32
    %c0_i32_0 = arith.constant 0 : i32
    return %arg0, %arg1, %c0_i32 : i32, i32, i32
  }
  func.func @transform_8(%arg0: i32, %arg1: i32) -> (i32, i32, i32) {
    %c0_i32 = arith.constant 0 : i32
    %c0_i32_0 = arith.constant 0 : i32
    return %arg0, %arg1, %c0_i32 : i32, i32, i32
  }
  func.func @transform_9(%arg0: i32, %arg1: i32) -> (i32, i32) {
    %c0_i32 = arith.constant 0 : i32
    %c0_i32_0 = arith.constant 0 : i32
    return %arg1, %c0_i32 : i32, i32
  }
  func.func @transform_10(%arg0: i32, %arg1: i32) -> (i32, i32, i32) {
    %c0_i32 = arith.constant 0 : i32
    %c0_i32_0 = arith.constant 0 : i32
    return %arg0, %arg1, %c0_i32 : i32, i32, i32
  }
}

module attributes {stable_mosaic.version = 11 : i64} {
  func.func @_conv_matmul_kernel(%arg0: i32, %arg1: i32, %arg2: memref<24x128xbf16, #tpu.memory_space<vmem>>, %arg3: memref<128x128xbf16, #tpu.memory_space<vmem>>, %arg4: memref<1x128xf32, #tpu.memory_space<vmem>>, %arg5: memref<24x128xf32, #tpu.memory_space<vmem>>, %arg6: memref<8x128xf32, #tpu.memory_space<vmem>>, %arg7: memref<8x128xf32, #tpu.memory_space<vmem>>) attributes {dimension_semantics = [#tpu.dimension_semantics<parallel>, #tpu.dimension_semantics<arbitrary>], iteration_bounds = array<i64: 1, 1>, scalar_prefetch = 0 : i64, scratch_operands = 0 : i64, tpu.core_type = #tpu.core_type<tc>, window_params = [{transform_indices = @transform_0, window_bounds = array<i64: 24, 128>}, {transform_indices = @transform_1, window_bounds = array<i64: 128, 128>}, {pipeline_mode = #tpu.pipeline_mode<synchronous>, transform_indices = @transform_2, window_bounds = array<i64: 1, 128>}, {transform_indices = @transform_3, window_bounds = array<i64: 24, 128>}, {transform_indices = @transform_4, window_bounds = array<i64: 8, 128>}, {transform_indices = @transform_5, window_bounds = array<i64: 8, 128>}]} {
    %c0_i32 = arith.constant 0 : i32
    %0 = arith.cmpi eq, %arg1, %c0_i32 : i32
    %1 = arith.extui %0 : i1 to i32
    %c0_i32_0 = arith.constant 0 : i32
    %2 = arith.cmpi ne, %1, %c0_i32_0 : i32
    scf.if %2 {
      %cst_10 = arith.constant 0.000000e+00 : f32
      %12 = vector.broadcast %cst_10 : f32 to vector<24x128xf32>
      %c0_11 = arith.constant 0 : index
      %c0_12 = arith.constant 0 : index
      %13 = vector.load %arg5[%c0_11, %c0_12] : memref<24x128xf32, #tpu.memory_space<vmem>>, vector<24x128xf32>
      tpu.vector_store %arg5[%c0_11, %c0_12], %12 {strides = array<i32>} : memref<24x128xf32, #tpu.memory_space<vmem>>, vector<24x128xf32>,
    } else {
    }
    %c0 = arith.constant 0 : index
    %c0_1 = arith.constant 0 : index
    %3 = vector.load %arg5[%c0, %c0_1] : memref<24x128xf32, #tpu.memory_space<vmem>>, vector<24x128xf32>
    %c0_2 = arith.constant 0 : index
    %c0_3 = arith.constant 0 : index
    %4 = vector.load %arg2[%c0_2, %c0_3] : memref<24x128xbf16, #tpu.memory_space<vmem>>, vector<24x128xbf16>
    %c0_4 = arith.constant 0 : index
    %c0_5 = arith.constant 0 : index
    %5 = vector.load %arg3[%c0_4, %c0_5] : memref<128x128xbf16, #tpu.memory_space<vmem>>, vector<128x128xbf16>
    %cst = arith.constant dense<0.000000e+00> : vector<24x128xf32>
    %6 = tpu.matmul %4, %5, %cst {dimension_numbers = #tpu.dot_dimension_numbers<[1], [0], [0], [1], [0, 0, 1, 1], [], []>} : vector<24x128xbf16>, vector<128x128xbf16>, vector<24x128xf32> -> vector<24x128xf32>
    %7 = arith.addf %3, %6 : vector<24x128xf32>
    %c0_6 = arith.constant 0 : index
    %c0_7 = arith.constant 0 : index
    %8 = vector.load %arg5[%c0_6, %c0_7] : memref<24x128xf32, #tpu.memory_space<vmem>>, vector<24x128xf32>
    tpu.vector_store %arg5[%c0_6, %c0_7], %7 {strides = array<i32>} : memref<24x128xf32, #tpu.memory_space<vmem>>, vector<24x128xf32>,
    %c0_i32_8 = arith.constant 0 : i32
    %9 = arith.cmpi eq, %arg1, %c0_i32_8 : i32
    %10 = arith.extui %9 : i1 to i32
    %c0_i32_9 = arith.constant 0 : i32
    %11 = arith.cmpi ne, %10, %c0_i32_9 : i32
    scf.if %11 {
      %c0_10 = arith.constant 0 : index
      %c0_11 = arith.constant 0 : index
      %12 = vector.load %arg5[%c0_10, %c0_11] : memref<24x128xf32, #tpu.memory_space<vmem>>, vector<24x128xf32>
      %c0_12 = arith.constant 0 : index
      %c0_13 = arith.constant 0 : index
      %13 = vector.load %arg4[%c0_12, %c0_13] : memref<1x128xf32, #tpu.memory_space<vmem>>, vector<1x128xf32>
      %14 = vector.broadcast %13 : vector<1x128xf32> to vector<24x128xf32>
      %15 = arith.addf %12, %14 : vector<24x128xf32>
      %cst_14 = arith.constant 0.000000e+00 : f32
      %16 = vector.broadcast %cst_14 : f32 to vector<8x128xf32>
      %c0_15 = arith.constant 0 : index
      %c0_16 = arith.constant 0 : index
      %17 = vector.load %arg6[%c0_15, %c0_16] : memref<8x128xf32, #tpu.memory_space<vmem>>, vector<8x128xf32>
      tpu.vector_store %arg6[%c0_15, %c0_16], %16 {strides = array<i32>} : memref<8x128xf32, #tpu.memory_space<vmem>>, vector<8x128xf32>,
      %cst_17 = arith.constant 0.000000e+00 : f32
      %18 = vector.broadcast %cst_17 : f32 to vector<8x128xf32>
      %c0_18 = arith.constant 0 : index
      %c0_19 = arith.constant 0 : index
      %19 = vector.load %arg7[%c0_18, %c0_19] : memref<8x128xf32, #tpu.memory_space<vmem>>, vector<8x128xf32>
      tpu.vector_store %arg7[%c0_18, %c0_19], %18 {strides = array<i32>} : memref<8x128xf32, #tpu.memory_space<vmem>>, vector<8x128xf32>,
      %cst_20 = arith.constant 0.000000e+00 : f32
      %20 = vector.broadcast %cst_20 : f32 to vector<24x128xf32>
      %21 = arith.cmpf oge, %15, %20 : vector<24x128xf32>
      %cst_21 = arith.constant 2.000000e-01 : f32
      %22 = vector.broadcast %cst_21 : f32 to vector<24x128xf32>
      %23 = arith.mulf %22, %15 : vector<24x128xf32>
      %24 = arith.select %21, %15, %23 : vector<24x128xi1>, vector<24x128xf32>
      %c0_22 = arith.constant 0 : index
      %c0_23 = arith.constant 0 : index
      %25 = vector.load %arg5[%c0_22, %c0_23] : memref<24x128xf32, #tpu.memory_space<vmem>>, vector<24x128xf32>
      tpu.vector_store %arg5[%c0_22, %c0_23], %24 {strides = array<i32>} : memref<24x128xf32, #tpu.memory_space<vmem>>, vector<24x128xf32>,
    } else {
    }
    return
  }
  func.func @transform_0(%arg0: i32, %arg1: i32) -> (i32, i32) {
    %c0_i32 = arith.constant 0 : i32
    return %arg0, %arg1 : i32, i32
  }
  func.func @transform_1(%arg0: i32, %arg1: i32) -> (i32, i32) {
    %c0_i32 = arith.constant 0 : i32
    %c0_i32_0 = arith.constant 0 : i32
    return %arg1, %c0_i32 : i32, i32
  }
  func.func @transform_2(%arg0: i32, %arg1: i32) -> (i32, i32) {
    %c0_i32 = arith.constant 0 : i32
    %c0_i32_0 = arith.constant 0 : i32
    %c0_i32_1 = arith.constant 0 : i32
    return %c0_i32, %c0_i32_0 : i32, i32
  }
  func.func @transform_3(%arg0: i32, %arg1: i32) -> (i32, i32) {
    %c0_i32 = arith.constant 0 : i32
    %c0_i32_0 = arith.constant 0 : i32
    return %arg0, %c0_i32 : i32, i32
  }
  func.func @transform_4(%arg0: i32, %arg1: i32) -> (i32, i32) {
    %c0_i32 = arith.constant 0 : i32
    %c0_i32_0 = arith.constant 0 : i32
    return %arg0, %c0_i32 : i32, i32
  }
  func.func @transform_5(%arg0: i32, %arg1: i32) -> (i32, i32) {
    %c0_i32 = arith.constant 0 : i32
    %c0_i32_0 = arith.constant 0 : i32
    return %arg0, %c0_i32 : i32, i32
  }
}

module attributes {stable_mosaic.version = 11 : i64} {
  func.func @_conv_matmul_kernel(%arg0: i32, %arg1: i32, %arg2: memref<8x128xbf16, #tpu.memory_space<vmem>>, %arg3: memref<128x128xbf16, #tpu.memory_space<vmem>>, %arg4: memref<1x128xf32, #tpu.memory_space<vmem>>, %arg5: memref<8x128xf32, #tpu.memory_space<vmem>>, %arg6: memref<8x128xf32, #tpu.memory_space<vmem>>, %arg7: memref<8x128xf32, #tpu.memory_space<vmem>>) attributes {dimension_semantics = [#tpu.dimension_semantics<parallel>, #tpu.dimension_semantics<arbitrary>], iteration_bounds = array<i64: 1, 1>, scalar_prefetch = 0 : i64, scratch_operands = 0 : i64, tpu.core_type = #tpu.core_type<tc>, window_params = [{transform_indices = @transform_0, window_bounds = array<i64: 8, 128>}, {transform_indices = @transform_1, window_bounds = array<i64: 128, 128>}, {pipeline_mode = #tpu.pipeline_mode<synchronous>, transform_indices = @transform_2, window_bounds = array<i64: 1, 128>}, {transform_indices = @transform_3, window_bounds = array<i64: 8, 128>}, {transform_indices = @transform_4, window_bounds = array<i64: 8, 128>}, {transform_indices = @transform_5, window_bounds = array<i64: 8, 128>}]} {
    %c0_i32 = arith.constant 0 : i32
    %0 = arith.cmpi eq, %arg1, %c0_i32 : i32
    %1 = arith.extui %0 : i1 to i32
    %c0_i32_0 = arith.constant 0 : i32
    %2 = arith.cmpi ne, %1, %c0_i32_0 : i32
    scf.if %2 {
      %cst_10 = arith.constant 0.000000e+00 : f32
      %12 = vector.broadcast %cst_10 : f32 to vector<8x128xf32>
      %c0_11 = arith.constant 0 : index
      %c0_12 = arith.constant 0 : index
      %13 = vector.load %arg5[%c0_11, %c0_12] : memref<8x128xf32, #tpu.memory_space<vmem>>, vector<8x128xf32>
      tpu.vector_store %arg5[%c0_11, %c0_12], %12 {strides = array<i32>} : memref<8x128xf32, #tpu.memory_space<vmem>>, vector<8x128xf32>,
    } else {
    }
    %c0 = arith.constant 0 : index
    %c0_1 = arith.constant 0 : index
    %3 = vector.load %arg5[%c0, %c0_1] : memref<8x128xf32, #tpu.memory_space<vmem>>, vector<8x128xf32>
    %c0_2 = arith.constant 0 : index
    %c0_3 = arith.constant 0 : index
    %4 = vector.load %arg2[%c0_2, %c0_3] : memref<8x128xbf16, #tpu.memory_space<vmem>>, vector<8x128xbf16>
    %c0_4 = arith.constant 0 : index
    %c0_5 = arith.constant 0 : index
    %5 = vector.load %arg3[%c0_4, %c0_5] : memref<128x128xbf16, #tpu.memory_space<vmem>>, vector<128x128xbf16>
    %cst = arith.constant dense<0.000000e+00> : vector<8x128xf32>
    %6 = tpu.matmul %4, %5, %cst {dimension_numbers = #tpu.dot_dimension_numbers<[1], [0], [0], [1], [0, 0, 1, 1], [], []>} : vector<8x128xbf16>, vector<128x128xbf16>, vector<8x128xf32> -> vector<8x128xf32>
    %7 = arith.addf %3, %6 : vector<8x128xf32>
    %c0_6 = arith.constant 0 : index
    %c0_7 = arith.constant 0 : index
    %8 = vector.load %arg5[%c0_6, %c0_7] : memref<8x128xf32, #tpu.memory_space<vmem>>, vector<8x128xf32>
    tpu.vector_store %arg5[%c0_6, %c0_7], %7 {strides = array<i32>} : memref<8x128xf32, #tpu.memory_space<vmem>>, vector<8x128xf32>,
    %c0_i32_8 = arith.constant 0 : i32
    %9 = arith.cmpi eq, %arg1, %c0_i32_8 : i32
    %10 = arith.extui %9 : i1 to i32
    %c0_i32_9 = arith.constant 0 : i32
    %11 = arith.cmpi ne, %10, %c0_i32_9 : i32
    scf.if %11 {
      %c0_10 = arith.constant 0 : index
      %c0_11 = arith.constant 0 : index
      %12 = vector.load %arg5[%c0_10, %c0_11] : memref<8x128xf32, #tpu.memory_space<vmem>>, vector<8x128xf32>
      %c0_12 = arith.constant 0 : index
      %c0_13 = arith.constant 0 : index
      %13 = vector.load %arg4[%c0_12, %c0_13] : memref<1x128xf32, #tpu.memory_space<vmem>>, vector<1x128xf32>
      %14 = vector.broadcast %13 : vector<1x128xf32> to vector<8x128xf32>
      %15 = arith.addf %12, %14 : vector<8x128xf32>
      %cst_14 = arith.constant dense<0.000000e+00> : vector<128xf32>
      %16 = vector.multi_reduction <add>, %15, %cst_14 [0] : vector<8x128xf32> to vector<128xf32>
      %17 = vector.shape_cast %16 : vector<128xf32> to vector<1x128xf32>
      %18 = arith.mulf %15, %15 : vector<8x128xf32>
      %cst_15 = arith.constant dense<0.000000e+00> : vector<128xf32>
      %19 = vector.multi_reduction <add>, %18, %cst_15 [0] : vector<8x128xf32> to vector<128xf32>
      %20 = vector.shape_cast %19 : vector<128xf32> to vector<1x128xf32>
      %21 = vector.shape_cast %17 : vector<1x128xf32> to vector<1x128xf32>
      %22 = vector.broadcast %21 : vector<1x128xf32> to vector<8x128xf32>
      %c0_16 = arith.constant 0 : index
      %c0_17 = arith.constant 0 : index
      %23 = vector.load %arg6[%c0_16, %c0_17] : memref<8x128xf32, #tpu.memory_space<vmem>>, vector<8x128xf32>
      tpu.vector_store %arg6[%c0_16, %c0_17], %22 {strides = array<i32>} : memref<8x128xf32, #tpu.memory_space<vmem>>, vector<8x128xf32>,
      %24 = vector.shape_cast %20 : vector<1x128xf32> to vector<1x128xf32>
      %25 = vector.broadcast %24 : vector<1x128xf32> to vector<8x128xf32>
      %c0_18 = arith.constant 0 : index
      %c0_19 = arith.constant 0 : index
      %26 = vector.load %arg7[%c0_18, %c0_19] : memref<8x128xf32, #tpu.memory_space<vmem>>, vector<8x128xf32>
      tpu.vector_store %arg7[%c0_18, %c0_19], %25 {strides = array<i32>} : memref<8x128xf32, #tpu.memory_space<vmem>>, vector<8x128xf32>,
      %c0_20 = arith.constant 0 : index
      %c0_21 = arith.constant 0 : index
      %27 = vector.load %arg5[%c0_20, %c0_21] : memref<8x128xf32, #tpu.memory_space<vmem>>, vector<8x128xf32>
      tpu.vector_store %arg5[%c0_20, %c0_21], %15 {strides = array<i32>} : memref<8x128xf32, #tpu.memory_space<vmem>>, vector<8x128xf32>,
    } else {
    }
    return
  }
  func.func @transform_0(%arg0: i32, %arg1: i32) -> (i32, i32) {
    %c0_i32 = arith.constant 0 : i32
    return %arg0, %arg1 : i32, i32
  }
  func.func @transform_1(%arg0: i32, %arg1: i32) -> (i32, i32) {
    %c0_i32 = arith.constant 0 : i32
    %c0_i32_0 = arith.constant 0 : i32
    return %arg1, %c0_i32 : i32, i32
  }
  func.func @transform_2(%arg0: i32, %arg1: i32) -> (i32, i32) {
    %c0_i32 = arith.constant 0 : i32
    %c0_i32_0 = arith.constant 0 : i32
    %c0_i32_1 = arith.constant 0 : i32
    return %c0_i32, %c0_i32_0 : i32, i32
  }
  func.func @transform_3(%arg0: i32, %arg1: i32) -> (i32, i32) {
    %c0_i32 = arith.constant 0 : i32
    %c0_i32_0 = arith.constant 0 : i32
    return %arg0, %c0_i32 : i32, i32
  }
  func.func @transform_4(%arg0: i32, %arg1: i32) -> (i32, i32) {
    %c0_i32 = arith.constant 0 : i32
    %c0_i32_0 = arith.constant 0 : i32
    return %arg0, %c0_i32 : i32, i32
  }
  func.func @transform_5(%arg0: i32, %arg1: i32) -> (i32, i32) {
    %c0_i32 = arith.constant 0 : i32
    %c0_i32_0 = arith.constant 0 : i32
    return %arg0, %c0_i32 : i32, i32
  }
}

</mosaic_0001>

<bundles_post_ra>
// kernel: multiscale_forward.26
= control target key start
LH: loop header
LB: loop body
LE: loop exit
PB: predicated region body
PF: predicated region fallthrough
CT: control target
= control target key end

     0   :  { %11 = vsyncpa [#allocation3], 0  ;;  %v733_v1 = vmov 0.0   ;;  %vm734_vm0 = vmmov 0   ;;  %s977_s0 = inlined_call_operand.vmem [shape: bf16[168,128], index: 0, kind: input, shape index: {}]   ;;  %s978_s1 = inlined_call_operand.vmem [shape: bf16[128,128], index: 1, kind: input, shape index: {}]   ;;  %s979_s2 = inlined_call_operand.vmem [shape: f32[1,128], index: 2, kind: input, shape index: {}]   ;;  %s980_s3 = inlined_call_operand.vmem [shape: f32[168,128], index: 3, kind: output, shape index: {0}]   ;;  %s981_s4 = inlined_call_operand.hbm [shape: f32[8,128], index: 4, kind: output, shape index: {1}]   ;;  %s982_s5 = inlined_call_operand.hbm [shape: f32[8,128], index: 5, kind: output, shape index: {2}]  }
   0x1   :  { %v666_v0 = vld [vmem:[%s978_s1] sm:$0xff]   ;;  %586 = vmatprep.subr.bf16.mxu0 %v733_v1  ;;  %429 = vst [vmem:[#allocation2] sm:$0xff] %v733_v1  ;;  %430 = vst [vmem:[#allocation4] sm:$0xff] %v733_v1  ;;  %646 = vmatprep.subr.bf16.mxu1 %v733_v1  ;;  %v667_v2 = vld [vmem:[%s978_s1 + $0x8] sm:$0xff]  }
   0x2   :  { %587 = vmatpush3.bf16.msra.mxu0 %v666_v0  ;;  %654 = vmatpush3.bf16.msra.mxu1 %v666_v0  ;;  %v668_v3 = vld [vmem:[%s978_s1 + $0x10] sm:$0xff]   ;;  %v669_v4 = vld [vmem:[%s978_s1 + $0x18] sm:$0xff]   ;;  %v670_v5 = vld [vmem:[%s978_s1 + $0x20] sm:$0xff]  }
   0x3   :  { %588 = vmatprep.subr.bf16.mxu0 %v733_v1  ;;  %647 = vmatprep.subr.bf16.mxu1 %v733_v1  ;;  %v671_v6 = vld [vmem:[%s978_s1 + $0x28] sm:$0xff]  }
   0x4   :  { %602 = vmatprep.mubr.msk.bf16.mxu0 %vm734_vm0, %v733_v1  ;;  %626 = vmatprep.mubr.msk.bf16.mxu1 %vm734_vm0, %v733_v1 }
   0x6   :  { %589 = vmatpush3.bf16.msra.mxu0 %v667_v2  ;;  %655 = vmatpush3.bf16.msra.mxu1 %v667_v2 }
   0x7   :  { %590 = vmatprep.subr.bf16.mxu0 %v733_v1  ;;  %648 = vmatprep.subr.bf16.mxu1 %v733_v1 }
   0xa   :  { %591 = vmatpush3.bf16.msra.mxu0 %v668_v3  ;;  %656 = vmatpush3.bf16.msra.mxu1 %v668_v3 }
   0xb   :  { %592 = vmatprep.subr.bf16.mxu0 %v733_v1  ;;  %649 = vmatprep.subr.bf16.mxu1 %v733_v1 }
   0xe   :  { %593 = vmatpush3.bf16.msra.mxu0 %v669_v4  ;;  %657 = vmatpush3.bf16.msra.mxu1 %v669_v4 }
   0xf   :  { %594 = vmatprep.subr.bf16.mxu0 %v733_v1  ;;  %650 = vmatprep.subr.bf16.mxu1 %v733_v1 }
  0x12   :  { %595 = vmatpush3.bf16.msra.mxu0 %v670_v5  ;;  %658 = vmatpush3.bf16.msra.mxu1 %v670_v5 }
  0x13   :  { %12 = vsyncpa [#allocation5], 0  ;;  %596 = vmatprep.subr.bf16.mxu0 %v733_v1  ;;  %651 = vmatprep.subr.bf16.mxu1 %v733_v1  ;;  %v672_v7 = vld [vmem:[%s978_s1 + $0x30] sm:$0xff]   ;;  %v673_v8 = vld [vmem:[%s978_s1 + $0x38] sm:$0xff]   ;;  %s735_s30 = smov [#allocation2]   ;;  %s736_s7 = smov [#allocation4]  }
  0x14   :  { %v674_v9 = vld [vmem:[%s977_s0] sm:$0xff]   ;;  %v675_v10 = vld [vmem:[%s977_s0 + $0x30] sm:$0xff]   ;;  %v676_v11 = vld [vmem:[%s977_s0 + $0x8] sm:$0xff]   ;;  %s523_s6 = sshll.u32 %s735_s30, 4  ;;  %s533_s8 = sshll.u32 %s736_s7, 4  ;;  %s524_s6 = int_to_ptr.vmem [resolvable:$true] %s523_s6  ;;  %s534_s8 = int_to_ptr.vmem [resolvable:$true] %s533_s8 }
  0x15   :  { %v677_v12 = vld [vmem:[%s977_s0 + $0x38] sm:$0xff]   ;;  %v678_v13 = vld [vmem:[%s977_s0 + $0x10] sm:$0xff]   ;;  %v679_v14 = vld [vmem:[%s977_s0 + $0x40] sm:$0xff]   ;;  %s685_s9 = scalar_lea.vmem %s524_s6, 128  ;;  %p690_p1 = scmp.lt.s32.totalorder %s524_s6, %s524_s6 }
  0x16   :  { %597 = vmatpush3.bf16.msra.mxu0 %v671_v6  ;;  %659 = vmatpush3.bf16.msra.mxu1 %v671_v6  ;;  %v680_v15 = vld [vmem:[%s977_s0 + $0x18] sm:$0xff]   ;;  %v681_v16 = vld [vmem:[%s977_s0 + $0x48] sm:$0xff]   ;;  %v682_v17 = vld [vmem:[%s977_s0 + $0x20] sm:$0xff]   ;;  %p686_p0 = scmp.ne.s32.totalorder %s524_s6, %s685_s9  ;;  %p691_p2 = scmp.lt.s32.totalorder %s685_s9, %s685_s9 }
  0x17   :  { %598 = vmatprep.subr.bf16.mxu0 %v733_v1  ;;  %652 = vmatprep.subr.bf16.mxu1 %v733_v1  ;;  %v683_v18 = vld [vmem:[%s977_s0 + $0x50] ss:$0 sps:$4 sm:$0xff]   ;;  %v684_v19 = vld [vmem:[%s977_s0 + $0x28] sm:$0xff]  }
  0x18   :  { %p692_p3 = por %p691_p2, %p690_p1 }
  0x1a   :  { %599 = vmatpush3.bf16.msra.mxu0 %v672_v7  ;;  %660 = vmatpush3.bf16.msra.mxu1 %v672_v7  ;;  %p693_p4 = pnand %p692_p3, %p686_p0 }
  0x1b   :  { %600 = vmatprep.subr.bf16.mxu0 %v733_v1  ;;  %653 = vmatprep.subr.bf16.mxu1 %v733_v1 }
  0x1e   :  { %601 = vmatpush3.bf16.msra.mxu0 %v673_v8  ;;  %661 = vmatpush3.bf16.msra.mxu1 %v673_v8 }
  0x21   :  { %603 = vmatmul.mubr.bf16.vlgmr.msra.gmra.mrb[0].mxu0 %v674_v9  ;;  %627 = vmatmul.mubr.bf16.vlgmr.msra.gmra.mrb[0].mxu1 %v675_v10 }
  0x22   :  { %606 = vmatprep.mubr.msk.bf16.mxu0 %vm734_vm0, %v733_v1  ;;  %630 = vmatprep.mubr.msk.bf16.mxu1 %vm734_vm0, %v733_v1 }
  0x29   :  { %607 = vmatmul.mubr.bf16.gmra.mrb[4].mxu0 %v676_v11  ;;  %631 = vmatmul.mubr.bf16.gmra.mrb[4].mxu1 %v677_v12 }
  0x2a   :  { %610 = vmatprep.mubr.msk.bf16.mxu0 %vm734_vm0, %v733_v1  ;;  %634 = vmatprep.mubr.msk.bf16.mxu1 %vm734_vm0, %v733_v1 }
  0x31   :  { %611 = vmatmul.mubr.bf16.gmra.mrb[8].mxu0 %v678_v13  ;;  %635 = vmatmul.mubr.bf16.gmra.mrb[8].mxu1 %v679_v14 }
  0x32   :  { %614 = vmatprep.mubr.msk.bf16.mxu0 %vm734_vm0, %v733_v1  ;;  %638 = vmatprep.mubr.msk.bf16.mxu1 %vm734_vm0, %v733_v1 }
  0x39   :  { %615 = vmatmul.mubr.bf16.gmra.mrb[12].mxu0 %v680_v15  ;;  %639 = vmatmul.mubr.bf16.gmra.mrb[12].mxu1 %v681_v16 }
  0x3a   :  { %618 = vmatprep.mubr.msk.bf16.mxu0 %vm734_vm0, %v733_v1  ;;  %642 = vmatprep.mubr.msk.bf16.mxu1 %vm734_vm0, %v733_v1 }
  0x41   :  { %619 = vmatmul.mubr.bf16.gmra.mrb[16].mxu0 %v682_v17  ;;  %643 = vmatmul.mubr.bf16.gmra.mrb[16].mxu1 %v683_v18 }
  0x42   :  { %622 = vmatprep.mubr.msk.bf16.mxu0 %vm734_vm0, %v733_v1 }
  0x49   :  { %623 = vmatmul.mubr.bf16.gmra.mrb[20].mxu0 %v684_v19 }
  0x4a   :  { %696 = shalt.err (!%p693_p4)
}
  0x4b   :  { %s697_s12 = scalar_lea.hbm %s981_s4, 128 }
  0x4c   :  { %p698_p5 = scmp.ne.s32.totalorder %s981_s4, %s697_s12  ;;  %p701_p6 = scmp.lt.u32.totalorder %s697_s12, %s981_s4 }
  0x4e   :  { %p703_p7 = pnand %p701_p6, %p698_p5 }
  0x50   :  { %706 = shalt.err (!%p703_p7)
}
  0x51   :  { %526 = dma.vmem_to_hbm [thread:$0]  %s524_s6, 128, %s981_s4, [#allocation3]  }
  0x52   :  { %s707_s17 = scalar_lea.vmem %s534_s8, 128  ;;  %p712_p9 = scmp.lt.s32.totalorder %s534_s8, %s534_s8 }
  0x53   :  { %p708_p8 = scmp.ne.s32.totalorder %s534_s8, %s707_s17  ;;  %p713_p10 = scmp.lt.s32.totalorder %s707_s17, %s707_s17 }
  0x55   :  { %p714_p11 = por %p713_p10, %p712_p9 }
  0x57   :  { %p715_p12 = pnand %p714_p11, %p708_p8 }
  0x59   :  { %718 = shalt.err (!%p715_p12)
}
  0x5a   :  { %s719_s20 = scalar_lea.hbm %s982_s5, 128 }
  0x5b   :  { %p720_p13 = scmp.ne.s32.totalorder %s982_s5, %s719_s20  ;;  %p723_p0 = scmp.lt.u32.totalorder %s719_s20, %s982_s5 }
  0x5d   :  { %p725_p1 = pnand %p723_p0, %p720_p13 }
  0x5f   :  { %728 = shalt.err (!%p725_p1)
}
  0x60   :  { %536 = dma.vmem_to_hbm [thread:$0]  %s534_s8, 128, %s982_s5, [#allocation5]   ;;  %v891_v21 = vld [vmem:[%s979_s2] ss:$0 sm:$0xff] }
  0xf4   :  { %v249_v20 = vpop.f32.mrb[0].mxu0  ;;  %v297_v22 = vpop.f32.mrb[0].mxu1 }
  0xf5   :  { %v604_v23 = vpop.f32.mrb[1].mxu0  ;;  %v628_v24 = vpop.f32.mrb[1].mxu1  ;;  %v408_v27 = vadd.f32 %v891_v21, %v249_v20  ;;  %v420_v29 = vadd.f32 %v891_v21, %v297_v22 }
  0xf6   :  { %v252_v25 = vpop.f32.mrb[2].mxu0  ;;  %v300_v26 = vpop.f32.mrb[2].mxu1 }
  0xf7   :  { %v605_v28 = vpop.f32.mrb[3].mxu0  ;;  %v629_v30 = vpop.f32.mrb[3].mxu1  ;;  %vm431_vm1 = vcmp.ge.f32.partialorder %v408_v27, 0.0  ;;  %v452_v31 = vmul.f32 0.2, %v408_v27  ;;  %v409_v32 = vadd.f32 %v891_v21, %v252_v25  ;;  %vm443_vm2 = vcmp.ge.f32.partialorder %v420_v29, 0.0 }
  0xf8   :  { %v464_v33 = vmul.f32 0.2, %v420_v29  ;;  %v421_v34 = vadd.f32 %v891_v21, %v300_v26 }
  0xf9   :  { %v473_v35 = vsel %vm431_vm1, %v408_v27, %v452_v31  ;;  %vm432_vm3 = vcmp.ge.f32.partialorder %v409_v32, 0.0  ;;  %v453_v36 = vmul.f32 0.2, %v409_v32 }
  0xfa   :  { %494 = vst [vmem:[%s980_s3] sm:$0xff] %v473_v35  ;;  %v485_v37 = vsel %vm443_vm2, %v420_v29, %v464_v33  ;;  %vm444_vm4 = vcmp.ge.f32.partialorder %v421_v34, 0.0  ;;  %v465_v39 = vmul.f32 0.2, %v421_v34 }
  0xfb   :  { %v474_v41 = vsel %vm432_vm3, %v409_v32, %v453_v36  ;;  %506 = vst [vmem:[%s980_s3 + $0x60] sm:$0xff] %v485_v37 }
  0xfc   :  { %v257_v38 = vpop.f32.mrb[4].mxu0  ;;  %v305_v40 = vpop.f32.mrb[4].mxu1  ;;  %495 = vst [vmem:[%s980_s3 + $0x8] sm:$0xff] %v474_v41  ;;  %v486_v44 = vsel %vm444_vm4, %v421_v34, %v465_v39 }
  0xfd   :  { %v608_v42 = vpop.f32.mrb[5].mxu0  ;;  %v632_v43 = vpop.f32.mrb[5].mxu1  ;;  %v410_v47 = vadd.f32 %v891_v21, %v257_v38  ;;  %507 = vst [vmem:[%s980_s3 + $0x68] sm:$0xff] %v486_v44  ;;  %v422_v49 = vadd.f32 %v891_v21, %v305_v40 }
  0xfe   :  { %v260_v45 = vpop.f32.mrb[6].mxu0  ;;  %v308_v46 = vpop.f32.mrb[6].mxu1 }
  0xff   :  { %v609_v48 = vpop.f32.mrb[7].mxu0  ;;  %v633_v50 = vpop.f32.mrb[7].mxu1  ;;  %vm433_vm5 = vcmp.ge.f32.partialorder %v410_v47, 0.0  ;;  %v454_v51 = vmul.f32 0.2, %v410_v47  ;;  %v411_v52 = vadd.f32 %v891_v21, %v260_v45  ;;  %vm445_vm6 = vcmp.ge.f32.partialorder %v422_v49, 0.0 }
 0x100   :  { %v466_v53 = vmul.f32 0.2, %v422_v49  ;;  %v423_v54 = vadd.f32 %v891_v21, %v308_v46 }
 0x101   :  { %v475_v55 = vsel %vm433_vm5, %v410_v47, %v454_v51  ;;  %vm434_vm7 = vcmp.ge.f32.partialorder %v411_v52, 0.0  ;;  %v455_v56 = vmul.f32 0.2, %v411_v52 }
 0x102   :  { %496 = vst [vmem:[%s980_s3 + $0x10] sm:$0xff] %v475_v55  ;;  %v487_v57 = vsel %vm445_vm6, %v422_v49, %v466_v53  ;;  %vm446_vm8 = vcmp.ge.f32.partialorder %v423_v54, 0.0  ;;  %v467_v59 = vmul.f32 0.2, %v423_v54 }
 0x103   :  { %v476_v61 = vsel %vm434_vm7, %v411_v52, %v455_v56  ;;  %508 = vst [vmem:[%s980_s3 + $0x70] sm:$0xff] %v487_v57 }
 0x104   :  { %v265_v58 = vpop.f32.mrb[8].mxu0  ;;  %v313_v60 = vpop.f32.mrb[8].mxu1  ;;  %497 = vst [vmem:[%s980_s3 + $0x18] sm:$0xff] %v476_v61  ;;  %v488_v0 = vsel %vm446_vm8, %v423_v54, %v467_v59 }
 0x105   :  { %v612_v62 = vpop.f32.mrb[9].mxu0  ;;  %v636_v63 = vpop.f32.mrb[9].mxu1  ;;  %v412_v3 = vadd.f32 %v891_v21, %v265_v58  ;;  %509 = vst [vmem:[%s980_s3 + $0x78] sm:$0xff] %v488_v0  ;;  %v424_v5 = vadd.f32 %v891_v21, %v313_v60 }
 0x106   :  { %v268_v1 = vpop.f32.mrb[10].mxu0  ;;  %v316_v2 = vpop.f32.mrb[10].mxu1 }
 0x107   :  { %v613_v4 = vpop.f32.mrb[11].mxu0  ;;  %v637_v6 = vpop.f32.mrb[11].mxu1  ;;  %vm435_vm9 = vcmp.ge.f32.partialorder %v412_v3, 0.0  ;;  %v456_v7 = vmul.f32 0.2, %v412_v3  ;;  %v413_v8 = vadd.f32 %v891_v21, %v268_v1  ;;  %vm447_vm10 = vcmp.ge.f32.partialorder %v424_v5, 0.0 }
 0x108   :  { %v468_v9 = vmul.f32 0.2, %v424_v5  ;;  %v425_v10 = vadd.f32 %v891_v21, %v316_v2 }
 0x109   :  { %v477_v11 = vsel %vm435_vm9, %v412_v3, %v456_v7  ;;  %vm436_vm11 = vcmp.ge.f32.partialorder %v413_v8, 0.0  ;;  %v457_v12 = vmul.f32 0.2, %v413_v8 }
 0x10a   :  { %498 = vst [vmem:[%s980_s3 + $0x20] sm:$0xff] %v477_v11  ;;  %v489_v13 = vsel %vm447_vm10, %v424_v5, %v468_v9  ;;  %vm448_vm12 = vcmp.ge.f32.partialorder %v425_v10, 0.0  ;;  %v469_v15 = vmul.f32 0.2, %v425_v10 }
 0x10b   :  { %v478_v17 = vsel %vm436_vm11, %v413_v8, %v457_v12  ;;  %510 = vst [vmem:[%s980_s3 + $0x80] sm:$0xff] %v489_v13 }
 0x10c   :  { %v273_v14 = vpop.f32.mrb[12].mxu0  ;;  %v321_v16 = vpop.f32.mrb[12].mxu1  ;;  %499 = vst [vmem:[%s980_s3 + $0x28] sm:$0xff] %v478_v17  ;;  %v490_v20 = vsel %vm448_vm12, %v425_v10, %v469_v15 }
 0x10d   :  { %v616_v18 = vpop.f32.mrb[13].mxu0  ;;  %v640_v19 = vpop.f32.mrb[13].mxu1  ;;  %v414_v24 = vadd.f32 %v891_v21, %v273_v14  ;;  %511 = vst [vmem:[%s980_s3 + $0x88] sm:$0xff] %v490_v20  ;;  %v426_v26 = vadd.f32 %v891_v21, %v321_v16 }
 0x10e   :  { %v276_v22 = vpop.f32.mrb[14].mxu0  ;;  %v324_v23 = vpop.f32.mrb[14].mxu1 }
 0x10f   :  { %v617_v25 = vpop.f32.mrb[15].mxu0  ;;  %v641_v27 = vpop.f32.mrb[15].mxu1  ;;  %vm437_vm13 = vcmp.ge.f32.partialorder %v414_v24, 0.0  ;;  %v458_v28 = vmul.f32 0.2, %v414_v24  ;;  %v415_v29 = vadd.f32 %v891_v21, %v276_v22  ;;  %vm449_vm14 = vcmp.ge.f32.partialorder %v426_v26, 0.0 }
 0x110   :  { %v470_v30 = vmul.f32 0.2, %v426_v26  ;;  %v427_v31 = vadd.f32 %v891_v21, %v324_v23 }
 0x111   :  { %v479_v32 = vsel %vm437_vm13, %v414_v24, %v458_v28  ;;  %vm438_vm15 = vcmp.ge.f32.partialorder %v415_v29, 0.0  ;;  %v459_v33 = vmul.f32 0.2, %v415_v29 }
 0x112   :  { %500 = vst [vmem:[%s980_s3 + $0x30] sm:$0xff] %v479_v32  ;;  %v491_v34 = vsel %vm449_vm14, %v426_v26, %v470_v30  ;;  %vm450_vm0 = vcmp.ge.f32.partialorder %v427_v31, 0.0  ;;  %v471_v36 = vmul.f32 0.2, %v427_v31 }
 0x113   :  { %v480_v38 = vsel %vm438_vm15, %v415_v29, %v459_v33  ;;  %512 = vst [vmem:[%s980_s3 + $0x90] sm:$0xff] %v491_v34 }
 0x114   :  { %v281_v35 = vpop.f32.mrb[16].mxu0  ;;  %v329_v37 = vpop.f32.mrb[16].mxu1  ;;  %501 = vst [vmem:[%s980_s3 + $0x38] sm:$0xff] %v480_v38  ;;  %v492_v41 = vsel %vm450_vm0, %v427_v31, %v471_v36 }
 0x115   :  { %v620_v39 = vpop.f32.mrb[17].mxu0  ;;  %v644_v40 = vpop.f32.mrb[17].mxu1  ;;  %v416_v44 = vadd.f32 %v891_v21, %v281_v35  ;;  %513 = vst [vmem:[%s980_s3 + $0x98] sm:$0xff] %v492_v41  ;;  %v428_v46 = vadd.f32 %v891_v21, %v329_v37 }
 0x116   :  { %v284_v42 = vpop.f32.mrb[18].mxu0  ;;  %v332_v43 = vpop.f32.mrb[18].mxu1 }
 0x117   :  { %v621_v45 = vpop.f32.mrb[19].mxu0  ;;  %v645_v47 = vpop.f32.mrb[19].mxu1  ;;  %vm439_vm1 = vcmp.ge.f32.partialorder %v416_v44, 0.0  ;;  %v460_v48 = vmul.f32 0.2, %v416_v44  ;;  %v417_v49 = vadd.f32 %v891_v21, %v284_v42  ;;  %vm451_vm2 = vcmp.ge.f32.partialorder %v428_v46, 0.0 }
 0x118   :  { %v472_v50 = vmul.f32 0.2, %v428_v46 }
 0x119   :  { %v481_v51 = vsel %vm439_vm1, %v416_v44, %v460_v48  ;;  %vm440_vm3 = vcmp.ge.f32.partialorder %v417_v49, 0.0  ;;  %v461_v52 = vmul.f32 0.2, %v417_v49 }
 0x11a   :  { %502 = vst [vmem:[%s980_s3 + $0x40] sm:$0xff] %v481_v51  ;;  %v493_v53 = vsel %vm451_vm2, %v428_v46, %v472_v50 }
 0x11b   :  { %v482_v55 = vsel %vm440_vm3, %v417_v49, %v461_v52  ;;  %514 = vst [vmem:[%s980_s3 + $0xa0] sm:$0xff] %v493_v53 }
 0x11c   :  { %v289_v54 = vpop.f32.mrb[20].mxu0  ;;  %503 = vst [vmem:[%s980_s3 + $0x48] sm:$0xff] %v482_v55 }
 0x11d   :  { %v624_v56 = vpop.f32.mrb[21].mxu0  ;;  %v418_v58 = vadd.f32 %v891_v21, %v289_v54 }
 0x11e   :  { %v292_v57 = vpop.f32.mrb[22].mxu0 }
 0x11f   :  { %v625_v59 = vpop.f32.mrb[23].mxu0  ;;  %vm441_vm4 = vcmp.ge.f32.partialorder %v418_v58, 0.0  ;;  %v462_v60 = vmul.f32 0.2, %v418_v58  ;;  %v419_v61 = vadd.f32 %v891_v21, %v292_v57 }
 0x121   :  { %v483_v62 = vsel %vm441_vm4, %v418_v58, %v462_v60  ;;  %vm442_vm5 = vcmp.ge.f32.partialorder %v419_v61, 0.0  ;;  %v463_v63 = vmul.f32 0.2, %v419_v61 }
 0x122   :  { %504 = vst [vmem:[%s980_s3 + $0x50] sm:$0xff] %v483_v62 }
 0x123   :  { %v484_v0 = vsel %vm442_vm5, %v419_v61, %v463_v63 }
 0x124   :  { %505 = vst [vmem:[%s980_s3 + $0x58] sm:$0xff] %v484_v0 }
 0x125   :  { %729 = dma.done.wait [#allocation3], 128  }
 0x126   :  { %730 = vsyncadd [#allocation3], 4294967168 }
 0x127   :  { %731 = dma.done.wait [#allocation5], 128  }
 0x128   :  { %732 = vsyncadd [#allocation5], 4294967168 }
 0x129   :  { %545 = vsyncpa [#allocation3], 1 }
 0x12a   :  { %546 = vsyncpa [#allocation5], 1 }

// kernel: tile.93
= control target key start
LH: loop header
LB: loop body
LE: loop exit
PB: predicated region body
PF: predicated region fallthrough
CT: control target
= control target key end

     0   :  { %s22_s0 = inlined_call_operand.vmem [shape: f32[16], index: 0, kind: input, shape index: {}]   ;;  %s23_s1 = inlined_call_operand.vmem [shape: f32[8,16], index: 1, kind: output, shape index: {}]  }
   0x1   :  { %v4_v0 = vld [vmem:[%s22_s0] ss:$0 sm:$0xff] }
   0x2   :  { %5 = vst [vmem:[%s23_s1] sm:$0xff] %v4_v0 }

// kernel: tile.98
= control target key start
LH: loop header
LB: loop body
LE: loop exit
PB: predicated region body
PF: predicated region fallthrough
CT: control target
= control target key end

     0   :  { %s67_s10 = smov 112   ;;  %s68_s11 = smov 80   ;;  %vm3_vm0 = vcmask 130048   ;;  %vm9_vm1 = vcmask 1048448   ;;  %vm15_vm2 = vcmask 917248   ;;  %vm21_vm3 = vcmask 786048   ;;  %s111_s0 = inlined_call_operand.vmem [shape: f32[8,16], index: 0, kind: input, shape index: {}]   ;;  %s112_s1 = inlined_call_operand.vmem [shape: f32[1,128], index: 1, kind: output, shape index: {}]  }
   0x1   :  { %v53_v0 = vld [vmem:[%s111_s0 + $0x7] sm:$0x1]   ;;  %v55_v1 = vld [vmem:[%s111_s0 + $0x5] sm:$0x1]   ;;  %v54_v2 = vld [vmem:[%s111_s0 + $0x6] sm:$0x1]  }
   0x2   :  { %7 = vrot.lane.b32.xlu0 %v53_v0, %s67_s10  ;;  %19 = vrot.lane.b32.xlu1 %v55_v1, %s68_s11  ;;  %v56_v3 = vld [vmem:[%s111_s0 + $0x4] sm:$0x1]   ;;  %v2_v4 = vld [vmem:[%s111_s0] sm:$0x1]   ;;  %s69_s18 = smov 96   ;;  %s70_s19 = smov 64  }
   0x3   :  { %4 = vst.msk [vmem:[#allocation0] sm:$0x1] %vm3_vm0, %v2_v4   ;;  %v57_v5 = vld [vmem:[%s111_s0 + $0x3] sm:$0x1]   ;;  %v58_v6 = vld [vmem:[%s111_s0 + $0x2] sm:$0x1]  }
   0x4   :  { %s71_s24 = smov 48   ;;  %s72_s25 = smov 32   ;;  %v59_v7 = vld [vmem:[%s111_s0 + $0x1] sm:$0x1]   ;;  %vm27_vm4 = vcmask 654848   ;;  %vm33_vm5 = vcmask 523648  }
   0x5   :  { %s73_s0 = smov 16   ;;  %vm39_vm6 = vcmask 392448   ;;  %vm45_vm7 = vcmask 261248  }
   0x6   :  { %13 = vrot.lane.b32.xlu0 %v54_v2, %s69_s18  ;;  %25 = vrot.lane.b32.xlu1 %v56_v3, %s70_s19 }
   0xa   :  { %31 = vrot.lane.b32.xlu0 %v57_v5, %s71_s24  ;;  %37 = vrot.lane.b32.xlu1 %v58_v6, %s72_s25 }
   0xe   :  { %43 = vrot.lane.b32.xlu0 %v59_v7, %s73_s0 }
  0x74   :  { %v8_v8 = vpop.permute.xlu0 %7   ;;  %v20_v9 = vpop.permute.xlu1 %19  }
  0x75   :  { %10 = vst.msk [vmem:[#allocation0] sm:$0x1] %vm9_vm1, %v8_v8  }
  0x78   :  { %v14_v10 = vpop.permute.xlu0 %13   ;;  %v26_v11 = vpop.permute.xlu1 %25  }
  0x79   :  { %16 = vst.msk [vmem:[#allocation0] sm:$0x1] %vm15_vm2, %v14_v10  }
  0x7a   :  { %22 = vst.msk [vmem:[#allocation0] sm:$0x1] %vm21_vm3, %v20_v9  }
  0x7b   :  { %28 = vst.msk [vmem:[#allocation0] sm:$0x1] %vm27_vm4, %v26_v11  }
  0x7c   :  { %v32_v12 = vpop.permute.xlu0 %31   ;;  %v38_v13 = vpop.permute.xlu1 %37  }
  0x7d   :  { %34 = vst.msk [vmem:[#allocation0] sm:$0x1] %vm33_vm5, %v32_v12  }
  0x7e   :  { %40 = vst.msk [vmem:[#allocation0] sm:$0x1] %vm39_vm6, %v38_v13  }
  0x80   :  { %v44_v14 = vpop.permute.xlu0 %43  }
  0x81   :  { %46 = vst.msk [vmem:[#allocation0] sm:$0x1] %vm45_vm7, %v44_v14  }
  0x88   :  { %v50_v15 = vld [vmem:[#allocation0] sm:$0x1] }
  0x89   :  { %52 = vst [vmem:[%s112_s1] sm:$0x1] %v50_v15 }

// kernel: multiscale_forward.27
= control target key start
LH: loop header
LB: loop body
LE: loop exit
PB: predicated region body
PF: predicated region fallthrough
CT: control target
= control target key end

     0   :  { %s457_s1 = inlined_call_operand.vmem [shape: bf16[128,128], index: 1, kind: input, shape index: {}]   ;;  %s458_s0 = inlined_call_operand.vmem [shape: bf16[56,128], index: 0, kind: input, shape index: {}]   ;;  %s459_s2 = inlined_call_operand.vmem [shape: f32[1,128], index: 2, kind: input, shape index: {}]   ;;  %s460_s3 = inlined_call_operand.vmem [shape: f32[56,128], index: 3, kind: output, shape index: {0}]   ;;  %s461_s4 = inlined_call_operand.vmem [shape: f32[8,128], index: 4, kind: output, shape index: {1}]   ;;  %s462_s5 = inlined_call_operand.vmem [shape: f32[8,128], index: 5, kind: output, shape index: {2}]  }
   0x1   :  { %v349_v0 = vld [vmem:[%s457_s1] sm:$0xff]   ;;  %v350_v1 = vld [vmem:[%s457_s1 + $0x8] sm:$0xff]   ;;  %v351_v2 = vld [vmem:[%s457_s1 + $0x10] sm:$0xff]  }
   0x2   :  { %308 = vmatprep.subr.bf16.mxu0 %v349_v0  ;;  %332 = vmatprep.subr.bf16.mxu1 %v349_v0  ;;  %v352_v3 = vld [vmem:[%s457_s1 + $0x18] sm:$0xff]   ;;  %v357_v4 = vld [vmem:[%s458_s0] sm:$0xff]   ;;  %v359_v5 = vld [vmem:[%s458_s0 + $0x10] sm:$0xff]  }
   0x3   :  { %309 = vmatpush3.bf16.msra.mxu0 %v349_v0  ;;  %340 = vmatpush3.bf16.msra.mxu1 %v349_v0  ;;  %v353_v6 = vld [vmem:[%s457_s1 + $0x20] sm:$0xff]   ;;  %v354_v7 = vld [vmem:[%s457_s1 + $0x28] sm:$0xff]   ;;  %v355_v8 = vld [vmem:[%s457_s1 + $0x30] sm:$0xff]  }
   0x4   :  { %310 = vmatprep.subr.bf16.mxu0 %v350_v1  ;;  %333 = vmatprep.subr.bf16.mxu1 %v350_v1  ;;  %v356_v9 = vld [vmem:[%s457_s1 + $0x38] sm:$0xff]   ;;  %v358_v10 = vld [vmem:[%s458_s0 + $0x8] sm:$0xff]   ;;  %v295_v13 = vld [vmem:[%s459_s2] ss:$0 sm:$0xff] }
   0x5   :  { %324 = vmatprep.mubr.bf16.mxu0 %v357_v4  ;;  %328 = vmatprep.mubr.bf16.mxu1 %v359_v5  ;;  %v360_v11 = vld [vmem:[%s458_s0 + $0x18] ss:$0 sps:$4 sm:$0xff]  }
   0x7   :  { %311 = vmatpush3.bf16.msra.mxu0 %v350_v1  ;;  %341 = vmatpush3.bf16.msra.mxu1 %v350_v1 }
   0x8   :  { %312 = vmatprep.subr.bf16.mxu0 %v351_v2  ;;  %334 = vmatprep.subr.bf16.mxu1 %v351_v2 }
   0xb   :  { %313 = vmatpush3.bf16.msra.mxu0 %v351_v2  ;;  %342 = vmatpush3.bf16.msra.mxu1 %v351_v2 }
   0xc   :  { %314 = vmatprep.subr.bf16.mxu0 %v352_v3  ;;  %335 = vmatprep.subr.bf16.mxu1 %v352_v3 }
   0xf   :  { %315 = vmatpush3.bf16.msra.mxu0 %v352_v3  ;;  %343 = vmatpush3.bf16.msra.mxu1 %v352_v3 }
  0x10   :  { %316 = vmatprep.subr.bf16.mxu0 %v353_v6  ;;  %336 = vmatprep.subr.bf16.mxu1 %v353_v6 }
  0x13   :  { %317 = vmatpush3.bf16.msra.mxu0 %v353_v6  ;;  %344 = vmatpush3.bf16.msra.mxu1 %v353_v6 }
  0x14   :  { %318 = vmatprep.subr.bf16.mxu0 %v354_v7  ;;  %337 = vmatprep.subr.bf16.mxu1 %v354_v7 }
  0x17   :  { %319 = vmatpush3.bf16.msra.mxu0 %v354_v7  ;;  %345 = vmatpush3.bf16.msra.mxu1 %v354_v7 }
  0x18   :  { %320 = vmatprep.subr.bf16.mxu0 %v355_v8  ;;  %338 = vmatprep.subr.bf16.mxu1 %v355_v8 }
  0x1b   :  { %321 = vmatpush3.bf16.msra.mxu0 %v355_v8  ;;  %346 = vmatpush3.bf16.msra.mxu1 %v355_v8 }
  0x1c   :  { %322 = vmatprep.subr.bf16.mxu0 %v356_v9  ;;  %339 = vmatprep.subr.bf16.mxu1 %v356_v9 }
  0x1f   :  { %323 = vmatpush3.bf16.msra.mxu0 %v356_v9  ;;  %347 = vmatpush3.bf16.msra.mxu1 %v356_v9 }
  0x22   :  { %325 = vmatmul.mubr.bf16.vlgmr.msra.gmra.mrb[0].mxu0 %v358_v10  ;;  %329 = vmatmul.mubr.bf16.vlgmr.msra.gmra.mrb[0].mxu1 %v360_v11 }
  0xf5   :  { %v326_v12 = vpop.f32.mrb[0].mxu0  ;;  %v330_v14 = vpop.f32.mrb[0].mxu1 }
  0xf6   :  { %v163_v15 = vpop.f32.mrb[1].mxu0  ;;  %v179_v16 = vpop.f32.mrb[1].mxu1  ;;  %v226_v19 = vadd.f32 %v326_v12, %v295_v13  ;;  %v230_v21 = vadd.f32 %v330_v14, %v295_v13 }
  0xf7   :  { %v327_v17 = vpop.f32.mrb[2].mxu0  ;;  %v331_v18 = vpop.f32.mrb[2].mxu1  ;;  %v224_v23 = vadd.f32 %v295_v13, %v163_v15  ;;  %v228_v24 = vadd.f32 %v295_v13, %v179_v16 }
  0xf8   :  { %v166_v20 = vpop.f32.mrb[3].mxu0  ;;  %v182_v22 = vpop.f32.mrb[3].mxu1  ;;  %266 = vst [vmem:[%s460_s3 + $0x10] sm:$0xff] %v226_v19  ;;  %v227_v25 = vadd.f32 %v327_v17, %v295_v13  ;;  %270 = vst [vmem:[%s460_s3 + $0x30] sm:$0xff] %v230_v21  ;;  %v245_v31 = vmul.f32 %v226_v19, %v226_v19  ;;  %v249_v43 = vmul.f32 %v230_v21, %v230_v21 }
  0xf9   :  { %264 = vst [vmem:[%s460_s3] sm:$0xff] %v224_v23  ;;  %v225_v26 = vadd.f32 %v295_v13, %v166_v20  ;;  %268 = vst [vmem:[%s460_s3 + $0x20] sm:$0xff] %v228_v24  ;;  %v229_v27 = vadd.f32 %v295_v13, %v182_v22  ;;  %v243_v28 = vmul.f32 %v224_v23, %v224_v23 }
  0xfa   :  { %267 = vst [vmem:[%s460_s3 + $0x18] sm:$0xff] %v227_v25  ;;  %v246_v34 = vmul.f32 %v227_v25, %v227_v25  ;;  %v247_v37 = vmul.f32 %v228_v24, %v228_v24 }
  0xfb   :  { %v231_v29 = vadd.f32 %v225_v26, %v224_v23  ;;  %v244_v30 = vmul.f32 %v225_v26, %v225_v26  ;;  %265 = vst [vmem:[%s460_s3 + $0x8] sm:$0xff] %v225_v26  ;;  %269 = vst [vmem:[%s460_s3 + $0x28] sm:$0xff] %v229_v27  ;;  %v248_v42 = vmul.f32 %v229_v27, %v229_v27 }
  0xfd   :  { %v232_v32 = vadd.f32 %v231_v29, %v226_v19  ;;  %v250_v33 = vadd.f32 %v244_v30, %v243_v28 }
  0xff   :  { %v251_v35 = vadd.f32 %v250_v33, %v245_v31  ;;  %v233_v36 = vadd.f32 %v232_v32, %v227_v25 }
 0x101   :  { %v234_v38 = vadd.f32 %v233_v36, %v228_v24  ;;  %v252_v39 = vadd.f32 %v251_v35, %v246_v34 }
 0x103   :  { %v253_v40 = vadd.f32 %v252_v39, %v247_v37  ;;  %v235_v41 = vadd.f32 %v234_v38, %v229_v27 }
 0x105   :  { %v236_v44 = vadd.f32 %v235_v41, %v230_v21  ;;  %v254_v45 = vadd.f32 %v253_v40, %v248_v42 }
 0x107   :  { %v237_v46 = vrot.slane %v236_v44, 4  ;;  %v255_v47 = vadd.f32 %v254_v45, %v249_v43 }
 0x109   :  { %v238_v48 = vadd.f32 %v237_v46, %v236_v44  ;;  %v256_v49 = vrot.slane %v255_v47, 4 }
 0x10b   :  { %v239_v50 = vrot.slane %v238_v48, 2  ;;  %v257_v51 = vadd.f32 %v256_v49, %v255_v47 }
 0x10d   :  { %v240_v52 = vadd.f32 %v239_v50, %v238_v48  ;;  %v258_v53 = vrot.slane %v257_v51, 2 }
 0x10f   :  { %v241_v54 = vrot.slane %v240_v52, 1  ;;  %v259_v55 = vadd.f32 %v258_v53, %v257_v51 }
 0x111   :  { %v242_v56 = vadd.f32 %v241_v54, %v240_v52  ;;  %v260_v57 = vrot.slane %v259_v55, 1 }
 0x113   :  { %v261_v58 = vadd.f32 %v260_v57, %v259_v55  ;;  %262 = vst [vmem:[%s461_s4] sm:$0xff] %v242_v56 }
 0x115   :  { %263 = vst [vmem:[%s462_s5] sm:$0xff] %v261_v58 }

// kernel: multiscale_forward.28
= control target key start
LH: loop header
LB: loop body
LE: loop exit
PB: predicated region body
PF: predicated region fallthrough
CT: control target
= control target key end

     0   :  { %s73_s0 = inlined_call_operand.vmem [shape: f32[8,128], index: 0, kind: input, shape index: {}]   ;;  %s74_s1 = inlined_call_operand.vmem [shape: f32[1,128], index: 1, kind: input, shape index: {}]   ;;  %s75_s2 = inlined_call_operand.vmem [shape: f32[1,128], index: 2, kind: input, shape index: {}]   ;;  %s76_s3 = inlined_call_operand.vmem [shape: f32[8,128], index: 3, kind: output, shape index: {}]  }
   0x1   :  { %v14_v0 = vld [vmem:[%s73_s0] sm:$0xff] }
   0x2   :  { %v39_v1 = vld [vmem:[%s74_s1] ss:$0 sm:$0xff] }
   0x3   :  { %v40_v2 = vld [vmem:[%s75_s2] ss:$0 sm:$0xff]  ;;  %v22_v3 = vmul.f32 %v39_v1, %v14_v0 }
   0x5   :  { %v30_v4 = vadd.f32 %v40_v2, %v22_v3 }
   0x7   :  { %vm31_vm0 = vcmp.ge.f32.partialorder %v30_v4, 0.0  ;;  %v32_v5 = vmul.f32 0.2, %v30_v4 }
   0x9   :  { %v33_v6 = vsel %vm31_vm0, %v30_v4, %v32_v5 }
   0xa   :  { %34 = vst [vmem:[%s76_s3] sm:$0xff] %v33_v6 }

// kernel: tile.103
= control target key start
LH: loop header
LB: loop body
LE: loop exit
PB: predicated region body
PF: predicated region fallthrough
CT: control target
= control target key end

     0   :  { %s22_s0 = inlined_call_operand.vmem [shape: f32[32], index: 0, kind: input, shape index: {}]   ;;  %s23_s1 = inlined_call_operand.vmem [shape: f32[4,32], index: 1, kind: output, shape index: {}]  }
   0x1   :  { %v4_v0 = vld [vmem:[%s22_s0] ss:$0 sm:$0xff] }
   0x2   :  { %5 = vst [vmem:[%s23_s1] sm:$0xf] %v4_v0 }

// kernel: tile.108
= control target key start
LH: loop header
LB: loop body
LE: loop exit
PB: predicated region body
PF: predicated region fallthrough
CT: control target
= control target key end

     0   :  { %vm7_vm0 = vcmask 261120   ;;  %s37_s8 = smov 32   ;;  %s38_s9 = smov 64   ;;  %vm13_vm1 = vcmask 1048320   ;;  %vm19_vm2 = vcmask 785920   ;;  %vm25_vm3 = vcmask 523520   ;;  %s55_s0 = inlined_call_operand.vmem [shape: f32[4,32], index: 0, kind: input, shape index: {}]   ;;  %s56_s1 = inlined_call_operand.vmem [shape: f32[1,128], index: 1, kind: output, shape index: {}]  }
   0x1   :  { %v4_v0 = vld [vmem:[%s55_s0] sm:$0xf]  ;;  %s36_s0 = smov 96  }
   0x2   :  { %5 = vst [vmem:[#allocation1] sm:$0xf] %v4_v0 }
   0x9   :  { %v10_v1 = vld [vmem:[#allocation1 + $0x3] sm:$0x1]   ;;  %v22_v2 = vld [vmem:[#allocation1 + $0x1] sm:$0x1]   ;;  %v6_v3 = vld [vmem:[#allocation1] sm:$0x1]  }
   0xa   :  { %11 = vrot.lane.b32.xlu0 %v10_v1, %s36_s0  ;;  %23 = vrot.lane.b32.xlu1 %v22_v2, %s37_s8  ;;  %v16_v4 = vld [vmem:[#allocation1 + $0x2] sm:$0x1]   ;;  %8 = vst.msk [vmem:[#allocation0] sm:$0x1] %vm7_vm0, %v6_v3  }
   0xe   :  { %17 = vrot.lane.b32.xlu0 %v16_v4, %s38_s9 }
  0x7c   :  { %v12_v5 = vpop.permute.xlu0 %11   ;;  %v24_v6 = vpop.permute.xlu1 %23  }
  0x7d   :  { %14 = vst.msk [vmem:[#allocation0] sm:$0x1] %vm13_vm1, %v12_v5  }
  0x80   :  { %v18_v7 = vpop.permute.xlu0 %17  }
  0x81   :  { %20 = vst.msk [vmem:[#allocation0] sm:$0x1] %vm19_vm2, %v18_v7  }
  0x82   :  { %26 = vst.msk [vmem:[#allocation0] sm:$0x1] %vm25_vm3, %v24_v6  }
  0x89   :  { %v30_v8 = vld [vmem:[#allocation0] sm:$0x1] }
  0x8a   :  { %32 = vst [vmem:[%s56_s1] sm:$0x1] %v30_v8 }

// kernel: multiscale_forward.29
= control target key start
LH: loop header
LB: loop body
LE: loop exit
PB: predicated region body
PF: predicated region fallthrough
CT: control target
= control target key end

     0   :  { %s474_s1 = inlined_call_operand.vmem [shape: bf16[256,128], index: 1, kind: input, shape index: {}]   ;;  %s475_s0 = inlined_call_operand.vmem [shape: bf16[24,256], index: 0, kind: input, shape index: {}]   ;;  %s476_s2 = inlined_call_operand.vmem [shape: f32[1,128], index: 2, kind: input, shape index: {}]   ;;  %s477_s3 = inlined_call_operand.vmem [shape: f32[24,128], index: 3, kind: output, shape index: {0}]   ;;  %s478_s4 = inlined_call_operand.vmem [shape: f32[8,128], index: 4, kind: output, shape index: {1}]   ;;  %s479_s5 = inlined_call_operand.vmem [shape: f32[8,128], index: 5, kind: output, shape index: {2}]  }
   0x1   :  { %v348_v0 = vld [vmem:[%s474_s1 + $0x40] sm:$0xff]   ;;  %v350_v2 = vld [vmem:[%s474_s1 + $0x48] sm:$0xff]   ;;  %v352_v4 = vld [vmem:[%s474_s1 + $0x50] sm:$0xff]  }
   0x2   :  { %v349_v1 = vld [vmem:[%s474_s1] sm:$0xff]   ;;  %303 = vmatprep.subr.bf16.mxu0 %v348_v0  ;;  %331 = vmatprep.subr.bf16.mxu1 %v348_v0  ;;  %v351_v3 = vld [vmem:[%s474_s1 + $0x8] sm:$0xff]   ;;  %v353_v5 = vld [vmem:[%s474_s1 + $0x10] sm:$0xff]  }
   0x3   :  { %304 = vmatpush3.bf16.msra.mxu0 %v349_v1  ;;  %339 = vmatpush3.bf16.msra.mxu1 %v349_v1  ;;  %v354_v6 = vld [vmem:[%s474_s1 + $0x58] sm:$0xff]   ;;  %v356_v8 = vld [vmem:[%s474_s1 + $0x60] sm:$0xff]   ;;  %v358_v10 = vld [vmem:[%s474_s1 + $0x68] sm:$0xff]  }
   0x4   :  { %305 = vmatprep.subr.bf16.mxu0 %v350_v2  ;;  %332 = vmatprep.subr.bf16.mxu1 %v350_v2  ;;  %v355_v7 = vld [vmem:[%s474_s1 + $0x18] sm:$0xff]   ;;  %v357_v9 = vld [vmem:[%s474_s1 + $0x20] sm:$0xff]   ;;  %v30_v12 = vld [vmem:[%s475_s0 + $0x10] sm:$0xff] }
   0x5   :  { %v366_v11 = vld [vmem:[%s475_s0 + $0x4] ss:$8 sps:$4 sm:$0xff]   ;;  %v285_v13 = vcombine.high %v30_v12, %v30_v12  ;;  %v360_v15 = vld [vmem:[%s474_s1 + $0x70] sm:$0xff]   ;;  %v362_v17 = vld [vmem:[%s474_s1 + $0x78] sm:$0xff]   ;;  %v284_v20 = vcombine.low %v30_v12, %v30_v12 }
   0x6   :  { %v359_v14 = vld [vmem:[%s474_s1 + $0x28] sm:$0xff]   ;;  %208 = vmatprep.mubr.bf16.mxu0 %v366_v11  ;;  %v361_v16 = vld [vmem:[%s474_s1 + $0x30] sm:$0xff]   ;;  %v363_v18 = vld [vmem:[%s474_s1 + $0x38] sm:$0xff]  }
   0x7   :  { %306 = vmatpush3.bf16.msra.mxu0 %v351_v3  ;;  %340 = vmatpush3.bf16.msra.mxu1 %v351_v3  ;;  %v364_v19 = vld [vmem:[%s475_s0] ss:$8 sps:$4 sm:$0xff]  }
   0x8   :  { %307 = vmatprep.subr.bf16.mxu0 %v352_v4  ;;  %333 = vmatprep.subr.bf16.mxu1 %v352_v4  ;;  %v302_v29 = vld [vmem:[%s476_s2] ss:$0 sm:$0xff] }
   0x9   :  { %216 = vmatprep.mubr.bf16.mxu1 %v285_v13 }
   0xb   :  { %308 = vmatpush3.bf16.msra.mxu0 %v353_v5  ;;  %341 = vmatpush3.bf16.msra.mxu1 %v353_v5 }
   0xc   :  { %309 = vmatprep.subr.bf16.mxu0 %v354_v6  ;;  %334 = vmatprep.subr.bf16.mxu1 %v354_v6 }
   0xf   :  { %310 = vmatpush3.bf16.msra.mxu0 %v355_v7  ;;  %342 = vmatpush3.bf16.msra.mxu1 %v355_v7 }
  0x10   :  { %311 = vmatprep.subr.bf16.mxu0 %v356_v8  ;;  %335 = vmatprep.subr.bf16.mxu1 %v356_v8 }
  0x13   :  { %312 = vmatpush3.bf16.msra.mxu0 %v357_v9  ;;  %343 = vmatpush3.bf16.msra.mxu1 %v357_v9 }
  0x14   :  { %313 = vmatprep.subr.bf16.mxu0 %v358_v10  ;;  %336 = vmatprep.subr.bf16.mxu1 %v358_v10 }
  0x17   :  { %314 = vmatpush3.bf16.msra.mxu0 %v359_v14  ;;  %344 = vmatpush3.bf16.msra.mxu1 %v359_v14 }
  0x18   :  { %315 = vmatprep.subr.bf16.mxu0 %v360_v15  ;;  %337 = vmatprep.subr.bf16.mxu1 %v360_v15 }
  0x1b   :  { %316 = vmatpush3.bf16.msra.mxu0 %v361_v16  ;;  %345 = vmatpush3.bf16.msra.mxu1 %v361_v16 }
  0x1c   :  { %317 = vmatprep.subr.bf16.mxu0 %v362_v17  ;;  %338 = vmatprep.subr.bf16.mxu1 %v362_v17 }
  0x1f   :  { %318 = vmatpush3.bf16.msra.mxu0 %v363_v18  ;;  %346 = vmatpush3.bf16.msra.mxu1 %v363_v18 }
  0x22   :  { %209 = vmatmul.mubr.bf16.vlgmr.msra.gmra.mrb[0].mxu0 %v364_v19  ;;  %217 = vmatmul.mubr.bf16.vlgmr.msra.gmra.mrb[0].mxu1 %v284_v20 }
  0xf5   :  { %v319_v21 = vpop.f32.mrb[0].mxu0  ;;  %v325_v22 = vpop.f32.mrb[0].mxu1 }
  0xf6   :  { %v320_v23 = vpop.f32.mrb[1].mxu0  ;;  %v326_v24 = vpop.f32.mrb[1].mxu1 }
  0xf7   :  { %v321_v25 = vadd.f32 %v320_v23, %v319_v21  ;;  %v322_v26 = vpop.f32.mrb[2].mxu0  ;;  %v327_v27 = vadd.f32 %v326_v24, %v325_v22  ;;  %v328_v28 = vpop.f32.mrb[2].mxu1 }
  0xf8   :  { %v323_v30 = vpop.f32.mrb[3].mxu0  ;;  %v329_v31 = vpop.f32.mrb[3].mxu1 }
  0xf9   :  { %v324_v32 = vadd.f32 %v323_v30, %v322_v26  ;;  %v243_v33 = vadd.f32 %v321_v25, %v302_v29  ;;  %v245_v34 = vadd.f32 %v327_v27, %v302_v29 }
  0xfb   :  { %267 = vst [vmem:[%s477_s3] sm:$0xff] %v243_v33  ;;  %269 = vst [vmem:[%s477_s3 + $0x10] sm:$0xff] %v245_v34  ;;  %v244_v35 = vadd.f32 %v324_v32, %v302_v29  ;;  %v254_v36 = vmul.f32 %v243_v33, %v243_v33  ;;  %v256_v37 = vmul.f32 %v245_v34, %v245_v34 }
  0xfd   :  { %v246_v38 = vadd.f32 %v244_v35, %v243_v33  ;;  %v255_v39 = vmul.f32 %v244_v35, %v244_v35  ;;  %268 = vst [vmem:[%s477_s3 + $0x8] sm:$0xff] %v244_v35 }
  0xff   :  { %v247_v40 = vadd.f32 %v246_v38, %v245_v34  ;;  %v257_v41 = vadd.f32 %v255_v39, %v254_v36 }
 0x101   :  { %v248_v42 = vrot.slane %v247_v40, 4  ;;  %v258_v43 = vadd.f32 %v257_v41, %v256_v37 }
 0x103   :  { %v249_v44 = vadd.f32 %v248_v42, %v247_v40  ;;  %v259_v45 = vrot.slane %v258_v43, 4 }
 0x105   :  { %v250_v46 = vrot.slane %v249_v44, 2  ;;  %v260_v47 = vadd.f32 %v259_v45, %v258_v43 }
 0x107   :  { %v251_v48 = vadd.f32 %v250_v46, %v249_v44  ;;  %v261_v49 = vrot.slane %v260_v47, 2 }
 0x109   :  { %v252_v50 = vrot.slane %v251_v48, 1  ;;  %v262_v51 = vadd.f32 %v261_v49, %v260_v47 }
 0x10b   :  { %v253_v52 = vadd.f32 %v252_v50, %v251_v48  ;;  %v263_v53 = vrot.slane %v262_v51, 1 }
 0x10d   :  { %v264_v54 = vadd.f32 %v263_v53, %v262_v51  ;;  %265 = vst [vmem:[%s478_s4] sm:$0xff] %v253_v52 }
 0x10f   :  { %266 = vst [vmem:[%s479_s5] sm:$0xff] %v264_v54 }

// kernel: tile.113
= control target key start
LH: loop header
LB: loop body
LE: loop exit
PB: predicated region body
PF: predicated region fallthrough
CT: control target
= control target key end

     0   :  { %s22_s0 = inlined_call_operand.vmem [shape: f32[64], index: 0, kind: input, shape index: {}]   ;;  %s23_s1 = inlined_call_operand.vmem [shape: f32[2,64], index: 1, kind: output, shape index: {}]  }
   0x1   :  { %v4_v0 = vld [vmem:[%s22_s0] ss:$0 sm:$0xff] }
   0x2   :  { %5 = vst [vmem:[%s23_s1] sm:$0x3] %v4_v0 }

// kernel: tile.118
= control target key start
LH: loop header
LB: loop body
LE: loop exit
PB: predicated region body
PF: predicated region fallthrough
CT: control target
= control target key end

     0   :  { %vm7_vm0 = vcmask 523264   ;;  %vm13_vm1 = vcmask 1048064   ;;  %s39_s0 = inlined_call_operand.vmem [shape: f32[2,64], index: 0, kind: input, shape index: {}]   ;;  %s40_s1 = inlined_call_operand.vmem [shape: f32[1,128], index: 1, kind: output, shape index: {}]  }
   0x1   :  { %v4_v0 = vld [vmem:[%s39_s0] sm:$0x3]  ;;  %s22_s0 = smov 64  }
   0x2   :  { %5 = vst [vmem:[#allocation1] sm:$0x3] %v4_v0 }
   0x9   :  { %v10_v1 = vld [vmem:[#allocation1 + $0x1] sm:$0x1]   ;;  %v6_v2 = vld [vmem:[#allocation1] sm:$0x1]  }
   0xa   :  { %11 = vrot.lane.b32.xlu0 %v10_v1, %s22_s0  ;;  %8 = vst.msk [vmem:[#allocation0] sm:$0x1] %vm7_vm0, %v6_v2  }
  0x7c   :  { %v12_v3 = vpop.permute.xlu0 %11  }
  0x7d   :  { %14 = vst.msk [vmem:[#allocation0] sm:$0x1] %vm13_vm1, %v12_v3  }
  0x84   :  { %v18_v4 = vld [vmem:[#allocation0] sm:$0x1] }
  0x85   :  { %20 = vst [vmem:[%s40_s1] sm:$0x1] %v18_v4 }

// kernel: multiscale_forward.32
= control target key start
LH: loop header
LB: loop body
LE: loop exit
PB: predicated region body
PF: predicated region fallthrough
CT: control target
= control target key end

     0   :  { %s86_s0 = inlined_call_operand.vmem [shape: f32[16,128], index: 0, kind: input, shape index: {}]   ;;  %s87_s1 = inlined_call_operand.vmem [shape: f32[1,128], index: 1, kind: input, shape index: {}]   ;;  %s88_s2 = inlined_call_operand.vmem [shape: f32[1,128], index: 2, kind: input, shape index: {}]   ;;  %s89_s3 = inlined_call_operand.vmem [shape: f32[16,128], index: 3, kind: output, shape index: {}]  }
   0x1   :  { %v14_v0 = vld [vmem:[%s86_s0] sm:$0xff]  ;;  %v15_v4 = vld [vmem:[%s86_s0 + $0x8] sm:$0xff] }
   0x2   :  { %v46_v1 = vld [vmem:[%s87_s1] ss:$0 sm:$0xff] }
   0x3   :  { %v47_v2 = vld [vmem:[%s88_s2] ss:$0 sm:$0xff]  ;;  %v23_v3 = vmul.f32 %v46_v1, %v14_v0  ;;  %v24_v5 = vmul.f32 %v46_v1, %v15_v4 }
   0x5   :  { %v32_v6 = vadd.f32 %v47_v2, %v23_v3  ;;  %v33_v7 = vadd.f32 %v47_v2, %v24_v5 }
   0x7   :  { %vm34_vm0 = vcmp.ge.f32.partialorder %v32_v6, 0.0  ;;  %v36_v8 = vmul.f32 0.2, %v32_v6  ;;  %vm35_vm1 = vcmp.ge.f32.partialorder %v33_v7, 0.0  ;;  %v37_v9 = vmul.f32 0.2, %v33_v7 }
   0x9   :  { %v38_v10 = vsel %vm34_vm0, %v32_v6, %v36_v8  ;;  %v39_v11 = vsel %vm35_vm1, %v33_v7, %v37_v9 }
   0xa   :  { %40 = vst [vmem:[%s89_s3] sm:$0xff] %v38_v10  ;;  %41 = vst [vmem:[%s89_s3 + $0x8] sm:$0xff] %v39_v11 }

// kernel: multiscale_forward.31
= control target key start
LH: loop header
LB: loop body
LE: loop exit
PB: predicated region body
PF: predicated region fallthrough
CT: control target
= control target key end

     0   :  { %s811_s1 = inlined_call_operand.vmem [shape: bf16[512,128], index: 1, kind: input, shape index: {}]   ;;  %s812_s0 = inlined_call_operand.vmem [shape: bf16[32,512], index: 0, kind: input, shape index: {}]   ;;  %s813_s2 = inlined_call_operand.vmem [shape: f32[1,128], index: 2, kind: input, shape index: {}]   ;;  %s814_s3 = inlined_call_operand.vmem [shape: f32[32,128], index: 3, kind: output, shape index: {0}]   ;;  %s815_s4 = inlined_call_operand.vmem [shape: f32[8,128], index: 4, kind: output, shape index: {1}]   ;;  %s816_s5 = inlined_call_operand.vmem [shape: f32[8,128], index: 5, kind: output, shape index: {2}]  }
   0x1   :  { %v596_v0 = vld [vmem:[%s811_s1 + $0x40] sm:$0xff]   ;;  %v600_v4 = vld [vmem:[%s811_s1 + $0x48] sm:$0xff]   ;;  %v604_v8 = vld [vmem:[%s811_s1 + $0x50] sm:$0xff]  }
   0x2   :  { %v597_v1 = vld [vmem:[%s811_s1 + $0xc0] sm:$0xff]   ;;  %539 = vmatprep.subr.bf16.mxu0 %v596_v0  ;;  %v601_v5 = vld [vmem:[%s811_s1 + $0xc8] sm:$0xff]   ;;  %v605_v9 = vld [vmem:[%s811_s1 + $0xd0] sm:$0xff]  }
   0x3   :  { %v598_v2 = vld [vmem:[%s811_s1] sm:$0xff]   ;;  %567 = vmatprep.subr.bf16.mxu1 %v597_v1  ;;  %v602_v6 = vld [vmem:[%s811_s1 + $0x8] sm:$0xff]   ;;  %v606_v10 = vld [vmem:[%s811_s1 + $0x10] sm:$0xff]  }
   0x4   :  { %v599_v3 = vld [vmem:[%s811_s1 + $0x80] sm:$0xff]   ;;  %540 = vmatpush3.bf16.msra.mxu0 %v598_v2  ;;  %v603_v7 = vld [vmem:[%s811_s1 + $0x88] sm:$0xff]   ;;  %v607_v11 = vld [vmem:[%s811_s1 + $0x90] sm:$0xff]  }
   0x5   :  { %568 = vmatpush3.bf16.msra.mxu1 %v599_v3  ;;  %541 = vmatprep.subr.bf16.mxu0 %v600_v4  ;;  %v608_v12 = vld [vmem:[%s811_s1 + $0x58] sm:$0xff]   ;;  %v612_v16 = vld [vmem:[%s811_s1 + $0x60] sm:$0xff]   ;;  %v616_v20 = vld [vmem:[%s811_s1 + $0x68] sm:$0xff]  }
   0x6   :  { %569 = vmatprep.subr.bf16.mxu1 %v601_v5  ;;  %v609_v13 = vld [vmem:[%s811_s1 + $0xd8] sm:$0xff]   ;;  %v613_v17 = vld [vmem:[%s811_s1 + $0xe0] sm:$0xff]   ;;  %v617_v21 = vld [vmem:[%s811_s1 + $0xe8] sm:$0xff]  }
   0x7   :  { %v610_v14 = vld [vmem:[%s811_s1 + $0x18] sm:$0xff]   ;;  %v614_v18 = vld [vmem:[%s811_s1 + $0x20] sm:$0xff]   ;;  %v618_v22 = vld [vmem:[%s811_s1 + $0x28] sm:$0xff]  }
   0x8   :  { %542 = vmatpush3.bf16.msra.mxu0 %v602_v6  ;;  %v611_v15 = vld [vmem:[%s811_s1 + $0x98] sm:$0xff]   ;;  %v615_v19 = vld [vmem:[%s811_s1 + $0xa0] sm:$0xff]   ;;  %v619_v23 = vld [vmem:[%s811_s1 + $0xa8] sm:$0xff]  }
   0x9   :  { %570 = vmatpush3.bf16.msra.mxu1 %v603_v7  ;;  %543 = vmatprep.subr.bf16.mxu0 %v604_v8  ;;  %v620_v24 = vld [vmem:[%s811_s1 + $0x70] sm:$0xff]   ;;  %v624_v28 = vld [vmem:[%s811_s1 + $0x78] sm:$0xff]   ;;  %v538_v53 = vld [vmem:[%s813_s2] ss:$0 sm:$0xff] }
   0xa   :  { %571 = vmatprep.subr.bf16.mxu1 %v605_v9  ;;  %v621_v25 = vld [vmem:[%s811_s1 + $0xf0] sm:$0xff]   ;;  %v625_v29 = vld [vmem:[%s811_s1 + $0xf8] sm:$0xff]  }
   0xb   :  { %v622_v26 = vld [vmem:[%s811_s1 + $0x30] sm:$0xff]   ;;  %v626_v30 = vld [vmem:[%s811_s1 + $0x38] sm:$0xff]  }
   0xc   :  { %544 = vmatpush3.bf16.msra.mxu0 %v606_v10  ;;  %v623_v27 = vld [vmem:[%s811_s1 + $0xb0] sm:$0xff]   ;;  %v627_v31 = vld [vmem:[%s811_s1 + $0xb8] sm:$0xff]  }
   0xd   :  { %572 = vmatpush3.bf16.msra.mxu1 %v607_v11  ;;  %545 = vmatprep.subr.bf16.mxu0 %v608_v12  ;;  %v628_v32 = vld [vmem:[%s812_s0] ss:$16 sps:$4 sm:$0xff]   ;;  %v630_v33 = vld [vmem:[%s812_s0 + $0x4] ss:$16 sps:$4 sm:$0xff]   ;;  %v631_v34 = vld [vmem:[%s812_s0 + $0x8] ss:$16 sps:$4 sm:$0xff]  }
   0xe   :  { %573 = vmatprep.subr.bf16.mxu1 %v609_v13  ;;  %v633_v35 = vld [vmem:[%s812_s0 + $0xc] ss:$16 sps:$4 sm:$0xff]   ;;  %366 = vmatprep.mubr.bf16.mxu0 %v630_v33  ;;  %v634_v36 = vld [vmem:[%s812_s0 + $0x24] ss:$16 sps:$4 sm:$0xff]   ;;  %v638_v38 = vld [vmem:[%s812_s0 + $0x20] ss:$16 sps:$4 sm:$0xff]  }
   0xf   :  { %415 = vmatprep.mubr.bf16.mxu1 %v633_v35  ;;  %v636_v37 = vld [vmem:[%s812_s0 + $0x2c] ss:$16 sps:$4 sm:$0xff]   ;;  %v639_v39 = vld [vmem:[%s812_s0 + $0x28] ss:$16 sps:$4 sm:$0xff]  }
  0x10   :  { %546 = vmatpush3.bf16.msra.mxu0 %v610_v14 }
  0x11   :  { %574 = vmatpush3.bf16.msra.mxu1 %v611_v15  ;;  %547 = vmatprep.subr.bf16.mxu0 %v612_v16 }
  0x12   :  { %575 = vmatprep.subr.bf16.mxu1 %v613_v17 }
  0x14   :  { %548 = vmatpush3.bf16.msra.mxu0 %v614_v18 }
  0x15   :  { %576 = vmatpush3.bf16.msra.mxu1 %v615_v19  ;;  %549 = vmatprep.subr.bf16.mxu0 %v616_v20 }
  0x16   :  { %577 = vmatprep.subr.bf16.mxu1 %v617_v21 }
  0x18   :  { %550 = vmatpush3.bf16.msra.mxu0 %v618_v22 }
  0x19   :  { %578 = vmatpush3.bf16.msra.mxu1 %v619_v23  ;;  %551 = vmatprep.subr.bf16.mxu0 %v620_v24 }
  0x1a   :  { %579 = vmatprep.subr.bf16.mxu1 %v621_v25 }
  0x1c   :  { %552 = vmatpush3.bf16.msra.mxu0 %v622_v26 }
  0x1d   :  { %580 = vmatpush3.bf16.msra.mxu1 %v623_v27  ;;  %553 = vmatprep.subr.bf16.mxu0 %v624_v28 }
  0x1e   :  { %581 = vmatprep.subr.bf16.mxu1 %v625_v29 }
  0x20   :  { %554 = vmatpush3.bf16.msra.mxu0 %v626_v30 }
  0x21   :  { %582 = vmatpush3.bf16.msra.mxu1 %v627_v31 }
  0x23   :  { %367 = vmatmul.mubr.bf16.vlgmr.msra.gmra.mrb[0].mxu0 %v628_v32 }
  0x24   :  { %416 = vmatmul.mubr.bf16.vlgmr.msra.gmra.mrb[0].mxu1 %v631_v34  ;;  %374 = vmatprep.mubr.bf16.mxu0 %v634_v36 }
  0x25   :  { %423 = vmatprep.mubr.bf16.mxu1 %v636_v37 }
  0x2b   :  { %375 = vmatmul.mubr.bf16.gmra.mrb[4].mxu0 %v638_v38 }
  0x2c   :  { %424 = vmatmul.mubr.bf16.gmra.mrb[4].mxu1 %v639_v39 }
  0xf6   :  { %v555_v40 = vpop.f32.mrb[0].mxu0 }
  0xf7   :  { %v583_v41 = vpop.f32.mrb[0].mxu1  ;;  %v556_v42 = vpop.f32.mrb[1].mxu0 }
  0xf8   :  { %v557_v43 = vadd.f32 %v556_v42, %v555_v40  ;;  %v584_v44 = vpop.f32.mrb[1].mxu1  ;;  %v558_v45 = vpop.f32.mrb[2].mxu0 }
  0xf9   :  { %v585_v46 = vadd.f32 %v584_v44, %v583_v41  ;;  %v586_v47 = vpop.f32.mrb[2].mxu1  ;;  %v559_v48 = vpop.f32.mrb[3].mxu0 }
  0xfa   :  { %v560_v49 = vadd.f32 %v559_v48, %v558_v45  ;;  %v587_v50 = vpop.f32.mrb[3].mxu1 }
  0xfb   :  { %v418_v51 = vadd.f32 %v585_v46, %v557_v43  ;;  %v588_v52 = vadd.f32 %v587_v50, %v586_v47 }
  0xfd   :  { %v421_v54 = vadd.f32 %v588_v52, %v560_v49  ;;  %v454_v56 = vadd.f32 %v538_v53, %v418_v51 }
  0xfe   :  { %v561_v55 = vpop.f32.mrb[4].mxu0 }
  0xff   :  { %v589_v57 = vpop.f32.mrb[4].mxu1  ;;  %v562_v58 = vpop.f32.mrb[5].mxu0  ;;  %482 = vst [vmem:[%s814_s3] sm:$0xff] %v454_v56  ;;  %v455_v62 = vadd.f32 %v538_v53, %v421_v54  ;;  %v467_v2 = vmul.f32 %v454_v56, %v454_v56 }
 0x100   :  { %v563_v59 = vadd.f32 %v562_v58, %v561_v55  ;;  %v590_v60 = vpop.f32.mrb[5].mxu1  ;;  %v564_v61 = vpop.f32.mrb[6].mxu0 }
 0x101   :  { %v591_v63 = vadd.f32 %v590_v60, %v589_v57  ;;  %v592_v0 = vpop.f32.mrb[6].mxu1  ;;  %v565_v1 = vpop.f32.mrb[7].mxu0  ;;  %v458_v5 = vadd.f32 %v455_v62, %v454_v56  ;;  %v468_v6 = vmul.f32 %v455_v62, %v455_v62  ;;  %483 = vst [vmem:[%s814_s3 + $0x8] sm:$0xff] %v455_v62 }
 0x102   :  { %v566_v3 = vadd.f32 %v565_v1, %v564_v61  ;;  %v593_v4 = vpop.f32.mrb[7].mxu1 }
 0x103   :  { %v426_v7 = vadd.f32 %v591_v63, %v563_v59  ;;  %v594_v8 = vadd.f32 %v593_v4, %v592_v0  ;;  %v471_v9 = vadd.f32 %v468_v6, %v467_v2 }
 0x105   :  { %v429_v10 = vadd.f32 %v594_v8, %v566_v3  ;;  %v456_v11 = vadd.f32 %v538_v53, %v426_v7 }
 0x107   :  { %v459_v12 = vadd.f32 %v458_v5, %v456_v11  ;;  %v469_v13 = vmul.f32 %v456_v11, %v456_v11  ;;  %484 = vst [vmem:[%s814_s3 + $0x10] sm:$0xff] %v456_v11  ;;  %v457_v14 = vadd.f32 %v538_v53, %v429_v10 }
 0x109   :  { %v472_v15 = vadd.f32 %v471_v9, %v469_v13  ;;  %v460_v16 = vadd.f32 %v459_v12, %v457_v14  ;;  %v470_v17 = vmul.f32 %v457_v14, %v457_v14  ;;  %485 = vst [vmem:[%s814_s3 + $0x18] sm:$0xff] %v457_v14 }
 0x10b   :  { %v461_v18 = vrot.slane %v460_v16, 4  ;;  %v473_v19 = vadd.f32 %v472_v15, %v470_v17 }
 0x10d   :  { %v462_v20 = vadd.f32 %v461_v18, %v460_v16  ;;  %v474_v21 = vrot.slane %v473_v19, 4 }
 0x10f   :  { %v463_v22 = vrot.slane %v462_v20, 2  ;;  %v475_v23 = vadd.f32 %v474_v21, %v473_v19 }
 0x111   :  { %v464_v24 = vadd.f32 %v463_v22, %v462_v20  ;;  %v476_v25 = vrot.slane %v475_v23, 2 }
 0x113   :  { %v465_v26 = vrot.slane %v464_v24, 1  ;;  %v477_v27 = vadd.f32 %v476_v25, %v475_v23 }
 0x115   :  { %v466_v28 = vadd.f32 %v465_v26, %v464_v24  ;;  %v478_v29 = vrot.slane %v477_v27, 1 }
 0x117   :  { %v479_v30 = vadd.f32 %v478_v29, %v477_v27  ;;  %480 = vst [vmem:[%s815_s4] sm:$0xff] %v466_v28 }
 0x119   :  { %481 = vst [vmem:[%s816_s5] sm:$0xff] %v479_v30 }

// kernel: multiscale_forward.33
= control target key start
LH: loop header
LB: loop body
LE: loop exit
PB: predicated region body
PF: predicated region fallthrough
CT: control target
= control target key end

     0   :  { %11 = vsyncpa [#allocation4], 0  ;;  %s1673_s0 = inlined_call_operand.vmem [shape: bf16[56,1024], index: 0, kind: input, shape index: {}]   ;;  %s1674_s1 = inlined_call_operand.vmem [shape: bf16[1024,128], index: 1, kind: input, shape index: {}]   ;;  %s1675_s2 = inlined_call_operand.vmem [shape: f32[1,128], index: 2, kind: input, shape index: {}]   ;;  %s1676_s3 = inlined_call_operand.vmem [shape: f32[56,128], index: 3, kind: output, shape index: {0}]   ;;  %s1677_s4 = inlined_call_operand.hbm [shape: f32[8,128], index: 4, kind: output, shape index: {1}]   ;;  %s1678_s5 = inlined_call_operand.hbm [shape: f32[8,128], index: 5, kind: output, shape index: {2}]  }
   0x1   :  { %12 = vsyncpa [#allocation6], 0  ;;  %s1390_s18 = smov 0   ;;  %s1392_s19 = smov 0  }
   0x2   :  { %s1394_s20 = smov 0   ;;  %s1396_s21 = smov 0  }
   0x3   :  { %s1398_s22 = smov 0  }
   0x4 LB: > { %s996_s23 = sadd.s32 4294967295, %s1354_s22   ;;  %s27_s24 = sadd.s32 1, %s1350_s21  ;;  %s1354_s22 = sphi %s1398_s22, %s18_s22   ;;  %s1350_s21 = sphi %s1396_s21, %s1683_s21   ;;  %s1346_s20 = sphi %s1394_s20, %s1682_s20   ;;  %s1342_s19 = sphi %s1392_s19, %s1681_s19   ;;  %s1338_s18 = sphi %s1390_s18, %s1680_s18  }
   0x5   : > { %p28_p0 = scmp.ge.s32.totalorder %s27_s24, 2  ;;  %p46_p1 = scmp.ne.s32.totalorder %s1342_s19, %s1338_s18 }
   0x6   : > { %p47_p2 = scmp.eq.s32.totalorder %s1354_s22, 0  ;;  %s39_s26 = sadd.s32 1, %s1342_s19 }
   0x7   : > { %s1685_s24 = smov (%p28_p0, %s27_s24), 0  ;;  %p998_p5 = scmp.ge.s32.totalorder %s1354_s22, 2 }
   0x8   : > { %p48_p3 = por %p47_p2, %p46_p1  ;;  %s35_s25 = ssub.s32 %s1350_s21, %s1685_s24 }
   0x9   : > { %p37_p4 = scmp.eq.s32.totalorder %s35_s25, 0  ;;  %200 = sbr.rel (%p998_p5) target bundleno = 27 (0x1b), region = 20 }
   0xb   : > { %s1426_s27 = scalar_select %p37_p4, %s1342_s19, %s39_s26  }
  0x10   : > { %203 = sbr.rel (!%p48_p3) target bundleno = 27 (0x1b), region = 24  ;;  %s205_s28 = sand.u32 (%p48_p3), 1, %s1342_s19  }
  0x11   : > { %s1063_s29 = sshll.u32 (%p48_p3), %s1350_s21, 4  ;;  %s1144_s30 = smul.u32 (%p48_p3), 112, %s205_s28 }
  0x12   : > { %s213_s8 = scalar_lea.vmem (%p48_p3), %s1673_s0, %s1063_s29 }
  0x13   : > { %v226_v0 = vld [vmem:[%s213_s8] sm:$0xff] (%p48_p3)  ;;  %v228_v1 = vld [vmem:[%s213_s8 + $0x8] sm:$0xff] (%p48_p3)  ;;  %s207_s9 = scalar_lea.vmem (%p48_p3), [#allocation2], %s1144_s30 }
  0x14   : > { %v230_v2 = vld [vmem:[%s213_s8 + $0x20] sm:$0xff] (%p48_p3)  ;;  %v232_v3 = vld [vmem:[%s213_s8 + $0x28] sm:$0xff] (%p48_p3)  ;;  %227 = vst [vmem:[%s207_s9] sm:$0xff] (%p48_p3), %v226_v0  ;;  %229 = vst [vmem:[%s207_s9 + $0x8] sm:$0xff] (%p48_p3), %v228_v1 }
  0x15   : > { %v234_v4 = vld [vmem:[%s213_s8 + $0x40] sm:$0xff] (%p48_p3)  ;;  %v236_v5 = vld [vmem:[%s213_s8 + $0x48] sm:$0xff] (%p48_p3)  ;;  %231 = vst [vmem:[%s207_s9 + $0x10] sm:$0xff] (%p48_p3), %v230_v2  ;;  %233 = vst [vmem:[%s207_s9 + $0x18] sm:$0xff] (%p48_p3), %v232_v3 }
  0x16   : > { %235 = vst [vmem:[%s207_s9 + $0x20] sm:$0xff] (%p48_p3), %v234_v4  ;;  %237 = vst [vmem:[%s207_s9 + $0x28] sm:$0xff] (%p48_p3), %v236_v5  ;;  %v238_v6 = vld [vmem:[%s213_s8 + $0x60] sm:$0xff] (%p48_p3)  ;;  %v240_v7 = vld [vmem:[%s213_s8 + $0x68] sm:$0xff] (%p48_p3) }
  0x17   : > { %v242_v8 = vld [vmem:[%s213_s8 + $0x80] sm:$0xff]  ;;  %239 = vst [vmem:[%s207_s9 + $0x30] sm:$0xff] %v238_v6  ;;  %241 = vst [vmem:[%s207_s9 + $0x38] sm:$0xff] %v240_v7  ;;  %v244_v9 = vld [vmem:[%s213_s8 + $0x88] sm:$0xff] }
  0x18   : > { %243 = vst [vmem:[%s207_s9 + $0x40] sm:$0xff] %v242_v8  ;;  %v246_v10 = vld [vmem:[%s213_s8 + $0xa0] sm:$0xff]  ;;  %v248_v11 = vld [vmem:[%s213_s8 + $0xa8] sm:$0xff]  ;;  %245 = vst [vmem:[%s207_s9 + $0x48] sm:$0xff] %v244_v9 }
  0x19   : > { %247 = vst [vmem:[%s207_s9 + $0x50] sm:$0xff] %v246_v10  ;;  %249 = vst [vmem:[%s207_s9 + $0x58] sm:$0xff] %v248_v11  ;;  %v250_v12 = vld [vmem:[%s213_s8 + $0xc0] sm:$0xff]  ;;  %v252_v13 = vld [vmem:[%s213_s8 + $0xc8] sm:$0xff] }
  0x1a   : > { %251 = vst [vmem:[%s207_s9 + $0x60] sm:$0xff] %v250_v12  ;;  %253 = vst [vmem:[%s207_s9 + $0x68] sm:$0xff] %v252_v13 }
  0x1b PF: > { %p1001_p6 = scmp.ge.s32.totalorder %s1354_s22, 1  ;;  %p267_p7 = scmp.lt.s32.totalorder %s1354_s22, 3 }
  0x1d   : > { %p268_p8 = pnand %p1001_p6, %p267_p7 }
  0x1e   : > { %s274_s10 = sand.u32 (!%p268_p8), 1, %s1338_s18   ;;  %s1002_s11 = sshll.u32 (!%p268_p8), %s1346_s20, 6 }
  0x1f   : > { %271 = sbr.rel (%p268_p8) target bundleno = 382 (0x17e), region = 51  ;;  %p309_p9 = scmp.lt.s32.totalorder (!%p268_p8), %s1002_s11, 127 }
  0x20   : > { %s1145_s12 = smul.u32 (!%p268_p8), 112, %s274_s10  ;;  %p1004_p10 = scmp.ne.s32.totalorder (!%p268_p8), %s1346_s20, 0 }
  0x22   : > { %s1443_s17 = scalar_lea.vmem (!%p268_p8), [#allocation2], %s1145_s12 }
  0x26   : > { %s1687_s11 = smov (!%p309_p9, %s1002_s11), 127  ;;  %324 = sbr.rel (%p1004_p10) target bundleno = 45 (0x2d), region = 59 }
  0x27   : > { %s1003_s13 = sshll.u32 %s1687_s11, 2  ;;  %v1356_v14 = vmov (!%p1004_p10), 0.0  }
  0x28   : > { %s1441_s16 = scalar_lea.vmem %s1674_s1, %s1003_s13  ;;  %325 = vst [vmem:[%s1676_s3] sm:$0xff] (!%p1004_p10), %v1356_v14  ;;  %326 = vst [vmem:[%s1676_s3 + $0x8] sm:$0xff] (!%p1004_p10), %v1356_v14 }
  0x29   : > { %327 = vst [vmem:[%s1676_s3 + $0x10] sm:$0xff] (!%p1004_p10), %v1356_v14  ;;  %328 = vst [vmem:[%s1676_s3 + $0x18] sm:$0xff] (!%p1004_p10), %v1356_v14 }
  0x2a   : > { %329 = vst [vmem:[%s1676_s3 + $0x20] sm:$0xff] (!%p1004_p10), %v1356_v14  ;;  %330 = vst [vmem:[%s1676_s3 + $0x28] sm:$0xff] (!%p1004_p10), %v1356_v14 }
  0x2b   : > { %331 = vst [vmem:[%s1676_s3 + $0x30] sm:$0xff] (!%p1004_p10), %v1356_v14 }
  0x2d PF: > { %v1202_v15 = vld [vmem:[%s1441_s16 + $0x40] sm:$0xff]   ;;  %v1206_v19 = vld [vmem:[%s1441_s16 + $0x48] sm:$0xff]   ;;  %v1210_v23 = vld [vmem:[%s1441_s16 + $0x50] sm:$0xff]   ;;  %p1053_p11 = scmp.ne.s32.totalorder %s1346_s20, 1 }
  0x2e   : > { %v1203_v16 = vld [vmem:[%s1441_s16 + $0xc0] sm:$0xff]   ;;  %1064 = vmatprep.subr.bf16.mxu0 %v1202_v15  ;;  %v1207_v20 = vld [vmem:[%s1441_s16 + $0xc8] sm:$0xff]   ;;  %v1211_v24 = vld [vmem:[%s1441_s16 + $0xd0] sm:$0xff]  }
  0x2f   : > { %v1204_v17 = vld [vmem:[%s1441_s16] sm:$0xff]   ;;  %1104 = vmatprep.subr.bf16.mxu1 %v1203_v16  ;;  %v1208_v21 = vld [vmem:[%s1441_s16 + $0x8] sm:$0xff]   ;;  %v1212_v25 = vld [vmem:[%s1441_s16 + $0x10] sm:$0xff]  }
  0x30   : > { %v1205_v18 = vld [vmem:[%s1441_s16 + $0x80] sm:$0xff]   ;;  %1065 = vmatpush3.bf16.msra.mxu0 %v1204_v17  ;;  %v1209_v22 = vld [vmem:[%s1441_s16 + $0x88] sm:$0xff]   ;;  %v1213_v26 = vld [vmem:[%s1441_s16 + $0x90] sm:$0xff]  }
  0x31   : > { %1105 = vmatpush3.bf16.msra.mxu1 %v1205_v18  ;;  %1066 = vmatprep.subr.bf16.mxu0 %v1206_v19  ;;  %v1214_v27 = vld [vmem:[%s1441_s16 + $0x58] sm:$0xff]   ;;  %v1218_v31 = vld [vmem:[%s1441_s16 + $0x60] sm:$0xff]   ;;  %v1222_v35 = vld [vmem:[%s1441_s16 + $0x68] sm:$0xff]  }
  0x32   : > { %1106 = vmatprep.subr.bf16.mxu1 %v1207_v20  ;;  %v1215_v28 = vld [vmem:[%s1441_s16 + $0xd8] sm:$0xff]   ;;  %v1219_v32 = vld [vmem:[%s1441_s16 + $0xe0] sm:$0xff]   ;;  %v1223_v36 = vld [vmem:[%s1441_s16 + $0xe8] sm:$0xff]  }
  0x33   : > { %v1216_v29 = vld [vmem:[%s1441_s16 + $0x18] sm:$0xff]   ;;  %v1220_v33 = vld [vmem:[%s1441_s16 + $0x20] sm:$0xff]   ;;  %v1224_v37 = vld [vmem:[%s1441_s16 + $0x28] sm:$0xff]  }
  0x34   : > { %1067 = vmatpush3.bf16.msra.mxu0 %v1208_v21  ;;  %v1217_v30 = vld [vmem:[%s1441_s16 + $0x98] sm:$0xff]   ;;  %v1221_v34 = vld [vmem:[%s1441_s16 + $0xa0] sm:$0xff]   ;;  %v1225_v38 = vld [vmem:[%s1441_s16 + $0xa8] sm:$0xff]  }
  0x35   : > { %1107 = vmatpush3.bf16.msra.mxu1 %v1209_v22  ;;  %1068 = vmatprep.subr.bf16.mxu0 %v1210_v23  ;;  %v1226_v39 = vld [vmem:[%s1441_s16 + $0x70] sm:$0xff]   ;;  %v1230_v43 = vld [vmem:[%s1441_s16 + $0x78] sm:$0xff]   ;;  %v332_v10 = vld [vmem:[%s1676_s3] sm:$0xff] }
  0x36   : > { %1108 = vmatprep.subr.bf16.mxu1 %v1211_v24  ;;  %v1227_v40 = vld [vmem:[%s1441_s16 + $0xf0] sm:$0xff]   ;;  %v1231_v44 = vld [vmem:[%s1441_s16 + $0xf8] sm:$0xff]   ;;  %v333_v15 = vld [vmem:[%s1676_s3 + $0x8] sm:$0xff] }
  0x37   : > { %v1228_v41 = vld [vmem:[%s1441_s16 + $0x30] sm:$0xff]   ;;  %v1232_v45 = vld [vmem:[%s1441_s16 + $0x38] sm:$0xff]  }
  0x38   : > { %1069 = vmatpush3.bf16.msra.mxu0 %v1212_v25  ;;  %v1229_v42 = vld [vmem:[%s1441_s16 + $0xb0] sm:$0xff]   ;;  %v1233_v46 = vld [vmem:[%s1441_s16 + $0xb8] sm:$0xff]  }
  0x39   : > { %1109 = vmatpush3.bf16.msra.mxu1 %v1213_v26  ;;  %1070 = vmatprep.subr.bf16.mxu0 %v1214_v27  ;;  %v1234_v47 = vld [vmem:[%s1443_s17] ss:$16 sps:$4 sm:$0xff]   ;;  %v1236_v48 = vld [vmem:[%s1443_s17 + $0x4] ss:$16 sps:$4 sm:$0xff]   ;;  %v1237_v49 = vld [vmem:[%s1443_s17 + $0x8] ss:$16 sps:$4 sm:$0xff]  }
  0x3a   : > { %1110 = vmatprep.subr.bf16.mxu1 %v1215_v28  ;;  %v1239_v50 = vld [vmem:[%s1443_s17 + $0xc] ss:$16 sps:$4 sm:$0xff]   ;;  %715 = vmatprep.mubr.bf16.mxu0 %v1236_v48  ;;  %v1240_v51 = vld [vmem:[%s1443_s17 + $0x24] ss:$16 sps:$4 sm:$0xff]   ;;  %v1244_v53 = vld [vmem:[%s1443_s17 + $0x20] ss:$16 sps:$4 sm:$0xff]  }
  0x3b   : > { %779 = vmatprep.mubr.bf16.mxu1 %v1239_v50  ;;  %v1242_v52 = vld [vmem:[%s1443_s17 + $0x2c] ss:$16 sps:$4 sm:$0xff]   ;;  %v1245_v54 = vld [vmem:[%s1443_s17 + $0x28] ss:$16 sps:$4 sm:$0xff]   ;;  %v1246_v55 = vld [vmem:[%s1443_s17 + $0x44] ss:$16 sps:$4 sm:$0xff]  }
  0x3c   : > { %1071 = vmatpush3.bf16.msra.mxu0 %v1216_v29  ;;  %v1248_v56 = vld [vmem:[%s1443_s17 + $0x4c] ss:$16 sps:$4 sm:$0xff]   ;;  %v351_v57 = vld [vmem:[%s1443_s17 + $0x60] sm:$0xff]  ;;  %v1251_v60 = vld [vmem:[%s1443_s17 + $0x48] ss:$16 sps:$4 sm:$0xff]  }
  0x3d   : > { %1111 = vmatpush3.bf16.msra.mxu1 %v1217_v30  ;;  %1072 = vmatprep.subr.bf16.mxu0 %v1218_v31  ;;  %v352_v58 = vld [vmem:[%s1443_s17 + $0x68] sm:$0xff]  ;;  %v1250_v59 = vld [vmem:[%s1443_s17 + $0x40] ss:$16 sps:$4 sm:$0xff]   ;;  %v1018_v61 = vcombine.high %v351_v57, %v351_v57  ;;  %v1017_v63 = vcombine.low %v351_v57, %v351_v57 }
  0x3e   : > { %1112 = vmatprep.subr.bf16.mxu1 %v1219_v32  ;;  %v1020_v62 = vcombine.high %v352_v58, %v352_v58  ;;  %v1019_v0 = vcombine.low %v352_v58, %v352_v58  ;;  %v334_v28 = vld [vmem:[%s1676_s3 + $0x10] sm:$0xff] }
  0x40   : > { %1073 = vmatpush3.bf16.msra.mxu0 %v1220_v33  ;;  %v335_v33 = vld [vmem:[%s1676_s3 + $0x18] sm:$0xff] }
  0x41   : > { %1113 = vmatpush3.bf16.msra.mxu1 %v1221_v34  ;;  %1074 = vmatprep.subr.bf16.mxu0 %v1222_v35 }
  0x42   : > { %1114 = vmatprep.subr.bf16.mxu1 %v1223_v36 }
  0x44   : > { %1075 = vmatpush3.bf16.msra.mxu0 %v1224_v37 }
  0x45   : > { %1115 = vmatpush3.bf16.msra.mxu1 %v1225_v38  ;;  %1076 = vmatprep.subr.bf16.mxu0 %v1226_v39 }
  0x46   : > { %1116 = vmatprep.subr.bf16.mxu1 %v1227_v40 }
  0x48   : > { %1077 = vmatpush3.bf16.msra.mxu0 %v1228_v41 }
  0x49   : > { %1117 = vmatpush3.bf16.msra.mxu1 %v1229_v42  ;;  %1078 = vmatprep.subr.bf16.mxu0 %v1230_v43 }
  0x4a   : > { %1118 = vmatprep.subr.bf16.mxu1 %v1231_v44 }
  0x4c   : > { %1079 = vmatpush3.bf16.msra.mxu0 %v1232_v45 }
  0x4d   : > { %1119 = vmatpush3.bf16.msra.mxu1 %v1233_v46  ;;  %v336_v46 = vld [vmem:[%s1676_s3 + $0x20] sm:$0xff] }
  0x4f   : > { %716 = vmatmul.mubr.bf16.vlgmr.msra.gmra.mrb[0].mxu0 %v1234_v47 }
  0x50   : > { %780 = vmatmul.mubr.bf16.vlgmr.msra.gmra.mrb[0].mxu1 %v1237_v49  ;;  %723 = vmatprep.mubr.bf16.mxu0 %v1240_v51  ;;  %v337_v51 = vld [vmem:[%s1676_s3 + $0x28] sm:$0xff] }
  0x51   : > { %787 = vmatprep.mubr.bf16.mxu1 %v1242_v52 }
  0x57   : > { %724 = vmatmul.mubr.bf16.gmra.mrb[4].mxu0 %v1244_v53 }
  0x58   : > { %788 = vmatmul.mubr.bf16.gmra.mrb[4].mxu1 %v1245_v54  ;;  %731 = vmatprep.mubr.bf16.mxu0 %v1246_v55 }
  0x59   : > { %795 = vmatprep.mubr.bf16.mxu1 %v1248_v56 }
  0x5f   : > { %732 = vmatmul.mubr.bf16.gmra.mrb[8].mxu0 %v1250_v59 }
  0x60   : > { %796 = vmatmul.mubr.bf16.gmra.mrb[8].mxu1 %v1251_v60  ;;  %739 = vmatprep.mubr.bf16.mxu0 %v1018_v61 }
  0x61   : > { %803 = vmatprep.mubr.bf16.mxu1 %v1020_v62 }
  0x67   : > { %740 = vmatmul.mubr.bf16.gmra.mrb[12].mxu0 %v1017_v63 }
  0x68   : > { %804 = vmatmul.mubr.bf16.gmra.mrb[12].mxu1 %v1019_v0  ;;  %v338_v0 = vld [vmem:[%s1676_s3 + $0x30] sm:$0xff] }
 0x122   : > { %v1080_v1 = vpop.f32.mrb[0].mxu0 }
 0x123   : > { %v1120_v2 = vpop.f32.mrb[0].mxu1  ;;  %v1081_v3 = vpop.f32.mrb[1].mxu0 }
 0x124   : > { %v1082_v4 = vadd.f32 %v1081_v3, %v1080_v1  ;;  %v1121_v5 = vpop.f32.mrb[1].mxu1  ;;  %v1083_v6 = vpop.f32.mrb[2].mxu0 }
 0x125   : > { %v1122_v7 = vadd.f32 %v1121_v5, %v1120_v2  ;;  %v1123_v8 = vpop.f32.mrb[2].mxu1  ;;  %v1084_v9 = vpop.f32.mrb[3].mxu0  ;;  %v1054_v5 = vld [vmem:[%s1675_s2] ss:$0 sm:$0xff] (!%p1053_p11) }
 0x126   : > { %v1085_v11 = vadd.f32 %v1084_v9, %v1083_v6  ;;  %v1124_v12 = vpop.f32.mrb[3].mxu1 }
 0x127   : > { %v782_v13 = vadd.f32 %v1122_v7, %v1082_v4  ;;  %v1125_v14 = vadd.f32 %v1124_v12, %v1123_v8  ;;  %v1357_v7 = vmov (!%p1053_p11), 0.0  }
 0x128   : > { %850 = vst [vmem:[#allocation3] sm:$0xff] (!%p1053_p11), %v1357_v7  ;;  %851 = vst [vmem:[#allocation5] sm:$0xff] (!%p1053_p11), %v1357_v7 }
 0x129   : > { %v811_v16 = vadd.f32 %v782_v13, %v332_v10  ;;  %v785_v17 = vadd.f32 %v1125_v14, %v1085_v11 }
 0x12a   : > { %v1086_v18 = vpop.f32.mrb[4].mxu0 }
 0x12b   : > { %818 = vst [vmem:[%s1676_s3] sm:$0xff] %v811_v16  ;;  %v812_v19 = vadd.f32 %v785_v17, %v333_v15  ;;  %v1126_v20 = vpop.f32.mrb[4].mxu1  ;;  %v1087_v21 = vpop.f32.mrb[5].mxu0 }
 0x12c   : > { %v1088_v22 = vadd.f32 %v1087_v21, %v1086_v18  ;;  %v1127_v23 = vpop.f32.mrb[5].mxu1  ;;  %v1089_v24 = vpop.f32.mrb[6].mxu0 }
 0x12d   : > { %819 = vst [vmem:[%s1676_s3 + $0x8] sm:$0xff] %v812_v19  ;;  %v1128_v25 = vadd.f32 %v1127_v23, %v1126_v20  ;;  %v1129_v26 = vpop.f32.mrb[6].mxu1  ;;  %v1090_v27 = vpop.f32.mrb[7].mxu0 }
 0x12e   : > { %v1091_v29 = vadd.f32 %v1090_v27, %v1089_v24  ;;  %v1130_v30 = vpop.f32.mrb[7].mxu1 }
 0x12f   : > { %v790_v31 = vadd.f32 %v1128_v25, %v1088_v22  ;;  %v1131_v32 = vadd.f32 %v1130_v30, %v1129_v26 }
 0x131   : > { %v813_v34 = vadd.f32 %v790_v31, %v334_v28  ;;  %v793_v35 = vadd.f32 %v1131_v32, %v1091_v29 }
 0x132   : > { %v1092_v36 = vpop.f32.mrb[8].mxu0  ;;  %v829_v4 = vld [vmem:[%s1676_s3] sm:$0xff] (!%p1053_p11) }
 0x133   : > { %820 = vst [vmem:[%s1676_s3 + $0x10] sm:$0xff] %v813_v34  ;;  %v814_v37 = vadd.f32 %v793_v35, %v335_v33  ;;  %v1132_v38 = vpop.f32.mrb[8].mxu1  ;;  %v1093_v39 = vpop.f32.mrb[9].mxu0  ;;  %v843_v8 = vadd.f32 (!%p1053_p11), %v1054_v5, %v829_v4 }
 0x134   : > { %v1094_v40 = vadd.f32 %v1093_v39, %v1092_v36  ;;  %v1133_v41 = vpop.f32.mrb[9].mxu1  ;;  %v1095_v42 = vpop.f32.mrb[10].mxu0  ;;  %v830_v6 = vld [vmem:[%s1676_s3 + $0x8] sm:$0xff] (!%p1053_p11) }
 0x135   : > { %821 = vst [vmem:[%s1676_s3 + $0x18] sm:$0xff] %v814_v37  ;;  %v1134_v43 = vadd.f32 %v1133_v41, %v1132_v38  ;;  %v1135_v44 = vpop.f32.mrb[10].mxu1  ;;  %v1096_v45 = vpop.f32.mrb[11].mxu0  ;;  %v844_v9 = vadd.f32 (!%p1053_p11), %v1054_v5, %v830_v6  ;;  %852 = vst [vmem:[%s1676_s3] sm:$0xff] (!%p1053_p11), %v843_v8 }
 0x136   : > { %v1097_v47 = vadd.f32 %v1096_v45, %v1095_v42  ;;  %v1136_v48 = vpop.f32.mrb[11].mxu1 }
 0x137   : > { %v798_v49 = vadd.f32 %v1134_v43, %v1094_v40  ;;  %v1137_v50 = vadd.f32 %v1136_v48, %v1135_v44  ;;  %853 = vst [vmem:[%s1676_s3 + $0x8] sm:$0xff] (!%p1053_p11), %v844_v9 }
 0x139   : > { %v815_v52 = vadd.f32 %v798_v49, %v336_v46  ;;  %v801_v53 = vadd.f32 %v1137_v50, %v1097_v47 }
 0x13a   : > { %v1098_v54 = vpop.f32.mrb[12].mxu0  ;;  %v831_v10 = vld [vmem:[%s1676_s3 + $0x10] sm:$0xff] (!%p1053_p11) }
 0x13b   : > { %822 = vst [vmem:[%s1676_s3 + $0x20] sm:$0xff] %v815_v52  ;;  %v816_v55 = vadd.f32 %v801_v53, %v337_v51  ;;  %v1138_v56 = vpop.f32.mrb[12].mxu1  ;;  %v1099_v57 = vpop.f32.mrb[13].mxu0  ;;  %v845_v13 = vadd.f32 (!%p1053_p11), %v1054_v5, %v831_v10 }
 0x13c   : > { %v1100_v58 = vadd.f32 %v1099_v57, %v1098_v54  ;;  %v1139_v59 = vpop.f32.mrb[13].mxu1  ;;  %v1101_v60 = vpop.f32.mrb[14].mxu0  ;;  %v832_v11 = vld [vmem:[%s1676_s3 + $0x18] sm:$0xff] (!%p1053_p11) }
 0x13d   : > { %823 = vst [vmem:[%s1676_s3 + $0x28] sm:$0xff] %v816_v55  ;;  %v1140_v61 = vadd.f32 %v1139_v59, %v1138_v56  ;;  %v1141_v62 = vpop.f32.mrb[14].mxu1  ;;  %v1102_v63 = vpop.f32.mrb[15].mxu0  ;;  %828 = sbr.rel (%p1053_p11) target bundleno = 334 (0x14e), region = 63  ;;  %v846_v14 = vadd.f32 (!%p1053_p11), %v1054_v5, %v832_v11  ;;  %854 = vst [vmem:[%s1676_s3 + $0x10] sm:$0xff] (!%p1053_p11), %v845_v13 }
 0x13e   : > { %v1142_v1 = vpop.f32.mrb[15].mxu1 }
 0x13f   : > { %v806_v2 = vadd.f32 %v1140_v61, %v1100_v58  ;;  %855 = vst [vmem:[%s1676_s3 + $0x18] sm:$0xff] (!%p1053_p11), %v846_v14 }
 0x141   : > { %v817_v3 = vadd.f32 %v806_v2, %v338_v0 }
 0x142   : > { %v833_v12 = vld [vmem:[%s1676_s3 + $0x20] sm:$0xff] (!%p1053_p11) }
 0x143   : > { %824 = vst [vmem:[%s1676_s3 + $0x30] sm:$0xff] %v817_v3  ;;  %v847_v15 = vadd.f32 (!%p1053_p11), %v1054_v5, %v833_v12 }
 0x144   : > { %v834_v16 = vld [vmem:[%s1676_s3 + $0x28] sm:$0xff] }
 0x145   : > { %v848_v18 = vadd.f32 %v1054_v5, %v834_v16  ;;  %856 = vst [vmem:[%s1676_s3 + $0x20] sm:$0xff] %v847_v15 }
 0x147   : > { %857 = vst [vmem:[%s1676_s3 + $0x28] sm:$0xff] %v848_v18 }
 0x14a   : > { %v835_v17 = vld [vmem:[%s1676_s3 + $0x30] sm:$0xff] }
 0x14b   : > { %v849_v19 = vadd.f32 %v1054_v5, %v835_v17 }
 0x14d   : > { %858 = vst [vmem:[%s1676_s3 + $0x30] sm:$0xff] %v849_v19 }
 0x14e PF: > { %p1603_p12 = scmp.eq.s32.totalorder %s996_s23, 1  ;;  %s1358_s17 = smov [#allocation3]  }
 0x14f   : > { %s877_s25 = sshll.u32 %s1358_s17, 4  ;;  %s1359_s26 = smov [#allocation5]   ;;  %s878_s25 = int_to_ptr.vmem [resolvable:$true] %s877_s25 }
 0x150   : > { %s890_s18 = sshll.u32 %s1359_s26, 4  ;;  %s1256_s28 = scalar_lea.vmem %s878_s25, 128  ;;  %s1607_s18 = int_to_ptr.vmem [resolvable:$true] %s890_s18 }
 0x151   : > { %p1257_p13 = scmp.ne.s32.totalorder %s878_s25, %s1256_s28  ;;  %p1263_p2 = scmp.lt.s32.totalorder %s878_s25, %s878_s25 }
 0x152   : > { %p1264_p3 = scmp.lt.s32.totalorder %s1256_s28, %s1256_s28 }
 0x153   : > { %p1258_p0 = pnand %p1257_p13, %p1603_p12 }
 0x154   : > { %p1265_p4 = por %p1264_p3, %p1263_p2 }
 0x155   : > { %p1259_p1 = pneg %p1258_p0 }
 0x157   : > { %p1266_p5 = pnand %p1265_p4, %p1259_p1 }
 0x159   : > { %1269 = shalt.err (!%p1266_p5)
}
 0x15a   : > { %s1270_s30 = scalar_lea.hbm %s1677_s4, 128 }
 0x15b   : > { %p1271_p6 = scmp.ne.s32.totalorder %s1677_s4, %s1270_s30  ;;  %p1276_p9 = scmp.lt.u32.totalorder %s1270_s30, %s1677_s4 }
 0x15d   : > { %p1272_p7 = pnand %p1271_p6, %p1603_p12 }
 0x15f   : > { %p1273_p8 = pneg %p1272_p7 }
 0x161   : > { %p1278_p10 = pnand %p1276_p9, %p1273_p8 }
 0x163   : > { %1281 = shalt.err (!%p1278_p10)
}
 0x164   : > { %1147 = dma.vmem_to_hbm [thread:$0]  (%p1603_p12), %s878_s25, 128, %s1677_s4, [#allocation4]  }
 0x165   : > { %s1282_s12 = scalar_lea.vmem %s1607_s18, 128  ;;  %p1289_p1 = scmp.lt.s32.totalorder %s1607_s18, %s1607_s18 }
 0x166   : > { %p1283_p11 = scmp.ne.s32.totalorder %s1607_s18, %s1282_s12  ;;  %p1290_p2 = scmp.lt.s32.totalorder %s1282_s12, %s1282_s12 }
 0x168   : > { %p1284_p13 = pnand %p1283_p11, %p1603_p12  ;;  %p1291_p3 = por %p1290_p2, %p1289_p1 }
 0x16a   : > { %p1285_p0 = pneg %p1284_p13 }
 0x16c   : > { %p1292_p4 = pnand %p1291_p3, %p1285_p0 }
 0x16e   : > { %1295 = shalt.err (!%p1292_p4)
}
 0x16f   : > { %s1296_s14 = scalar_lea.hbm %s1678_s5, 128 }
 0x170   : > { %p1297_p5 = scmp.ne.s32.totalorder %s1678_s5, %s1296_s14  ;;  %p1302_p8 = scmp.lt.u32.totalorder %s1296_s14, %s1678_s5 }
 0x172   : > { %p1298_p6 = pnand %p1297_p5, %p1603_p12 }
 0x174   : > { %p1299_p7 = pneg %p1298_p6 }
 0x176   : > { %p1304_p9 = pnand %p1302_p8, %p1299_p7 }
 0x178   : > { %1307 = shalt.err (!%p1304_p9)
}
 0x179   : > { %1149 = dma.vmem_to_hbm [thread:$0]  (%p1603_p12), %s1607_s18, 128, %s1678_s5, [#allocation6]  }
 0x17a   : > { %1329 = dma.done.wait (%p1603_p12), [#allocation4], 128  }
 0x17b   : > { %1331 = vsyncadd (%p1603_p12), [#allocation4], 4294967168 }
 0x17c   : > { %1333 = dma.done.wait (%p1603_p12), [#allocation6], 128  }
 0x17d   : > { %1335 = vsyncadd (%p1603_p12), [#allocation6], 4294967168 }
 0x17e PF: > { %s18_s22 = sadd.s32 1, %s1354_s22   ;;  %s1680_s18 = smov %s1342_s19 }
 0x17f   : > { %p15_p10 = scmp.ge.s32.totalorder %s18_s22, 4   ;;  %s1681_s19 = smov %s1426_s27 }
 0x180   : > { %s1682_s20 = smov %s1350_s21  ;;  %s1683_s21 = smov %s1685_s24 }
 0x181   :  { %17 = sbr.rel (!%p15_p10) target bundleno = 4 (0x4), region = 120 }
 0x188   :  { %915 = vsyncpa [#allocation4], 1 }
 0x189   :  { %917 = vsyncpa [#allocation4 + $0x1], 1 }
 0x18a   :  { %918 = vsyncpa [#allocation6], 1 }

// kernel: multiscale_forward.34
= control target key start
LH: loop header
LB: loop body
LE: loop exit
PB: predicated region body
PF: predicated region fallthrough
CT: control target
= control target key end

     0   :  { %s979_s13 = smov 0   ;;  %s981_s14 = smov 0   ;;  %s1051_s0 = inlined_call_operand.vmem [shape: f32[8,8,8], index: 0, kind: input, shape index: {}]   ;;  %s1052_s1 = inlined_call_operand.vmem [shape: f32[8,8,8], index: 1, kind: input, shape index: {}]   ;;  %s1053_s2 = inlined_call_operand.vmem [shape: f32[8,8,8], index: 2, kind: input, shape index: {}]   ;;  %s1054_s3 = inlined_call_operand.vmem [shape: f32[8,8,8], index: 3, kind: input, shape index: {}]   ;;  %s1055_s4 = inlined_call_operand.vmem [shape: f32[8,8,8], index: 4, kind: input, shape index: {}]   ;;  %s1056_s5 = inlined_call_operand.vmem [shape: f32[8,8,8], index: 5, kind: input, shape index: {}]   ;;  %s1057_s6 = inlined_call_operand.vmem [shape: f32[8,8,8], index: 6, kind: input, shape index: {}]   ;;  %s1058_s7 = inlined_call_operand.vmem [shape: f32[8,8,8], index: 7, kind: input, shape index: {}]   ;;  %s1059_s8 = inlined_call_operand.vmem [shape: f32[8,8,8], index: 8, kind: input, shape index: {}]   ;;  %s1060_s9 = inlined_call_operand.vmem [shape: f32[8,8], index: 9, kind: input, shape index: {}]   ;;  %s1061_s10 = inlined_call_operand.vmem [shape: f32[8,8,8], index: 10, kind: output, shape index: {}]  }
   0x1   :  { %s983_s15 = smov 0  }
   0x2 LB: > { %s32_s16 = sadd.s32 1, %s918_s14  ;;  %p863_p0 = scmp.ge.s32.totalorder %s922_s15, 1  ;;  %s922_s15 = sphi %s983_s15, %s20_s15   ;;  %s918_s14 = sphi %s981_s14, %s1063_s14   ;;  %s914_s13 = sphi %s979_s13, %s1062_s13  }
   0x3   : > { %p34_p1 = scmp.ge.s32.totalorder %s32_s16, 8  ;;  %p451_p2 = scmp.lt.s32.totalorder %s922_s15, 9 }
   0x5   : > { %s1065_s16 = smov (%p34_p1, %s32_s16), 0  ;;  %p452_p3 = pnand %p863_p0, %p451_p2 }
   0x6   : > { %p553_p4 = scmp.lt.s32.totalorder (!%p452_p3), %s914_s13, 7  ;;  %v644_v16 = vld [vmem:[%s1060_s9] sm:$0xff] (!%p452_p3)  ;;  %vm646_vm0 = vcmask (!%p452_p3), 64512  }
   0x7   : > { %455 = sbr.rel (%p452_p3) target bundleno = 38 (0x26), region = 60 }
   0xe   : > { %s1067_s13 = smov (!%p553_p4, %s914_s13), 7 }
   0xf   : > { %s997_s17 = sshll.u32 %s1067_s13, 3 }
  0x10   : > { %s559_s20 = scalar_lea.vmem %s1051_s0, %s997_s17  ;;  %s566_s23 = scalar_lea.vmem %s1052_s1, %s997_s17 }
  0x11   : > { %s573_s26 = scalar_lea.vmem %s1053_s2, %s997_s17  ;;  %s580_s29 = scalar_lea.vmem %s1054_s3, %s997_s17  ;;  %v627_v0 = vld [vmem:[%s559_s20] sm:$0xff] }
  0x12   : > { %v628_v1 = vld [vmem:[%s566_s23] sm:$0xff]  ;;  %s587_s12 = scalar_lea.vmem %s1055_s4, %s997_s17  ;;  %s594_s19 = scalar_lea.vmem %s1056_s5, %s997_s17 }
  0x13   : > { %v629_v2 = vadd.f32 %v628_v1, %v627_v0  ;;  %v630_v3 = vld [vmem:[%s573_s26] sm:$0xff]  ;;  %s601_s24 = scalar_lea.vmem %s1057_s6, %s997_s17  ;;  %s608_s25 = scalar_lea.vmem %s1058_s7, %s997_s17 }
  0x14   : > { %v632_v4 = vld [vmem:[%s580_s29] sm:$0xff]  ;;  %s615_s28 = scalar_lea.vmem %s1059_s8, %s997_s17  ;;  %s626_s13 = scalar_lea.vmem %s1061_s10, %s997_s17 }
  0x15   : > { %v631_v5 = vadd.f32 %v630_v3, %v629_v2  ;;  %v634_v6 = vld [vmem:[%s587_s12] sm:$0xff] }
  0x16   : > { %v636_v8 = vld [vmem:[%s594_s19] sm:$0xff] }
  0x17   : > { %v633_v7 = vadd.f32 %v632_v4, %v631_v5  ;;  %v638_v10 = vld [vmem:[%s601_s24] sm:$0xff] }
  0x18   : > { %v640_v12 = vld [vmem:[%s608_s25] sm:$0xff] }
  0x19   : > { %v635_v9 = vadd.f32 %v634_v6, %v633_v7  ;;  %v642_v14 = vld [vmem:[%s615_s28] sm:$0xff] }
  0x1b   : > { %v637_v11 = vadd.f32 %v636_v8, %v635_v9 }
  0x1d   : > { %v639_v13 = vadd.f32 %v638_v10, %v637_v11 }
  0x1f   : > { %v641_v15 = vadd.f32 %v640_v12, %v639_v13 }
  0x21   : > { %v643_v17 = vadd.f32 %v642_v14, %v641_v15 }
  0x23   : > { %v645_v18 = vmul.f32 %v644_v16, %v643_v17 }
  0x25   : > { %647 = vst.msk [vmem:[%s626_s13] sm:$0xff] %vm646_vm0, %v645_v18 }
  0x26 PF: > { %s20_s15 = sadd.s32 1, %s922_s15   ;;  %s1062_s13 = smov %s918_s14 }
  0x27   : > { %p17_p5 = scmp.ge.s32.totalorder %s20_s15, 10   ;;  %s1063_s14 = smov %s1065_s16 }
  0x29   :  { %19 = sbr.rel (!%p17_p5) target bundleno = 2 (0x2), region = 117 }

// kernel: multiscale_forward.35
= control target key start
LH: loop header
LB: loop body
LE: loop exit
PB: predicated region body
PF: predicated region fallthrough
CT: control target
= control target key end

     0   :  { %11 = vsyncpa [#allocation3], 0  ;;  %v423_v2 = vmov 0.0   ;;  %s540_s0 = inlined_call_operand.vmem [shape: bf16[56,128], index: 0, kind: input, shape index: {}]   ;;  %s541_s1 = inlined_call_operand.vmem [shape: bf16[128,128], index: 1, kind: input, shape index: {}]   ;;  %s542_s2 = inlined_call_operand.vmem [shape: f32[1,128], index: 2, kind: input, shape index: {}]   ;;  %s543_s3 = inlined_call_operand.vmem [shape: f32[56,128], index: 3, kind: output, shape index: {0}]   ;;  %s544_s4 = inlined_call_operand.hbm [shape: f32[8,128], index: 4, kind: output, shape index: {1}]   ;;  %s545_s5 = inlined_call_operand.hbm [shape: f32[8,128], index: 5, kind: output, shape index: {2}]  }
   0x1   :  { %v363_v0 = vld [vmem:[%s541_s1] sm:$0xff]   ;;  %v364_v1 = vld [vmem:[%s541_s1 + $0x8] sm:$0xff]   ;;  %233 = vst [vmem:[#allocation2] sm:$0xff] %v423_v2  ;;  %234 = vst [vmem:[#allocation4] sm:$0xff] %v423_v2 }
   0x2   :  { %320 = vmatprep.subr.bf16.mxu0 %v363_v0  ;;  %344 = vmatprep.subr.bf16.mxu1 %v363_v0  ;;  %v365_v3 = vld [vmem:[%s541_s1 + $0x10] sm:$0xff]   ;;  %v366_v4 = vld [vmem:[%s541_s1 + $0x18] sm:$0xff]   ;;  %v371_v5 = vld [vmem:[%s540_s0] sm:$0xff]  }
   0x3   :  { %321 = vmatpush3.bf16.msra.mxu0 %v363_v0  ;;  %352 = vmatpush3.bf16.msra.mxu1 %v363_v0  ;;  %v372_v6 = vld [vmem:[%s540_s0 + $0x10] sm:$0xff]  }
   0x4   :  { %322 = vmatprep.subr.bf16.mxu0 %v364_v1  ;;  %345 = vmatprep.subr.bf16.mxu1 %v364_v1 }
   0x5   :  { %336 = vmatprep.mubr.bf16.mxu0 %v371_v5 }
   0x7   :  { %323 = vmatpush3.bf16.msra.mxu0 %v364_v1  ;;  %353 = vmatpush3.bf16.msra.mxu1 %v364_v1 }
   0x8   :  { %324 = vmatprep.subr.bf16.mxu0 %v365_v3  ;;  %346 = vmatprep.subr.bf16.mxu1 %v365_v3 }
   0xb   :  { %325 = vmatpush3.bf16.msra.mxu0 %v365_v3  ;;  %354 = vmatpush3.bf16.msra.mxu1 %v365_v3 }
   0xc   :  { %12 = vsyncpa [#allocation5], 0  ;;  %326 = vmatprep.subr.bf16.mxu0 %v366_v4  ;;  %347 = vmatprep.subr.bf16.mxu1 %v366_v4  ;;  %v367_v7 = vld [vmem:[%s541_s1 + $0x20] sm:$0xff]   ;;  %v368_v8 = vld [vmem:[%s541_s1 + $0x28] sm:$0xff]   ;;  %s424_s17 = smov [#allocation2]   ;;  %s425_s19 = smov [#allocation4]  }
   0xd   :  { %340 = vmatprep.mubr.bf16.mxu1 %v372_v6  ;;  %v369_v9 = vld [vmem:[%s541_s1 + $0x30] sm:$0xff]   ;;  %v370_v10 = vld [vmem:[%s541_s1 + $0x38] sm:$0xff]   ;;  %v373_v11 = vld [vmem:[%s540_s0 + $0x8] sm:$0xff]   ;;  %s271_s18 = sshll.u32 %s424_s17, 4  ;;  %s281_s1 = sshll.u32 %s425_s19, 4  ;;  %s272_s18 = int_to_ptr.vmem [resolvable:$true] %s271_s18  ;;  %s282_s1 = int_to_ptr.vmem [resolvable:$true] %s281_s1 }
   0xe   :  { %v374_v12 = vld [vmem:[%s540_s0 + $0x18] ss:$0 sps:$4 sm:$0xff]   ;;  %s375_s20 = scalar_lea.vmem %s272_s18, 128  ;;  %p380_p1 = scmp.lt.s32.totalorder %s272_s18, %s272_s18 }
   0xf   :  { %327 = vmatpush3.bf16.msra.mxu0 %v366_v4  ;;  %355 = vmatpush3.bf16.msra.mxu1 %v366_v4  ;;  %p376_p0 = scmp.ne.s32.totalorder %s272_s18, %s375_s20  ;;  %p381_p2 = scmp.lt.s32.totalorder %s375_s20, %s375_s20 }
  0x10   :  { %328 = vmatprep.subr.bf16.mxu0 %v367_v7  ;;  %348 = vmatprep.subr.bf16.mxu1 %v367_v7 }
  0x11   :  { %p382_p3 = por %p381_p2, %p380_p1 }
  0x13   :  { %329 = vmatpush3.bf16.msra.mxu0 %v367_v7  ;;  %356 = vmatpush3.bf16.msra.mxu1 %v367_v7  ;;  %p383_p4 = pnand %p382_p3, %p376_p0 }
  0x14   :  { %330 = vmatprep.subr.bf16.mxu0 %v368_v8  ;;  %349 = vmatprep.subr.bf16.mxu1 %v368_v8 }
  0x17   :  { %331 = vmatpush3.bf16.msra.mxu0 %v368_v8  ;;  %357 = vmatpush3.bf16.msra.mxu1 %v368_v8 }
  0x18   :  { %332 = vmatprep.subr.bf16.mxu0 %v369_v9  ;;  %350 = vmatprep.subr.bf16.mxu1 %v369_v9 }
  0x1b   :  { %333 = vmatpush3.bf16.msra.mxu0 %v369_v9  ;;  %358 = vmatpush3.bf16.msra.mxu1 %v369_v9 }
  0x1c   :  { %334 = vmatprep.subr.bf16.mxu0 %v370_v10  ;;  %351 = vmatprep.subr.bf16.mxu1 %v370_v10 }
  0x1f   :  { %335 = vmatpush3.bf16.msra.mxu0 %v370_v10  ;;  %359 = vmatpush3.bf16.msra.mxu1 %v370_v10 }
  0x22   :  { %337 = vmatmul.mubr.bf16.vlgmr.msra.gmra.mrb[0].mxu0 %v373_v11  ;;  %341 = vmatmul.mubr.bf16.vlgmr.msra.gmra.mrb[0].mxu1 %v374_v12 }
  0x23   :  { %386 = shalt.err (!%p383_p4)
}
  0x24   :  { %s387_s0 = scalar_lea.hbm %s544_s4, 128 }
  0x25   :  { %p388_p5 = scmp.ne.s32.totalorder %s544_s4, %s387_s0  ;;  %p391_p6 = scmp.lt.u32.totalorder %s387_s0, %s544_s4 }
  0x27   :  { %p393_p7 = pnand %p391_p6, %p388_p5 }
  0x29   :  { %396 = shalt.err (!%p393_p7)
}
  0x2a   :  { %274 = dma.vmem_to_hbm [thread:$0]  %s272_s18, 128, %s544_s4, [#allocation3]  }
  0x2b   :  { %s397_s29 = scalar_lea.vmem %s282_s1, 128  ;;  %p402_p9 = scmp.lt.s32.totalorder %s282_s1, %s282_s1 }
  0x2c   :  { %p398_p8 = scmp.ne.s32.totalorder %s282_s1, %s397_s29  ;;  %p403_p10 = scmp.lt.s32.totalorder %s397_s29, %s397_s29 }
  0x2e   :  { %p404_p11 = por %p403_p10, %p402_p9 }
  0x30   :  { %p405_p12 = pnand %p404_p11, %p398_p8 }
  0x32   :  { %408 = shalt.err (!%p405_p12)
}
  0x33   :  { %s409_s7 = scalar_lea.hbm %s545_s5, 128 }
  0x34   :  { %p410_p13 = scmp.ne.s32.totalorder %s545_s5, %s409_s7  ;;  %p413_p0 = scmp.lt.u32.totalorder %s409_s7, %s545_s5 }
  0x36   :  { %p415_p1 = pnand %p413_p0, %p410_p13 }
  0x38   :  { %418 = shalt.err (!%p415_p1)
}
  0x39   :  { %284 = dma.vmem_to_hbm [thread:$0]  %s282_s1, 128, %s545_s5, [#allocation5]   ;;  %v307_v14 = vld [vmem:[%s542_s2] ss:$0 sm:$0xff] }
  0xf5   :  { %v338_v13 = vpop.f32.mrb[0].mxu0  ;;  %v342_v15 = vpop.f32.mrb[0].mxu1 }
  0xf6   :  { %v165_v16 = vpop.f32.mrb[1].mxu0  ;;  %v181_v17 = vpop.f32.mrb[1].mxu1  ;;  %v228_v20 = vadd.f32 %v338_v13, %v307_v14  ;;  %v232_v21 = vadd.f32 %v342_v15, %v307_v14 }
  0xf7   :  { %v339_v18 = vpop.f32.mrb[2].mxu0  ;;  %v343_v19 = vpop.f32.mrb[2].mxu1  ;;  %v226_v24 = vadd.f32 %v307_v14, %v165_v16  ;;  %v230_v25 = vadd.f32 %v307_v14, %v181_v17 }
  0xf8   :  { %v168_v22 = vpop.f32.mrb[3].mxu0  ;;  %v184_v23 = vpop.f32.mrb[3].mxu1  ;;  %vm237_vm0 = vcmp.ge.f32.partialorder %v228_v20, 0.0  ;;  %v244_v26 = vmul.f32 0.2, %v228_v20  ;;  %vm241_vm1 = vcmp.ge.f32.partialorder %v232_v21, 0.0  ;;  %v229_v32 = vadd.f32 %v339_v18, %v307_v14 }
  0xf9   :  { %v248_v27 = vmul.f32 0.2, %v232_v21  ;;  %vm235_vm2 = vcmp.ge.f32.partialorder %v226_v24, 0.0  ;;  %v242_v28 = vmul.f32 0.2, %v226_v24  ;;  %vm239_vm3 = vcmp.ge.f32.partialorder %v230_v25, 0.0 }
  0xfa   :  { %v246_v29 = vmul.f32 0.2, %v230_v25  ;;  %v251_v30 = vsel %vm237_vm0, %v228_v20, %v244_v26  ;;  %v227_v33 = vadd.f32 %v307_v14, %v168_v22  ;;  %v231_v36 = vadd.f32 %v307_v14, %v184_v23 }
  0xfb   :  { %v255_v31 = vsel %vm241_vm1, %v232_v21, %v248_v27  ;;  %258 = vst [vmem:[%s543_s3 + $0x10] sm:$0xff] %v251_v30  ;;  %v249_v34 = vsel %vm235_vm2, %v226_v24, %v242_v28  ;;  %vm238_vm4 = vcmp.ge.f32.partialorder %v229_v32, 0.0  ;;  %v245_v37 = vmul.f32 0.2, %v229_v32 }
  0xfc   :  { %262 = vst [vmem:[%s543_s3 + $0x30] sm:$0xff] %v255_v31  ;;  %v253_v35 = vsel %vm239_vm3, %v230_v25, %v246_v29  ;;  %256 = vst [vmem:[%s543_s3] sm:$0xff] %v249_v34  ;;  %vm236_vm5 = vcmp.ge.f32.partialorder %v227_v33, 0.0  ;;  %v243_v38 = vmul.f32 0.2, %v227_v33  ;;  %vm240_vm6 = vcmp.ge.f32.partialorder %v231_v36, 0.0 }
  0xfd   :  { %260 = vst [vmem:[%s543_s3 + $0x20] sm:$0xff] %v253_v35  ;;  %v247_v39 = vmul.f32 0.2, %v231_v36  ;;  %v252_v40 = vsel %vm238_vm4, %v229_v32, %v245_v37 }
  0xfe   :  { %v250_v41 = vsel %vm236_vm5, %v227_v33, %v243_v38  ;;  %259 = vst [vmem:[%s543_s3 + $0x18] sm:$0xff] %v252_v40 }
  0xff   :  { %257 = vst [vmem:[%s543_s3 + $0x8] sm:$0xff] %v250_v41  ;;  %v254_v42 = vsel %vm240_vm6, %v231_v36, %v247_v39 }
 0x100   :  { %261 = vst [vmem:[%s543_s3 + $0x28] sm:$0xff] %v254_v42 }
 0x101   :  { %419 = dma.done.wait [#allocation3], 128  }
 0x102   :  { %420 = vsyncadd [#allocation3], 4294967168 }
 0x103   :  { %421 = dma.done.wait [#allocation5], 128  }
 0x104   :  { %422 = vsyncadd [#allocation5], 4294967168 }
 0x105   :  { %293 = vsyncpa [#allocation3], 1 }
 0x106   :  { %294 = vsyncpa [#allocation5], 1 }

// kernel: multiscale_forward.36
= control target key start
LH: loop header
LB: loop body
LE: loop exit
PB: predicated region body
PF: predicated region fallthrough
CT: control target
= control target key end

     0   :  { %s341_s1 = inlined_call_operand.vmem [shape: bf16[128,128], index: 1, kind: input, shape index: {}]   ;;  %s342_s0 = inlined_call_operand.vmem [shape: bf16[24,128], index: 0, kind: input, shape index: {}]   ;;  %s343_s2 = inlined_call_operand.vmem [shape: f32[1,128], index: 2, kind: input, shape index: {}]   ;;  %s344_s3 = inlined_call_operand.vmem [shape: f32[24,128], index: 3, kind: output, shape index: {0}]   ;;  %s345_s4 = inlined_call_operand.vmem [shape: f32[8,128], index: 4, kind: output, shape index: {1}]   ;;  %s346_s5 = inlined_call_operand.vmem [shape: f32[8,128], index: 5, kind: output, shape index: {2}]  }
   0x1   :  { %v253_v0 = vld [vmem:[%s341_s1] sm:$0xff]   ;;  %v254_v1 = vld [vmem:[%s341_s1 + $0x8] sm:$0xff]   ;;  %v255_v2 = vld [vmem:[%s341_s1 + $0x10] sm:$0xff]  }
   0x2   :  { %232 = vmatprep.subr.bf16.mxu0 %v253_v0  ;;  %v256_v3 = vld [vmem:[%s341_s1 + $0x18] sm:$0xff]   ;;  %v261_v4 = vld [vmem:[%s342_s0] sm:$0xff]   ;;  %v258_v6 = vld [vmem:[%s341_s1 + $0x28] sm:$0xff]  }
   0x3   :  { %233 = vmatpush3.bf16.msra.mxu0 %v253_v0  ;;  %248 = vmatprep.mubr.bf16.mxu0 %v261_v4  ;;  %v257_v5 = vld [vmem:[%s341_s1 + $0x20] sm:$0xff]   ;;  %v259_v7 = vld [vmem:[%s341_s1 + $0x30] sm:$0xff]   ;;  %v260_v8 = vld [vmem:[%s341_s1 + $0x38] sm:$0xff]  }
   0x4   :  { %234 = vmatprep.subr.bf16.mxu0 %v254_v1  ;;  %v262_v9 = vld [vmem:[%s342_s0 + $0x8] ss:$0 sps:$4 sm:$0xff]   ;;  %v221_v11 = vld [vmem:[%s343_s2] ss:$0 sm:$0xff] }
   0x7   :  { %235 = vmatpush3.bf16.msra.mxu0 %v254_v1 }
   0x8   :  { %236 = vmatprep.subr.bf16.mxu0 %v255_v2 }
   0xb   :  { %237 = vmatpush3.bf16.msra.mxu0 %v255_v2 }
   0xc   :  { %238 = vmatprep.subr.bf16.mxu0 %v256_v3 }
   0xf   :  { %239 = vmatpush3.bf16.msra.mxu0 %v256_v3 }
  0x10   :  { %240 = vmatprep.subr.bf16.mxu0 %v257_v5 }
  0x13   :  { %241 = vmatpush3.bf16.msra.mxu0 %v257_v5 }
  0x14   :  { %242 = vmatprep.subr.bf16.mxu0 %v258_v6 }
  0x17   :  { %243 = vmatpush3.bf16.msra.mxu0 %v258_v6 }
  0x18   :  { %244 = vmatprep.subr.bf16.mxu0 %v259_v7 }
  0x1b   :  { %245 = vmatpush3.bf16.msra.mxu0 %v259_v7 }
  0x1c   :  { %246 = vmatprep.subr.bf16.mxu0 %v260_v8 }
  0x1f   :  { %247 = vmatpush3.bf16.msra.mxu0 %v260_v8 }
  0x22   :  { %249 = vmatmul.mubr.bf16.vlgmr.msra.gmra.mrb[0].mxu0 %v262_v9 }
  0xf5   :  { %v250_v10 = vpop.f32.mrb[0].mxu0 }
  0xf6   :  { %v139_v12 = vpop.f32.mrb[1].mxu0  ;;  %v174_v14 = vadd.f32 %v250_v10, %v221_v11 }
  0xf7   :  { %v251_v13 = vpop.f32.mrb[2].mxu0  ;;  %v172_v16 = vadd.f32 %v221_v11, %v139_v12 }
  0xf8   :  { %v142_v15 = vpop.f32.mrb[3].mxu0  ;;  %198 = vst [vmem:[%s344_s3 + $0x10] sm:$0xff] %v174_v14  ;;  %v185_v21 = vmul.f32 %v174_v14, %v174_v14 }
  0xf9   :  { %196 = vst [vmem:[%s344_s3] sm:$0xff] %v172_v16  ;;  %v173_v17 = vadd.f32 %v221_v11, %v142_v15  ;;  %v183_v18 = vmul.f32 %v172_v16, %v172_v16 }
  0xfb   :  { %v175_v19 = vadd.f32 %v173_v17, %v172_v16  ;;  %v184_v20 = vmul.f32 %v173_v17, %v173_v17  ;;  %197 = vst [vmem:[%s344_s3 + $0x8] sm:$0xff] %v173_v17 }
  0xfd   :  { %v176_v22 = vadd.f32 %v175_v19, %v174_v14  ;;  %v186_v23 = vadd.f32 %v184_v20, %v183_v18 }
  0xff   :  { %v177_v24 = vrot.slane %v176_v22, 4  ;;  %v187_v25 = vadd.f32 %v186_v23, %v185_v21 }
 0x101   :  { %v178_v26 = vadd.f32 %v177_v24, %v176_v22  ;;  %v188_v27 = vrot.slane %v187_v25, 4 }
 0x103   :  { %v179_v28 = vrot.slane %v178_v26, 2  ;;  %v189_v29 = vadd.f32 %v188_v27, %v187_v25 }
 0x105   :  { %v180_v30 = vadd.f32 %v179_v28, %v178_v26  ;;  %v190_v31 = vrot.slane %v189_v29, 2 }
 0x107   :  { %v181_v32 = vrot.slane %v180_v30, 1  ;;  %v191_v33 = vadd.f32 %v190_v31, %v189_v29 }
 0x109   :  { %v182_v34 = vadd.f32 %v181_v32, %v180_v30  ;;  %v192_v35 = vrot.slane %v191_v33, 1 }
 0x10b   :  { %v193_v36 = vadd.f32 %v192_v35, %v191_v33  ;;  %194 = vst [vmem:[%s345_s4] sm:$0xff] %v182_v34 }
 0x10d   :  { %195 = vst [vmem:[%s346_s5] sm:$0xff] %v193_v36 }

// kernel: multiscale_forward.38
= control target key start
LH: loop header
LB: loop body
LE: loop exit
PB: predicated region body
PF: predicated region fallthrough
CT: control target
= control target key end

     0   :  { %s395_s1 = inlined_call_operand.vmem [shape: bf16[256,128], index: 1, kind: input, shape index: {}]   ;;  %s396_s0 = inlined_call_operand.vmem [shape: bf16[8,256], index: 0, kind: input, shape index: {}]   ;;  %s397_s2 = inlined_call_operand.vmem [shape: f32[1,128], index: 2, kind: input, shape index: {}]   ;;  %s398_s3 = inlined_call_operand.vmem [shape: f32[8,128], index: 3, kind: output, shape index: {0}]   ;;  %s399_s4 = inlined_call_operand.vmem [shape: f32[8,128], index: 4, kind: output, shape index: {1}]   ;;  %s400_s5 = inlined_call_operand.vmem [shape: f32[8,128], index: 5, kind: output, shape index: {2}]  }
   0x1   :  { %v284_v0 = vld [vmem:[%s395_s1 + $0x40] sm:$0xff]   ;;  %v286_v2 = vld [vmem:[%s395_s1 + $0x48] sm:$0xff]   ;;  %v288_v4 = vld [vmem:[%s395_s1 + $0x50] sm:$0xff]  }
   0x2   :  { %v285_v1 = vld [vmem:[%s395_s1] sm:$0xff]   ;;  %261 = vmatprep.subr.bf16.mxu0 %v284_v0  ;;  %v287_v3 = vld [vmem:[%s395_s1 + $0x8] sm:$0xff]   ;;  %v289_v5 = vld [vmem:[%s395_s1 + $0x10] sm:$0xff]  }
   0x3   :  { %262 = vmatpush3.bf16.msra.mxu0 %v285_v1  ;;  %v290_v6 = vld [vmem:[%s395_s1 + $0x58] sm:$0xff]   ;;  %v292_v8 = vld [vmem:[%s395_s1 + $0x60] sm:$0xff]   ;;  %v294_v10 = vld [vmem:[%s395_s1 + $0x68] sm:$0xff]  }
   0x4   :  { %263 = vmatprep.subr.bf16.mxu0 %v286_v2  ;;  %v291_v7 = vld [vmem:[%s395_s1 + $0x18] sm:$0xff]   ;;  %v293_v9 = vld [vmem:[%s395_s1 + $0x20] sm:$0xff]   ;;  %v295_v13 = vld [vmem:[%s395_s1 + $0x28] sm:$0xff]  }
   0x5   :  { %v24_v11 = vld [vmem:[%s396_s0] sm:$0xff]  ;;  %v296_v14 = vld [vmem:[%s395_s1 + $0x70] sm:$0xff]   ;;  %v298_v16 = vld [vmem:[%s395_s1 + $0x78] sm:$0xff]  }
   0x6   :  { %v243_v12 = vcombine.high %v24_v11, %v24_v11  ;;  %v297_v15 = vld [vmem:[%s395_s1 + $0x30] sm:$0xff]   ;;  %v299_v17 = vld [vmem:[%s395_s1 + $0x38] sm:$0xff]   ;;  %v242_v18 = vcombine.low %v24_v11, %v24_v11  ;;  %v260_v23 = vld [vmem:[%s397_s2] ss:$0 sm:$0xff] }
   0x7   :  { %264 = vmatpush3.bf16.msra.mxu0 %v287_v3 }
   0x8   :  { %265 = vmatprep.subr.bf16.mxu0 %v288_v4  ;;  %192 = vmatprep.mubr.bf16.mxu0 %v243_v12 }
   0xb   :  { %266 = vmatpush3.bf16.msra.mxu0 %v289_v5 }
   0xc   :  { %267 = vmatprep.subr.bf16.mxu0 %v290_v6 }
   0xf   :  { %268 = vmatpush3.bf16.msra.mxu0 %v291_v7 }
  0x10   :  { %269 = vmatprep.subr.bf16.mxu0 %v292_v8 }
  0x13   :  { %270 = vmatpush3.bf16.msra.mxu0 %v293_v9 }
  0x14   :  { %271 = vmatprep.subr.bf16.mxu0 %v294_v10 }
  0x17   :  { %272 = vmatpush3.bf16.msra.mxu0 %v295_v13 }
  0x18   :  { %273 = vmatprep.subr.bf16.mxu0 %v296_v14 }
  0x1b   :  { %274 = vmatpush3.bf16.msra.mxu0 %v297_v15 }
  0x1c   :  { %275 = vmatprep.subr.bf16.mxu0 %v298_v16 }
  0x1f   :  { %276 = vmatpush3.bf16.msra.mxu0 %v299_v17 }
  0x22   :  { %193 = vmatmul.mubr.bf16.vlgmr.msra.gmra.mrb[0].mxu0 %v242_v18 }
  0xf5   :  { %v277_v19 = vpop.f32.mrb[0].mxu0 }
  0xf6   :  { %v278_v20 = vpop.f32.mrb[1].mxu0 }
  0xf7   :  { %v279_v21 = vadd.f32 %v278_v20, %v277_v19  ;;  %v280_v22 = vpop.f32.mrb[2].mxu0 }
  0xf8   :  { %v281_v24 = vpop.f32.mrb[3].mxu0 }
  0xf9   :  { %v213_v25 = vadd.f32 %v279_v21, %v260_v23 }
  0xfb   :  { %v214_v26 = vrot.slane %v213_v25, 4  ;;  %v220_v27 = vmul.f32 %v213_v25, %v213_v25  ;;  %229 = vst [vmem:[%s398_s3] sm:$0xff] %v213_v25 }
  0xfd   :  { %v215_v28 = vadd.f32 %v214_v26, %v213_v25  ;;  %v221_v29 = vrot.slane %v220_v27, 4 }
  0xff   :  { %v216_v30 = vrot.slane %v215_v28, 2  ;;  %v222_v31 = vadd.f32 %v221_v29, %v220_v27 }
 0x101   :  { %v217_v32 = vadd.f32 %v216_v30, %v215_v28  ;;  %v223_v33 = vrot.slane %v222_v31, 2 }
 0x103   :  { %v218_v34 = vrot.slane %v217_v32, 1  ;;  %v224_v35 = vadd.f32 %v223_v33, %v222_v31 }
 0x105   :  { %v219_v36 = vadd.f32 %v218_v34, %v217_v32  ;;  %v225_v37 = vrot.slane %v224_v35, 1 }
 0x107   :  { %v226_v38 = vadd.f32 %v225_v37, %v224_v35  ;;  %227 = vst [vmem:[%s399_s4] sm:$0xff] %v219_v36 }
 0x109   :  { %228 = vst [vmem:[%s400_s5] sm:$0xff] %v226_v38 }

// kernel: multiscale_forward.40
= control target key start
LH: loop header
LB: loop body
LE: loop exit
PB: predicated region body
PF: predicated region fallthrough
CT: control target
= control target key end

     0   :  { %s780_s1 = inlined_call_operand.vmem [shape: bf16[512,128], index: 1, kind: input, shape index: {}]   ;;  %s781_s0 = inlined_call_operand.vmem [shape: bf16[24,512], index: 0, kind: input, shape index: {}]   ;;  %s782_s2 = inlined_call_operand.vmem [shape: f32[1,128], index: 2, kind: input, shape index: {}]   ;;  %s783_s3 = inlined_call_operand.vmem [shape: f32[24,128], index: 3, kind: output, shape index: {0}]   ;;  %s784_s4 = inlined_call_operand.vmem [shape: f32[8,128], index: 4, kind: output, shape index: {1}]   ;;  %s785_s5 = inlined_call_operand.vmem [shape: f32[8,128], index: 5, kind: output, shape index: {2}]  }
   0x1   :  { %v576_v0 = vld [vmem:[%s780_s1 + $0x40] sm:$0xff]   ;;  %v580_v4 = vld [vmem:[%s780_s1 + $0x48] sm:$0xff]   ;;  %v584_v8 = vld [vmem:[%s780_s1 + $0x50] sm:$0xff]  }
   0x2   :  { %v577_v1 = vld [vmem:[%s780_s1 + $0xc0] sm:$0xff]   ;;  %519 = vmatprep.subr.bf16.mxu0 %v576_v0  ;;  %v581_v5 = vld [vmem:[%s780_s1 + $0xc8] sm:$0xff]   ;;  %v585_v9 = vld [vmem:[%s780_s1 + $0xd0] sm:$0xff]  }
   0x3   :  { %v578_v2 = vld [vmem:[%s780_s1] sm:$0xff]   ;;  %547 = vmatprep.subr.bf16.mxu1 %v577_v1  ;;  %v582_v6 = vld [vmem:[%s780_s1 + $0x8] sm:$0xff]   ;;  %v586_v10 = vld [vmem:[%s780_s1 + $0x10] sm:$0xff]  }
   0x4   :  { %v579_v3 = vld [vmem:[%s780_s1 + $0x80] sm:$0xff]   ;;  %520 = vmatpush3.bf16.msra.mxu0 %v578_v2  ;;  %v583_v7 = vld [vmem:[%s780_s1 + $0x88] sm:$0xff]   ;;  %v587_v11 = vld [vmem:[%s780_s1 + $0x90] sm:$0xff]  }
   0x5   :  { %548 = vmatpush3.bf16.msra.mxu1 %v579_v3  ;;  %521 = vmatprep.subr.bf16.mxu0 %v580_v4  ;;  %v588_v12 = vld [vmem:[%s780_s1 + $0x58] sm:$0xff]   ;;  %v592_v16 = vld [vmem:[%s780_s1 + $0x60] sm:$0xff]   ;;  %v596_v20 = vld [vmem:[%s780_s1 + $0x68] sm:$0xff]  }
   0x6   :  { %549 = vmatprep.subr.bf16.mxu1 %v581_v5  ;;  %v589_v13 = vld [vmem:[%s780_s1 + $0xd8] sm:$0xff]   ;;  %v593_v17 = vld [vmem:[%s780_s1 + $0xe0] sm:$0xff]   ;;  %v597_v21 = vld [vmem:[%s780_s1 + $0xe8] sm:$0xff]  }
   0x7   :  { %v590_v14 = vld [vmem:[%s780_s1 + $0x18] sm:$0xff]   ;;  %v594_v18 = vld [vmem:[%s780_s1 + $0x20] sm:$0xff]   ;;  %v598_v22 = vld [vmem:[%s780_s1 + $0x28] sm:$0xff]  }
   0x8   :  { %522 = vmatpush3.bf16.msra.mxu0 %v582_v6  ;;  %v591_v15 = vld [vmem:[%s780_s1 + $0x98] sm:$0xff]   ;;  %v595_v19 = vld [vmem:[%s780_s1 + $0xa0] sm:$0xff]   ;;  %v599_v23 = vld [vmem:[%s780_s1 + $0xa8] sm:$0xff]  }
   0x9   :  { %550 = vmatpush3.bf16.msra.mxu1 %v583_v7  ;;  %523 = vmatprep.subr.bf16.mxu0 %v584_v8  ;;  %v600_v24 = vld [vmem:[%s780_s1 + $0x70] sm:$0xff]   ;;  %v604_v28 = vld [vmem:[%s780_s1 + $0x78] sm:$0xff]   ;;  %v32_v36 = vld [vmem:[%s781_s0 + $0x20] sm:$0xff] }
   0xa   :  { %551 = vmatprep.subr.bf16.mxu1 %v585_v9  ;;  %v601_v25 = vld [vmem:[%s780_s1 + $0xf0] sm:$0xff]   ;;  %v605_v29 = vld [vmem:[%s780_s1 + $0xf8] sm:$0xff]   ;;  %v483_v37 = vcombine.high %v32_v36, %v32_v36  ;;  %v33_v38 = vld [vmem:[%s781_s0 + $0x28] sm:$0xff]  ;;  %v482_v40 = vcombine.low %v32_v36, %v32_v36 }
   0xb   :  { %v602_v26 = vld [vmem:[%s780_s1 + $0x30] sm:$0xff]   ;;  %v606_v30 = vld [vmem:[%s780_s1 + $0x38] sm:$0xff]   ;;  %v485_v39 = vcombine.high %v33_v38, %v33_v38  ;;  %v484_v41 = vcombine.low %v33_v38, %v33_v38  ;;  %v518_v55 = vld [vmem:[%s782_s2] ss:$0 sm:$0xff] }
   0xc   :  { %524 = vmatpush3.bf16.msra.mxu0 %v586_v10  ;;  %v603_v27 = vld [vmem:[%s780_s1 + $0xb0] sm:$0xff]   ;;  %v607_v31 = vld [vmem:[%s780_s1 + $0xb8] sm:$0xff]  }
   0xd   :  { %552 = vmatpush3.bf16.msra.mxu1 %v587_v11  ;;  %525 = vmatprep.subr.bf16.mxu0 %v588_v12  ;;  %v608_v32 = vld [vmem:[%s781_s0] ss:$16 sps:$4 sm:$0xff]   ;;  %v610_v33 = vld [vmem:[%s781_s0 + $0x4] ss:$16 sps:$4 sm:$0xff]   ;;  %v611_v34 = vld [vmem:[%s781_s0 + $0x8] ss:$16 sps:$4 sm:$0xff]  }
   0xe   :  { %553 = vmatprep.subr.bf16.mxu1 %v589_v13  ;;  %v613_v35 = vld [vmem:[%s781_s0 + $0xc] ss:$16 sps:$4 sm:$0xff]   ;;  %356 = vmatprep.mubr.bf16.mxu0 %v610_v33 }
   0xf   :  { %404 = vmatprep.mubr.bf16.mxu1 %v613_v35 }
  0x10   :  { %526 = vmatpush3.bf16.msra.mxu0 %v590_v14 }
  0x11   :  { %554 = vmatpush3.bf16.msra.mxu1 %v591_v15  ;;  %527 = vmatprep.subr.bf16.mxu0 %v592_v16 }
  0x12   :  { %555 = vmatprep.subr.bf16.mxu1 %v593_v17 }
  0x14   :  { %528 = vmatpush3.bf16.msra.mxu0 %v594_v18 }
  0x15   :  { %556 = vmatpush3.bf16.msra.mxu1 %v595_v19  ;;  %529 = vmatprep.subr.bf16.mxu0 %v596_v20 }
  0x16   :  { %557 = vmatprep.subr.bf16.mxu1 %v597_v21 }
  0x18   :  { %530 = vmatpush3.bf16.msra.mxu0 %v598_v22 }
  0x19   :  { %558 = vmatpush3.bf16.msra.mxu1 %v599_v23  ;;  %531 = vmatprep.subr.bf16.mxu0 %v600_v24 }
  0x1a   :  { %559 = vmatprep.subr.bf16.mxu1 %v601_v25 }
  0x1c   :  { %532 = vmatpush3.bf16.msra.mxu0 %v602_v26 }
  0x1d   :  { %560 = vmatpush3.bf16.msra.mxu1 %v603_v27  ;;  %533 = vmatprep.subr.bf16.mxu0 %v604_v28 }
  0x1e   :  { %561 = vmatprep.subr.bf16.mxu1 %v605_v29 }
  0x20   :  { %534 = vmatpush3.bf16.msra.mxu0 %v606_v30 }
  0x21   :  { %562 = vmatpush3.bf16.msra.mxu1 %v607_v31 }
  0x23   :  { %357 = vmatmul.mubr.bf16.vlgmr.msra.gmra.mrb[0].mxu0 %v608_v32 }
  0x24   :  { %405 = vmatmul.mubr.bf16.vlgmr.msra.gmra.mrb[0].mxu1 %v611_v34  ;;  %364 = vmatprep.mubr.bf16.mxu0 %v483_v37 }
  0x25   :  { %412 = vmatprep.mubr.bf16.mxu1 %v485_v39 }
  0x2b   :  { %365 = vmatmul.mubr.bf16.gmra.mrb[4].mxu0 %v482_v40 }
  0x2c   :  { %413 = vmatmul.mubr.bf16.gmra.mrb[4].mxu1 %v484_v41 }
  0xf6   :  { %v535_v42 = vpop.f32.mrb[0].mxu0 }
  0xf7   :  { %v563_v43 = vpop.f32.mrb[0].mxu1  ;;  %v536_v44 = vpop.f32.mrb[1].mxu0 }
  0xf8   :  { %v537_v45 = vadd.f32 %v536_v44, %v535_v42  ;;  %v564_v46 = vpop.f32.mrb[1].mxu1  ;;  %v538_v47 = vpop.f32.mrb[2].mxu0 }
  0xf9   :  { %v565_v48 = vadd.f32 %v564_v46, %v563_v43  ;;  %v566_v49 = vpop.f32.mrb[2].mxu1  ;;  %v539_v50 = vpop.f32.mrb[3].mxu0 }
  0xfa   :  { %v540_v51 = vadd.f32 %v539_v50, %v538_v47  ;;  %v567_v52 = vpop.f32.mrb[3].mxu1 }
  0xfb   :  { %v407_v53 = vadd.f32 %v565_v48, %v537_v45  ;;  %v568_v54 = vadd.f32 %v567_v52, %v566_v49 }
  0xfd   :  { %v410_v56 = vadd.f32 %v568_v54, %v540_v51  ;;  %v439_v58 = vadd.f32 %v518_v55, %v407_v53 }
  0xfe   :  { %v541_v57 = vpop.f32.mrb[4].mxu0 }
  0xff   :  { %v569_v59 = vpop.f32.mrb[4].mxu1  ;;  %v542_v60 = vpop.f32.mrb[5].mxu0  ;;  %463 = vst [vmem:[%s783_s3] sm:$0xff] %v439_v58  ;;  %v440_v0 = vadd.f32 %v518_v55, %v410_v56  ;;  %v450_v5 = vmul.f32 %v439_v58, %v439_v58 }
 0x100   :  { %v543_v61 = vadd.f32 %v542_v60, %v541_v57  ;;  %v570_v62 = vpop.f32.mrb[5].mxu1  ;;  %v544_v63 = vpop.f32.mrb[6].mxu0 }
 0x101   :  { %v571_v1 = vadd.f32 %v570_v62, %v569_v59  ;;  %v572_v2 = vpop.f32.mrb[6].mxu1  ;;  %v545_v3 = vpop.f32.mrb[7].mxu0  ;;  %v442_v6 = vadd.f32 %v440_v0, %v439_v58  ;;  %v451_v7 = vmul.f32 %v440_v0, %v440_v0  ;;  %464 = vst [vmem:[%s783_s3 + $0x8] sm:$0xff] %v440_v0 }
 0x102   :  { %v573_v4 = vpop.f32.mrb[7].mxu1 }
 0x103   :  { %v415_v8 = vadd.f32 %v571_v1, %v543_v61  ;;  %v453_v9 = vadd.f32 %v451_v7, %v450_v5 }
 0x105   :  { %v441_v10 = vadd.f32 %v518_v55, %v415_v8 }
 0x107   :  { %v443_v11 = vadd.f32 %v442_v6, %v441_v10  ;;  %v452_v12 = vmul.f32 %v441_v10, %v441_v10  ;;  %465 = vst [vmem:[%s783_s3 + $0x10] sm:$0xff] %v441_v10 }
 0x109   :  { %v444_v13 = vrot.slane %v443_v11, 4  ;;  %v454_v14 = vadd.f32 %v453_v9, %v452_v12 }
 0x10b   :  { %v445_v15 = vadd.f32 %v444_v13, %v443_v11  ;;  %v455_v16 = vrot.slane %v454_v14, 4 }
 0x10d   :  { %v446_v17 = vrot.slane %v445_v15, 2  ;;  %v456_v18 = vadd.f32 %v455_v16, %v454_v14 }
 0x10f   :  { %v447_v19 = vadd.f32 %v446_v17, %v445_v15  ;;  %v457_v20 = vrot.slane %v456_v18, 2 }
 0x111   :  { %v448_v21 = vrot.slane %v447_v19, 1  ;;  %v458_v22 = vadd.f32 %v457_v20, %v456_v18 }
 0x113   :  { %v449_v23 = vadd.f32 %v448_v21, %v447_v19  ;;  %v459_v24 = vrot.slane %v458_v22, 1 }
 0x115   :  { %v460_v25 = vadd.f32 %v459_v24, %v458_v22  ;;  %461 = vst [vmem:[%s784_s4] sm:$0xff] %v449_v23 }
 0x117   :  { %462 = vst [vmem:[%s785_s5] sm:$0xff] %v460_v25 }

// kernel: multiscale_forward.42
= control target key start
LH: loop header
LB: loop body
LE: loop exit
PB: predicated region body
PF: predicated region fallthrough
CT: control target
= control target key end

     0   :  { %11 = vsyncpa [#allocation4], 0  ;;  %s1477_s0 = inlined_call_operand.vmem [shape: bf16[32,1024], index: 0, kind: input, shape index: {}]   ;;  %s1478_s1 = inlined_call_operand.vmem [shape: bf16[1024,128], index: 1, kind: input, shape index: {}]   ;;  %s1479_s2 = inlined_call_operand.vmem [shape: f32[1,128], index: 2, kind: input, shape index: {}]   ;;  %s1480_s3 = inlined_call_operand.vmem [shape: f32[32,128], index: 3, kind: output, shape index: {0}]   ;;  %s1481_s4 = inlined_call_operand.hbm [shape: f32[8,128], index: 4, kind: output, shape index: {1}]   ;;  %s1482_s5 = inlined_call_operand.hbm [shape: f32[8,128], index: 5, kind: output, shape index: {2}]  }
   0x1   :  { %12 = vsyncpa [#allocation6], 0  ;;  %s1245_s18 = smov 0   ;;  %s1247_s19 = smov 0  }
   0x2   :  { %s1249_s20 = smov 0   ;;  %s1251_s21 = smov 0  }
   0x3   :  { %s1253_s22 = smov 0  }
   0x4 LB: > { %s893_s23 = sadd.s32 4294967295, %s1209_s22   ;;  %s27_s24 = sadd.s32 1, %s1205_s21  ;;  %s1209_s22 = sphi %s1253_s22, %s18_s22   ;;  %s1205_s21 = sphi %s1251_s21, %s1487_s21   ;;  %s1201_s20 = sphi %s1249_s20, %s1486_s20   ;;  %s1197_s19 = sphi %s1247_s19, %s1485_s19   ;;  %s1193_s18 = sphi %s1245_s18, %s1484_s18  }
   0x5   : > { %p28_p0 = scmp.ge.s32.totalorder %s27_s24, 2  ;;  %p46_p1 = scmp.ne.s32.totalorder %s1197_s19, %s1193_s18 }
   0x6   : > { %p47_p2 = scmp.eq.s32.totalorder %s1209_s22, 0  ;;  %s39_s26 = sadd.s32 1, %s1197_s19 }
   0x7   : > { %s1489_s24 = smov (%p28_p0, %s27_s24), 0  ;;  %p895_p5 = scmp.ge.s32.totalorder %s1209_s22, 2 }
   0x8   : > { %p48_p3 = por %p47_p2, %p46_p1  ;;  %s35_s25 = ssub.s32 %s1205_s21, %s1489_s24 }
   0x9   : > { %p37_p4 = scmp.eq.s32.totalorder %s35_s25, 0  ;;  %200 = sbr.rel (%p895_p5) target bundleno = 24 (0x18), region = 20 }
   0xb   : > { %s1281_s27 = scalar_select %p37_p4, %s1197_s19, %s39_s26  }
  0x10   : > { %203 = sbr.rel (!%p48_p3) target bundleno = 24 (0x18), region = 24  ;;  %s205_s28 = sand.u32 (%p48_p3), 1, %s1197_s19  }
  0x11   : > { %s954_s29 = sshll.u32 (%p48_p3), %s1205_s21, 4  ;;  %s896_s30 = sshll.u32 (%p48_p3), %s205_s28, 6 }
  0x12   : > { %s213_s8 = scalar_lea.vmem (%p48_p3), %s1477_s0, %s954_s29  ;;  %s207_s9 = scalar_lea.vmem (%p48_p3), [#allocation2], %s896_s30 }
  0x13   : > { %v226_v0 = vld [vmem:[%s213_s8] sm:$0xff] (%p48_p3)  ;;  %v228_v1 = vld [vmem:[%s213_s8 + $0x8] sm:$0xff] (%p48_p3) }
  0x14   : > { %v230_v2 = vld [vmem:[%s213_s8 + $0x20] sm:$0xff] (%p48_p3)  ;;  %227 = vst [vmem:[%s207_s9] sm:$0xff] (%p48_p3), %v226_v0  ;;  %229 = vst [vmem:[%s207_s9 + $0x8] sm:$0xff] (%p48_p3), %v228_v1  ;;  %v232_v3 = vld [vmem:[%s213_s8 + $0x28] sm:$0xff] (%p48_p3) }
  0x15   : > { %231 = vst [vmem:[%s207_s9 + $0x10] sm:$0xff] (%p48_p3), %v230_v2  ;;  %v234_v4 = vld [vmem:[%s213_s8 + $0x40] sm:$0xff] (%p48_p3)  ;;  %v236_v5 = vld [vmem:[%s213_s8 + $0x48] sm:$0xff] (%p48_p3)  ;;  %233 = vst [vmem:[%s207_s9 + $0x18] sm:$0xff] (%p48_p3), %v232_v3 }
  0x16   : > { %235 = vst [vmem:[%s207_s9 + $0x20] sm:$0xff] (%p48_p3), %v234_v4  ;;  %237 = vst [vmem:[%s207_s9 + $0x28] sm:$0xff] (%p48_p3), %v236_v5  ;;  %v238_v6 = vld [vmem:[%s213_s8 + $0x60] sm:$0xff] (%p48_p3)  ;;  %v240_v7 = vld [vmem:[%s213_s8 + $0x68] sm:$0xff] (%p48_p3) }
  0x17   : > { %239 = vst [vmem:[%s207_s9 + $0x30] sm:$0xff] %v238_v6  ;;  %241 = vst [vmem:[%s207_s9 + $0x38] sm:$0xff] %v240_v7 }
  0x18 PF: > { %p899_p6 = scmp.ge.s32.totalorder %s1209_s22, 1  ;;  %p255_p7 = scmp.lt.s32.totalorder %s1209_s22, 3 }
  0x1a   : > { %p256_p8 = pnand %p899_p6, %p255_p7 }
  0x1b   : > { %s262_s10 = sand.u32 (!%p256_p8), 1, %s1193_s18   ;;  %s901_s11 = sshll.u32 (!%p256_p8), %s1201_s20, 6 }
  0x1c   : > { %259 = sbr.rel (%p256_p8) target bundleno = 365 (0x16d), region = 51  ;;  %s900_s12 = sshll.u32 (!%p256_p8), %s262_s10, 6 }
  0x1d   : > { %p297_p9 = scmp.lt.s32.totalorder (!%p256_p8), %s901_s11, 127  ;;  %s1298_s17 = scalar_lea.vmem (!%p256_p8), [#allocation2], %s900_s12 }
  0x1e   : > { %p903_p10 = scmp.ne.s32.totalorder (!%p256_p8), %s1201_s20, 0 }
  0x23   : > { %s1491_s11 = smov (!%p297_p9, %s901_s11), 127  ;;  %312 = sbr.rel (%p903_p10) target bundleno = 42 (0x2a), region = 59 }
  0x24   : > { %s902_s13 = sshll.u32 %s1491_s11, 2  ;;  %v1211_v8 = vmov (!%p903_p10), 0.0  }
  0x25   : > { %s1296_s16 = scalar_lea.vmem %s1478_s1, %s902_s13  ;;  %313 = vst [vmem:[%s1480_s3] sm:$0xff] (!%p903_p10), %v1211_v8  ;;  %314 = vst [vmem:[%s1480_s3 + $0x8] sm:$0xff] (!%p903_p10), %v1211_v8 }
  0x26   : > { %315 = vst [vmem:[%s1480_s3 + $0x10] sm:$0xff] (!%p903_p10), %v1211_v8  ;;  %316 = vst [vmem:[%s1480_s3 + $0x18] sm:$0xff] (!%p903_p10), %v1211_v8 }
  0x2a PF: > { %v1067_v9 = vld [vmem:[%s1296_s16 + $0x40] sm:$0xff]   ;;  %v1071_v13 = vld [vmem:[%s1296_s16 + $0x48] sm:$0xff]   ;;  %v1075_v17 = vld [vmem:[%s1296_s16 + $0x50] sm:$0xff]   ;;  %p944_p11 = scmp.ne.s32.totalorder %s1201_s20, 1 }
  0x2b   : > { %v1068_v10 = vld [vmem:[%s1296_s16 + $0xc0] sm:$0xff]   ;;  %955 = vmatprep.subr.bf16.mxu0 %v1067_v9  ;;  %v1072_v14 = vld [vmem:[%s1296_s16 + $0xc8] sm:$0xff]   ;;  %v1076_v18 = vld [vmem:[%s1296_s16 + $0xd0] sm:$0xff]  }
  0x2c   : > { %v1069_v11 = vld [vmem:[%s1296_s16] sm:$0xff]   ;;  %983 = vmatprep.subr.bf16.mxu1 %v1068_v10  ;;  %v1073_v15 = vld [vmem:[%s1296_s16 + $0x8] sm:$0xff]   ;;  %v1077_v19 = vld [vmem:[%s1296_s16 + $0x10] sm:$0xff]  }
  0x2d   : > { %v1070_v12 = vld [vmem:[%s1296_s16 + $0x80] sm:$0xff]   ;;  %956 = vmatpush3.bf16.msra.mxu0 %v1069_v11  ;;  %v1074_v16 = vld [vmem:[%s1296_s16 + $0x88] sm:$0xff]   ;;  %v1078_v20 = vld [vmem:[%s1296_s16 + $0x90] sm:$0xff]  }
  0x2e   : > { %984 = vmatpush3.bf16.msra.mxu1 %v1070_v12  ;;  %957 = vmatprep.subr.bf16.mxu0 %v1071_v13  ;;  %v1079_v21 = vld [vmem:[%s1296_s16 + $0x58] sm:$0xff]   ;;  %v1083_v25 = vld [vmem:[%s1296_s16 + $0x60] sm:$0xff]   ;;  %v1087_v29 = vld [vmem:[%s1296_s16 + $0x68] sm:$0xff]  }
  0x2f   : > { %985 = vmatprep.subr.bf16.mxu1 %v1072_v14  ;;  %v1080_v22 = vld [vmem:[%s1296_s16 + $0xd8] sm:$0xff]   ;;  %v1084_v26 = vld [vmem:[%s1296_s16 + $0xe0] sm:$0xff]   ;;  %v1088_v30 = vld [vmem:[%s1296_s16 + $0xe8] sm:$0xff]  }
  0x30   : > { %v1081_v23 = vld [vmem:[%s1296_s16 + $0x18] sm:$0xff]   ;;  %v1085_v27 = vld [vmem:[%s1296_s16 + $0x20] sm:$0xff]   ;;  %v1089_v31 = vld [vmem:[%s1296_s16 + $0x28] sm:$0xff]  }
  0x31   : > { %958 = vmatpush3.bf16.msra.mxu0 %v1073_v15  ;;  %v1082_v24 = vld [vmem:[%s1296_s16 + $0x98] sm:$0xff]   ;;  %v1086_v28 = vld [vmem:[%s1296_s16 + $0xa0] sm:$0xff]   ;;  %v1090_v32 = vld [vmem:[%s1296_s16 + $0xa8] sm:$0xff]  }
  0x32   : > { %986 = vmatpush3.bf16.msra.mxu1 %v1074_v16  ;;  %959 = vmatprep.subr.bf16.mxu0 %v1075_v17  ;;  %v1091_v33 = vld [vmem:[%s1296_s16 + $0x70] sm:$0xff]   ;;  %v1095_v37 = vld [vmem:[%s1296_s16 + $0x78] sm:$0xff]   ;;  %v317_v58 = vld [vmem:[%s1480_s3] sm:$0xff] }
  0x33   : > { %987 = vmatprep.subr.bf16.mxu1 %v1076_v18  ;;  %v1092_v34 = vld [vmem:[%s1296_s16 + $0xf0] sm:$0xff]   ;;  %v1096_v38 = vld [vmem:[%s1296_s16 + $0xf8] sm:$0xff]   ;;  %v318_v63 = vld [vmem:[%s1480_s3 + $0x8] sm:$0xff] }
  0x34   : > { %v1093_v35 = vld [vmem:[%s1296_s16 + $0x30] sm:$0xff]   ;;  %v1097_v39 = vld [vmem:[%s1296_s16 + $0x38] sm:$0xff]  }
  0x35   : > { %960 = vmatpush3.bf16.msra.mxu0 %v1077_v19  ;;  %v1094_v36 = vld [vmem:[%s1296_s16 + $0xb0] sm:$0xff]   ;;  %v1098_v40 = vld [vmem:[%s1296_s16 + $0xb8] sm:$0xff]  }
  0x36   : > { %988 = vmatpush3.bf16.msra.mxu1 %v1078_v20  ;;  %961 = vmatprep.subr.bf16.mxu0 %v1079_v21  ;;  %v1099_v41 = vld [vmem:[%s1298_s17] ss:$16 sps:$4 sm:$0xff]   ;;  %v1101_v42 = vld [vmem:[%s1298_s17 + $0x4] ss:$16 sps:$4 sm:$0xff]   ;;  %v1102_v43 = vld [vmem:[%s1298_s17 + $0x8] ss:$16 sps:$4 sm:$0xff]  }
  0x37   : > { %989 = vmatprep.subr.bf16.mxu1 %v1080_v22  ;;  %v1104_v44 = vld [vmem:[%s1298_s17 + $0xc] ss:$16 sps:$4 sm:$0xff]   ;;  %657 = vmatprep.mubr.bf16.mxu0 %v1101_v42  ;;  %v1105_v45 = vld [vmem:[%s1298_s17 + $0x24] ss:$16 sps:$4 sm:$0xff]   ;;  %v1109_v47 = vld [vmem:[%s1298_s17 + $0x20] ss:$16 sps:$4 sm:$0xff]  }
  0x38   : > { %706 = vmatprep.mubr.bf16.mxu1 %v1104_v44  ;;  %v1107_v46 = vld [vmem:[%s1298_s17 + $0x2c] ss:$16 sps:$4 sm:$0xff]   ;;  %v1110_v48 = vld [vmem:[%s1298_s17 + $0x28] ss:$16 sps:$4 sm:$0xff]   ;;  %v319_v12 = vld [vmem:[%s1480_s3 + $0x10] sm:$0xff] }
  0x39   : > { %962 = vmatpush3.bf16.msra.mxu0 %v1081_v23  ;;  %v320_v17 = vld [vmem:[%s1480_s3 + $0x18] sm:$0xff]  ;;  %v945_v22 = vld [vmem:[%s1479_s2] ss:$0 sm:$0xff] (!%p944_p11) }
  0x3a   : > { %990 = vmatpush3.bf16.msra.mxu1 %v1082_v24  ;;  %963 = vmatprep.subr.bf16.mxu0 %v1083_v25  ;;  %v1212_v24 = vmov (!%p944_p11), 0.0  }
  0x3b   : > { %991 = vmatprep.subr.bf16.mxu1 %v1084_v26  ;;  %750 = vst [vmem:[#allocation3] sm:$0xff] (!%p944_p11), %v1212_v24  ;;  %751 = vst [vmem:[#allocation5] sm:$0xff] (!%p944_p11), %v1212_v24 }
  0x3d   : > { %964 = vmatpush3.bf16.msra.mxu0 %v1085_v27 }
  0x3e   : > { %992 = vmatpush3.bf16.msra.mxu1 %v1086_v28  ;;  %965 = vmatprep.subr.bf16.mxu0 %v1087_v29 }
  0x3f   : > { %993 = vmatprep.subr.bf16.mxu1 %v1088_v30 }
  0x41   : > { %966 = vmatpush3.bf16.msra.mxu0 %v1089_v31 }
  0x42   : > { %994 = vmatpush3.bf16.msra.mxu1 %v1090_v32  ;;  %967 = vmatprep.subr.bf16.mxu0 %v1091_v33 }
  0x43   : > { %995 = vmatprep.subr.bf16.mxu1 %v1092_v34 }
  0x45   : > { %968 = vmatpush3.bf16.msra.mxu0 %v1093_v35 }
  0x46   : > { %996 = vmatpush3.bf16.msra.mxu1 %v1094_v36  ;;  %969 = vmatprep.subr.bf16.mxu0 %v1095_v37 }
  0x47   : > { %997 = vmatprep.subr.bf16.mxu1 %v1096_v38 }
  0x49   : > { %970 = vmatpush3.bf16.msra.mxu0 %v1097_v39 }
  0x4a   : > { %998 = vmatpush3.bf16.msra.mxu1 %v1098_v40 }
  0x4c   : > { %658 = vmatmul.mubr.bf16.vlgmr.msra.gmra.mrb[0].mxu0 %v1099_v41 }
  0x4d   : > { %707 = vmatmul.mubr.bf16.vlgmr.msra.gmra.mrb[0].mxu1 %v1102_v43  ;;  %665 = vmatprep.mubr.bf16.mxu0 %v1105_v45 }
  0x4e   : > { %714 = vmatprep.mubr.bf16.mxu1 %v1107_v46 }
  0x54   : > { %666 = vmatmul.mubr.bf16.gmra.mrb[4].mxu0 %v1109_v47 }
  0x55   : > { %715 = vmatmul.mubr.bf16.gmra.mrb[4].mxu1 %v1110_v48 }
 0x11f   : > { %v971_v49 = vpop.f32.mrb[0].mxu0 }
 0x120   : > { %v999_v50 = vpop.f32.mrb[0].mxu1  ;;  %v972_v51 = vpop.f32.mrb[1].mxu0 }
 0x121   : > { %v973_v52 = vadd.f32 %v972_v51, %v971_v49  ;;  %v1000_v53 = vpop.f32.mrb[1].mxu1  ;;  %v974_v54 = vpop.f32.mrb[2].mxu0 }
 0x122   : > { %v1001_v55 = vadd.f32 %v1000_v53, %v999_v50  ;;  %v1002_v56 = vpop.f32.mrb[2].mxu1  ;;  %v975_v57 = vpop.f32.mrb[3].mxu0 }
 0x123   : > { %v976_v59 = vadd.f32 %v975_v57, %v974_v54  ;;  %v1003_v60 = vpop.f32.mrb[3].mxu1 }
 0x124   : > { %v709_v61 = vadd.f32 %v1001_v55, %v973_v52  ;;  %v1004_v62 = vadd.f32 %v1003_v60, %v1002_v56 }
 0x126   : > { %v723_v0 = vadd.f32 %v709_v61, %v317_v58  ;;  %v712_v1 = vadd.f32 %v1004_v62, %v976_v59 }
 0x127   : > { %v977_v2 = vpop.f32.mrb[4].mxu0 }
 0x128   : > { %727 = vst [vmem:[%s1480_s3] sm:$0xff] %v723_v0  ;;  %v724_v3 = vadd.f32 %v712_v1, %v318_v63  ;;  %v1005_v4 = vpop.f32.mrb[4].mxu1  ;;  %v978_v5 = vpop.f32.mrb[5].mxu0 }
 0x129   : > { %v979_v6 = vadd.f32 %v978_v5, %v977_v2  ;;  %v1006_v7 = vpop.f32.mrb[5].mxu1  ;;  %v980_v8 = vpop.f32.mrb[6].mxu0 }
 0x12a   : > { %728 = vst [vmem:[%s1480_s3 + $0x8] sm:$0xff] %v724_v3  ;;  %v1007_v9 = vadd.f32 %v1006_v7, %v1005_v4  ;;  %v1008_v10 = vpop.f32.mrb[6].mxu1  ;;  %v981_v11 = vpop.f32.mrb[7].mxu0 }
 0x12b   : > { %v982_v13 = vadd.f32 %v981_v11, %v980_v8  ;;  %v1009_v14 = vpop.f32.mrb[7].mxu1 }
 0x12c   : > { %v717_v15 = vadd.f32 %v1007_v9, %v979_v6  ;;  %v1010_v16 = vadd.f32 %v1009_v14, %v1008_v10  ;;  %734 = sbr.rel (%p944_p11) target bundleno = 317 (0x13d), region = 63 }
 0x12e   : > { %v725_v18 = vadd.f32 %v717_v15, %v319_v12  ;;  %v720_v19 = vadd.f32 %v1010_v16, %v982_v13 }
 0x12f   : > { %v735_v21 = vld [vmem:[%s1480_s3] sm:$0xff] (!%p944_p11) }
 0x130   : > { %729 = vst [vmem:[%s1480_s3 + $0x10] sm:$0xff] %v725_v18  ;;  %v726_v20 = vadd.f32 %v720_v19, %v320_v17  ;;  %v746_v25 = vadd.f32 (!%p944_p11), %v945_v22, %v735_v21 }
 0x131   : > { %v736_v23 = vld [vmem:[%s1480_s3 + $0x8] sm:$0xff] (!%p944_p11) }
 0x132   : > { %730 = vst [vmem:[%s1480_s3 + $0x18] sm:$0xff] %v726_v20  ;;  %v747_v26 = vadd.f32 (!%p944_p11), %v945_v22, %v736_v23  ;;  %752 = vst [vmem:[%s1480_s3] sm:$0xff] (!%p944_p11), %v746_v25 }
 0x134   : > { %753 = vst [vmem:[%s1480_s3 + $0x8] sm:$0xff] %v747_v26 }
 0x137   : > { %v737_v27 = vld [vmem:[%s1480_s3 + $0x10] sm:$0xff] }
 0x138   : > { %v748_v29 = vadd.f32 %v945_v22, %v737_v27 }
 0x139   : > { %v738_v28 = vld [vmem:[%s1480_s3 + $0x18] sm:$0xff] }
 0x13a   : > { %v749_v30 = vadd.f32 %v945_v22, %v738_v28  ;;  %754 = vst [vmem:[%s1480_s3 + $0x10] sm:$0xff] %v748_v29 }
 0x13c   : > { %755 = vst [vmem:[%s1480_s3 + $0x18] sm:$0xff] %v749_v30 }
 0x13d PF: > { %p1407_p12 = scmp.eq.s32.totalorder %s893_s23, 1  ;;  %s1213_s6 = smov [#allocation3]  }
 0x13e   : > { %s774_s7 = sshll.u32 %s1213_s6, 4  ;;  %s1214_s8 = smov [#allocation5]   ;;  %s775_s7 = int_to_ptr.vmem [resolvable:$true] %s774_s7 }
 0x13f   : > { %s787_s9 = sshll.u32 %s1214_s8, 4  ;;  %s1111_s10 = scalar_lea.vmem %s775_s7, 128  ;;  %s1411_s9 = int_to_ptr.vmem [resolvable:$true] %s787_s9 }
 0x140   : > { %p1112_p13 = scmp.ne.s32.totalorder %s775_s7, %s1111_s10  ;;  %p1118_p2 = scmp.lt.s32.totalorder %s775_s7, %s775_s7 }
 0x141   : > { %p1119_p3 = scmp.lt.s32.totalorder %s1111_s10, %s1111_s10 }
 0x142   : > { %p1113_p0 = pnand %p1112_p13, %p1407_p12 }
 0x143   : > { %p1120_p4 = por %p1119_p3, %p1118_p2 }
 0x144   : > { %p1114_p1 = pneg %p1113_p0 }
 0x146   : > { %p1121_p5 = pnand %p1120_p4, %p1114_p1 }
 0x148   : > { %1124 = shalt.err (!%p1121_p5)
}
 0x149   : > { %s1125_s12 = scalar_lea.hbm %s1481_s4, 128 }
 0x14a   : > { %p1126_p6 = scmp.ne.s32.totalorder %s1481_s4, %s1125_s12  ;;  %p1131_p9 = scmp.lt.u32.totalorder %s1125_s12, %s1481_s4 }
 0x14c   : > { %p1127_p7 = pnand %p1126_p6, %p1407_p12 }
 0x14e   : > { %p1128_p8 = pneg %p1127_p7 }
 0x150   : > { %p1133_p10 = pnand %p1131_p9, %p1128_p8 }
 0x152   : > { %1136 = shalt.err (!%p1133_p10)
}
 0x153   : > { %1012 = dma.vmem_to_hbm [thread:$0]  (%p1407_p12), %s775_s7, 128, %s1481_s4, [#allocation4]  }
 0x154   : > { %s1137_s25 = scalar_lea.vmem %s1411_s9, 128  ;;  %p1144_p1 = scmp.lt.s32.totalorder %s1411_s9, %s1411_s9 }
 0x155   : > { %p1138_p11 = scmp.ne.s32.totalorder %s1411_s9, %s1137_s25  ;;  %p1145_p2 = scmp.lt.s32.totalorder %s1137_s25, %s1137_s25 }
 0x157   : > { %p1139_p13 = pnand %p1138_p11, %p1407_p12  ;;  %p1146_p3 = por %p1145_p2, %p1144_p1 }
 0x159   : > { %p1140_p0 = pneg %p1139_p13 }
 0x15b   : > { %p1147_p4 = pnand %p1146_p3, %p1140_p0 }
 0x15d   : > { %1150 = shalt.err (!%p1147_p4)
}
 0x15e   : > { %s1151_s28 = scalar_lea.hbm %s1482_s5, 128 }
 0x15f   : > { %p1152_p5 = scmp.ne.s32.totalorder %s1482_s5, %s1151_s28  ;;  %p1157_p8 = scmp.lt.u32.totalorder %s1151_s28, %s1482_s5 }
 0x161   : > { %p1153_p6 = pnand %p1152_p5, %p1407_p12 }
 0x163   : > { %p1154_p7 = pneg %p1153_p6 }
 0x165   : > { %p1159_p9 = pnand %p1157_p8, %p1154_p7 }
 0x167   : > { %1162 = shalt.err (!%p1159_p9)
}
 0x168   : > { %1014 = dma.vmem_to_hbm [thread:$0]  (%p1407_p12), %s1411_s9, 128, %s1482_s5, [#allocation6]  }
 0x169   : > { %1184 = dma.done.wait (%p1407_p12), [#allocation4], 128  }
 0x16a   : > { %1186 = vsyncadd (%p1407_p12), [#allocation4], 4294967168 }
 0x16b   : > { %1188 = dma.done.wait (%p1407_p12), [#allocation6], 128  }
 0x16c   : > { %1190 = vsyncadd (%p1407_p12), [#allocation6], 4294967168 }
 0x16d PF: > { %s18_s22 = sadd.s32 1, %s1209_s22   ;;  %s1484_s18 = smov %s1197_s19 }
 0x16e   : > { %p15_p10 = scmp.ge.s32.totalorder %s18_s22, 4   ;;  %s1485_s19 = smov %s1281_s27 }
 0x16f   : > { %s1486_s20 = smov %s1205_s21  ;;  %s1487_s21 = smov %s1489_s24 }
 0x170   :  { %17 = sbr.rel (!%p15_p10) target bundleno = 4 (0x4), region = 120 }
 0x177   :  { %812 = vsyncpa [#allocation4], 1 }
 0x178   :  { %814 = vsyncpa [#allocation4 + $0x1], 1 }
 0x179   :  { %815 = vsyncpa [#allocation6], 1 }

// kernel: div.23
= control target key start
LH: loop header
LB: loop body
LE: loop exit
PB: predicated region body
PF: predicated region fallthrough
CT: control target
= control target key end

     0   :  { %s20_s0 = inlined_call_operand.<no memory space> [shape: f32[], index: 0, kind: input, shape index: {}]   ;;  %s21_s1 = inlined_call_operand.vmem [shape: f32[8,8], index: 1, kind: output, shape index: {}]  }
   0x1   :  { %v2_v0 = vstv %s20_s0 }
   0x2   :  { %3 = vst [vmem:[%s21_s1] sm:$0xff] %v2_v0 }

// kernel: multiscale_forward.43
= control target key start
LH: loop header
LB: loop body
LE: loop exit
PB: predicated region body
PF: predicated region fallthrough
CT: control target
= control target key end

     0   :  { %s979_s13 = smov 0   ;;  %s981_s14 = smov 0   ;;  %s1051_s0 = inlined_call_operand.vmem [shape: f32[8,8,4], index: 0, kind: input, shape index: {}]   ;;  %s1052_s1 = inlined_call_operand.vmem [shape: f32[8,8,4], index: 1, kind: input, shape index: {}]   ;;  %s1053_s2 = inlined_call_operand.vmem [shape: f32[8,8,4], index: 2, kind: input, shape index: {}]   ;;  %s1054_s3 = inlined_call_operand.vmem [shape: f32[8,8,4], index: 3, kind: input, shape index: {}]   ;;  %s1055_s4 = inlined_call_operand.vmem [shape: f32[8,8,4], index: 4, kind: input, shape index: {}]   ;;  %s1056_s5 = inlined_call_operand.vmem [shape: f32[8,8,4], index: 5, kind: input, shape index: {}]   ;;  %s1057_s6 = inlined_call_operand.vmem [shape: f32[8,8,4], index: 6, kind: input, shape index: {}]   ;;  %s1058_s7 = inlined_call_operand.vmem [shape: f32[8,8,4], index: 7, kind: input, shape index: {}]   ;;  %s1059_s8 = inlined_call_operand.vmem [shape: f32[8,8,4], index: 8, kind: input, shape index: {}]   ;;  %s1060_s9 = inlined_call_operand.vmem [shape: f32[8,4], index: 9, kind: input, shape index: {}]   ;;  %s1061_s10 = inlined_call_operand.vmem [shape: f32[8,8,4], index: 10, kind: output, shape index: {}]  }
   0x1   :  { %s983_s15 = smov 0  }
   0x2 LB: > { %s32_s16 = sadd.s32 1, %s918_s14  ;;  %p863_p0 = scmp.ge.s32.totalorder %s922_s15, 1  ;;  %s922_s15 = sphi %s983_s15, %s20_s15   ;;  %s918_s14 = sphi %s981_s14, %s1063_s14   ;;  %s914_s13 = sphi %s979_s13, %s1062_s13  }
   0x3   : > { %p34_p1 = scmp.ge.s32.totalorder %s32_s16, 8  ;;  %p451_p2 = scmp.lt.s32.totalorder %s922_s15, 9 }
   0x5   : > { %s1065_s16 = smov (%p34_p1, %s32_s16), 0  ;;  %p452_p3 = pnand %p863_p0, %p451_p2 }
   0x6   : > { %p553_p4 = scmp.lt.s32.totalorder (!%p452_p3), %s914_s13, 7  ;;  %v644_v16 = vld [vmem:[%s1060_s9] sm:$0xff] (!%p452_p3)  ;;  %vm646_vm0 = vcmask (!%p452_p3), 31744  }
   0x7   : > { %455 = sbr.rel (%p452_p3) target bundleno = 38 (0x26), region = 60 }
   0xe   : > { %s1067_s13 = smov (!%p553_p4, %s914_s13), 7 }
   0xf   : > { %s997_s17 = sshll.u32 %s1067_s13, 3 }
  0x10   : > { %s559_s20 = scalar_lea.vmem %s1051_s0, %s997_s17  ;;  %s566_s23 = scalar_lea.vmem %s1052_s1, %s997_s17 }
  0x11   : > { %s573_s26 = scalar_lea.vmem %s1053_s2, %s997_s17  ;;  %s580_s29 = scalar_lea.vmem %s1054_s3, %s997_s17  ;;  %v627_v0 = vld [vmem:[%s559_s20] sm:$0xff] }
  0x12   : > { %v628_v1 = vld [vmem:[%s566_s23] sm:$0xff]  ;;  %s587_s12 = scalar_lea.vmem %s1055_s4, %s997_s17  ;;  %s594_s19 = scalar_lea.vmem %s1056_s5, %s997_s17 }
  0x13   : > { %v629_v2 = vadd.f32 %v628_v1, %v627_v0  ;;  %v630_v3 = vld [vmem:[%s573_s26] sm:$0xff]  ;;  %s601_s24 = scalar_lea.vmem %s1057_s6, %s997_s17  ;;  %s608_s25 = scalar_lea.vmem %s1058_s7, %s997_s17 }
  0x14   : > { %v632_v4 = vld [vmem:[%s580_s29] sm:$0xff]  ;;  %s615_s28 = scalar_lea.vmem %s1059_s8, %s997_s17  ;;  %s626_s13 = scalar_lea.vmem %s1061_s10, %s997_s17 }
  0x15   : > { %v631_v5 = vadd.f32 %v630_v3, %v629_v2  ;;  %v634_v6 = vld [vmem:[%s587_s12] sm:$0xff] }
  0x16   : > { %v636_v8 = vld [vmem:[%s594_s19] sm:$0xff] }
  0x17   : > { %v633_v7 = vadd.f32 %v632_v4, %v631_v5  ;;  %v638_v10 = vld [vmem:[%s601_s24] sm:$0xff] }
  0x18   : > { %v640_v12 = vld [vmem:[%s608_s25] sm:$0xff] }
  0x19   : > { %v635_v9 = vadd.f32 %v634_v6, %v633_v7  ;;  %v642_v14 = vld [vmem:[%s615_s28] sm:$0xff] }
  0x1b   : > { %v637_v11 = vadd.f32 %v636_v8, %v635_v9 }
  0x1d   : > { %v639_v13 = vadd.f32 %v638_v10, %v637_v11 }
  0x1f   : > { %v641_v15 = vadd.f32 %v640_v12, %v639_v13 }
  0x21   : > { %v643_v17 = vadd.f32 %v642_v14, %v641_v15 }
  0x23   : > { %v645_v18 = vmul.f32 %v644_v16, %v643_v17 }
  0x25   : > { %647 = vst.msk [vmem:[%s626_s13] sm:$0xff] %vm646_vm0, %v645_v18 }
  0x26 PF: > { %s20_s15 = sadd.s32 1, %s922_s15   ;;  %s1062_s13 = smov %s918_s14 }
  0x27   : > { %p17_p5 = scmp.ge.s32.totalorder %s20_s15, 10   ;;  %s1063_s14 = smov %s1065_s16 }
  0x29   :  { %19 = sbr.rel (!%p17_p5) target bundleno = 2 (0x2), region = 117 }

// kernel: multiscale_forward.44
= control target key start
LH: loop header
LB: loop body
LE: loop exit
PB: predicated region body
PF: predicated region fallthrough
CT: control target
= control target key end

     0   :  { %11 = vsyncpa [#allocation3], 0  ;;  %v325_v2 = vmov 0.0   ;;  %s424_s0 = inlined_call_operand.vmem [shape: bf16[24,128], index: 0, kind: input, shape index: {}]   ;;  %s425_s1 = inlined_call_operand.vmem [shape: bf16[128,128], index: 1, kind: input, shape index: {}]   ;;  %s426_s2 = inlined_call_operand.vmem [shape: f32[1,128], index: 2, kind: input, shape index: {}]   ;;  %s427_s3 = inlined_call_operand.vmem [shape: f32[24,128], index: 3, kind: output, shape index: {0}]   ;;  %s428_s4 = inlined_call_operand.hbm [shape: f32[8,128], index: 4, kind: output, shape index: {1}]   ;;  %s429_s5 = inlined_call_operand.hbm [shape: f32[8,128], index: 5, kind: output, shape index: {2}]  }
   0x1   :  { %v267_v0 = vld [vmem:[%s425_s1] sm:$0xff]   ;;  %v268_v1 = vld [vmem:[%s425_s1 + $0x8] sm:$0xff]   ;;  %177 = vst [vmem:[#allocation2] sm:$0xff] %v325_v2  ;;  %178 = vst [vmem:[#allocation4] sm:$0xff] %v325_v2 }
   0x2   :  { %244 = vmatprep.subr.bf16.mxu0 %v267_v0  ;;  %v269_v3 = vld [vmem:[%s425_s1 + $0x10] sm:$0xff]   ;;  %v270_v4 = vld [vmem:[%s425_s1 + $0x18] sm:$0xff]   ;;  %v275_v5 = vld [vmem:[%s424_s0] sm:$0xff]  }
   0x3   :  { %245 = vmatpush3.bf16.msra.mxu0 %v267_v0 }
   0x4   :  { %246 = vmatprep.subr.bf16.mxu0 %v268_v1 }
   0x7   :  { %247 = vmatpush3.bf16.msra.mxu0 %v268_v1 }
   0x8   :  { %248 = vmatprep.subr.bf16.mxu0 %v269_v3 }
   0x9   :  { %12 = vsyncpa [#allocation5], 0  ;;  %260 = vmatprep.mubr.bf16.mxu0 %v275_v5  ;;  %v271_v6 = vld [vmem:[%s425_s1 + $0x20] sm:$0xff]   ;;  %v272_v7 = vld [vmem:[%s425_s1 + $0x28] sm:$0xff]   ;;  %s326_s13 = smov [#allocation2]   ;;  %s327_s15 = smov [#allocation4]  }
   0xa   :  { %v273_v8 = vld [vmem:[%s425_s1 + $0x30] sm:$0xff]   ;;  %v274_v9 = vld [vmem:[%s425_s1 + $0x38] sm:$0xff]   ;;  %v276_v10 = vld [vmem:[%s424_s0 + $0x8] ss:$0 sps:$4 sm:$0xff]   ;;  %s199_s14 = sshll.u32 %s326_s13, 4  ;;  %s209_s16 = sshll.u32 %s327_s15, 4  ;;  %s200_s14 = int_to_ptr.vmem [resolvable:$true] %s199_s14  ;;  %s210_s16 = int_to_ptr.vmem [resolvable:$true] %s209_s16 }
   0xb   :  { %249 = vmatpush3.bf16.msra.mxu0 %v269_v3  ;;  %s277_s17 = scalar_lea.vmem %s200_s14, 128  ;;  %p282_p1 = scmp.lt.s32.totalorder %s200_s14, %s200_s14 }
   0xc   :  { %250 = vmatprep.subr.bf16.mxu0 %v270_v4  ;;  %p278_p0 = scmp.ne.s32.totalorder %s200_s14, %s277_s17  ;;  %p283_p2 = scmp.lt.s32.totalorder %s277_s17, %s277_s17 }
   0xe   :  { %p284_p3 = por %p283_p2, %p282_p1 }
   0xf   :  { %251 = vmatpush3.bf16.msra.mxu0 %v270_v4 }
  0x10   :  { %252 = vmatprep.subr.bf16.mxu0 %v271_v6  ;;  %p285_p4 = pnand %p284_p3, %p278_p0 }
  0x13   :  { %253 = vmatpush3.bf16.msra.mxu0 %v271_v6 }
  0x14   :  { %254 = vmatprep.subr.bf16.mxu0 %v272_v7 }
  0x17   :  { %255 = vmatpush3.bf16.msra.mxu0 %v272_v7 }
  0x18   :  { %256 = vmatprep.subr.bf16.mxu0 %v273_v8 }
  0x1b   :  { %257 = vmatpush3.bf16.msra.mxu0 %v273_v8 }
  0x1c   :  { %258 = vmatprep.subr.bf16.mxu0 %v274_v9 }
  0x1f   :  { %259 = vmatpush3.bf16.msra.mxu0 %v274_v9 }
  0x22   :  { %261 = vmatmul.mubr.bf16.vlgmr.msra.gmra.mrb[0].mxu0 %v276_v10 }
  0x23   :  { %288 = shalt.err (!%p285_p4)
}
  0x24   :  { %s289_s19 = scalar_lea.hbm %s428_s4, 128 }
  0x25   :  { %p290_p5 = scmp.ne.s32.totalorder %s428_s4, %s289_s19  ;;  %p293_p6 = scmp.lt.u32.totalorder %s289_s19, %s428_s4 }
  0x27   :  { %p295_p7 = pnand %p293_p6, %p290_p5 }
  0x29   :  { %298 = shalt.err (!%p295_p7)
}
  0x2a   :  { %202 = dma.vmem_to_hbm [thread:$0]  %s200_s14, 128, %s428_s4, [#allocation3]  }
  0x2b   :  { %s299_s25 = scalar_lea.vmem %s210_s16, 128  ;;  %p304_p9 = scmp.lt.s32.totalorder %s210_s16, %s210_s16 }
  0x2c   :  { %p300_p8 = scmp.ne.s32.totalorder %s210_s16, %s299_s25  ;;  %p305_p10 = scmp.lt.s32.totalorder %s299_s25, %s299_s25 }
  0x2e   :  { %p306_p11 = por %p305_p10, %p304_p9 }
  0x30   :  { %p307_p12 = pnand %p306_p11, %p300_p8 }
  0x32   :  { %310 = shalt.err (!%p307_p12)
}
  0x33   :  { %s311_s28 = scalar_lea.hbm %s429_s5, 128 }
  0x34   :  { %p312_p13 = scmp.ne.s32.totalorder %s429_s5, %s311_s28  ;;  %p315_p0 = scmp.lt.u32.totalorder %s311_s28, %s429_s5 }
  0x36   :  { %p317_p1 = pnand %p315_p0, %p312_p13 }
  0x38   :  { %320 = shalt.err (!%p317_p1)
}
  0x39   :  { %212 = dma.vmem_to_hbm [thread:$0]  %s210_s16, 128, %s429_s5, [#allocation5]   ;;  %v233_v12 = vld [vmem:[%s426_s2] ss:$0 sm:$0xff] }
  0xf5   :  { %v262_v11 = vpop.f32.mrb[0].mxu0 }
  0xf6   :  { %v141_v13 = vpop.f32.mrb[1].mxu0  ;;  %v176_v15 = vadd.f32 %v262_v11, %v233_v12 }
  0xf7   :  { %v263_v14 = vpop.f32.mrb[2].mxu0  ;;  %v174_v17 = vadd.f32 %v233_v12, %v141_v13 }
  0xf8   :  { %v144_v16 = vpop.f32.mrb[3].mxu0  ;;  %vm181_vm0 = vcmp.ge.f32.partialorder %v176_v15, 0.0  ;;  %v184_v18 = vmul.f32 0.2, %v176_v15 }
  0xf9   :  { %vm179_vm1 = vcmp.ge.f32.partialorder %v174_v17, 0.0  ;;  %v182_v19 = vmul.f32 0.2, %v174_v17  ;;  %v175_v20 = vadd.f32 %v233_v12, %v144_v16 }
  0xfa   :  { %v187_v21 = vsel %vm181_vm0, %v176_v15, %v184_v18 }
  0xfb   :  { %190 = vst [vmem:[%s427_s3 + $0x10] sm:$0xff] %v187_v21  ;;  %v185_v22 = vsel %vm179_vm1, %v174_v17, %v182_v19  ;;  %vm180_vm2 = vcmp.ge.f32.partialorder %v175_v20, 0.0  ;;  %v183_v23 = vmul.f32 0.2, %v175_v20 }
  0xfc   :  { %188 = vst [vmem:[%s427_s3] sm:$0xff] %v185_v22 }
  0xfd   :  { %v186_v24 = vsel %vm180_vm2, %v175_v20, %v183_v23 }
  0xfe   :  { %189 = vst [vmem:[%s427_s3 + $0x8] sm:$0xff] %v186_v24 }
  0xff   :  { %321 = dma.done.wait [#allocation3], 128  }
 0x100   :  { %322 = vsyncadd [#allocation3], 4294967168 }
 0x101   :  { %323 = dma.done.wait [#allocation5], 128  }
 0x102   :  { %324 = vsyncadd [#allocation5], 4294967168 }
 0x103   :  { %221 = vsyncpa [#allocation3], 1 }
 0x104   :  { %222 = vsyncpa [#allocation5], 1 }

// kernel: multiscale_forward.45
= control target key start
LH: loop header
LB: loop body
LE: loop exit
PB: predicated region body
PF: predicated region fallthrough
CT: control target
= control target key end

     0   :  { %v219_v0 = vmov 0.0   ;;  %vm220_vm0 = vmmov 0   ;;  %s290_s1 = inlined_call_operand.vmem [shape: bf16[128,128], index: 1, kind: input, shape index: {}]   ;;  %s291_s0 = inlined_call_operand.vmem [shape: bf16[8,128], index: 0, kind: input, shape index: {}]   ;;  %s292_s2 = inlined_call_operand.vmem [shape: f32[1,128], index: 2, kind: input, shape index: {}]   ;;  %s293_s3 = inlined_call_operand.vmem [shape: f32[8,128], index: 3, kind: output, shape index: {0}]   ;;  %s294_s4 = inlined_call_operand.vmem [shape: f32[8,128], index: 4, kind: output, shape index: {1}]   ;;  %s295_s5 = inlined_call_operand.vmem [shape: f32[8,128], index: 5, kind: output, shape index: {2}]  }
   0x1   :  { %189 = vmatprep.subr.bf16.mxu0 %v219_v0  ;;  %v211_v1 = vld [vmem:[%s290_s1] sm:$0xff]   ;;  %205 = vmatprep.mubr.msk.bf16.mxu0 %vm220_vm0, %v219_v0  ;;  %v212_v2 = vld [vmem:[%s290_s1 + $0x8] sm:$0xff]   ;;  %v213_v3 = vld [vmem:[%s290_s1 + $0x10] sm:$0xff]  }
   0x2   :  { %190 = vmatpush3.bf16.msra.mxu0 %v211_v1  ;;  %v214_v4 = vld [vmem:[%s290_s1 + $0x18] sm:$0xff]   ;;  %v215_v5 = vld [vmem:[%s290_s1 + $0x20] sm:$0xff]   ;;  %v216_v6 = vld [vmem:[%s290_s1 + $0x28] sm:$0xff]  }
   0x3   :  { %191 = vmatprep.subr.bf16.mxu0 %v219_v0  ;;  %v217_v7 = vld [vmem:[%s290_s1 + $0x30] sm:$0xff]   ;;  %v218_v8 = vld [vmem:[%s290_s1 + $0x38] sm:$0xff]   ;;  %v24_v9 = vld [vmem:[%s291_s0] sm:$0xf] }
   0x4   :  { %v179_v11 = vld [vmem:[%s292_s2] ss:$0 sm:$0xff] }
   0x6   :  { %192 = vmatpush3.bf16.msra.mxu0 %v212_v2 }
   0x7   :  { %193 = vmatprep.subr.bf16.mxu0 %v219_v0 }
   0xa   :  { %194 = vmatpush3.bf16.msra.mxu0 %v213_v3 }
   0xb   :  { %195 = vmatprep.subr.bf16.mxu0 %v219_v0 }
   0xe   :  { %196 = vmatpush3.bf16.msra.mxu0 %v214_v4 }
   0xf   :  { %197 = vmatprep.subr.bf16.mxu0 %v219_v0 }
  0x12   :  { %198 = vmatpush3.bf16.msra.mxu0 %v215_v5 }
  0x13   :  { %199 = vmatprep.subr.bf16.mxu0 %v219_v0 }
  0x16   :  { %200 = vmatpush3.bf16.msra.mxu0 %v216_v6 }
  0x17   :  { %201 = vmatprep.subr.bf16.mxu0 %v219_v0 }
  0x1a   :  { %202 = vmatpush3.bf16.msra.mxu0 %v217_v7 }
  0x1b   :  { %203 = vmatprep.subr.bf16.mxu0 %v219_v0 }
  0x1e   :  { %204 = vmatpush3.bf16.msra.mxu0 %v218_v8 }
  0x21   :  { %206 = vmatmul.mubr.bf16.vlgmr.msra.gmra.mrb[0].mxu0 %v24_v9 }
  0xf4   :  { %v123_v10 = vpop.f32.mrb[0].mxu0 }
  0xf5   :  { %v207_v12 = vpop.f32.mrb[1].mxu0  ;;  %v142_v14 = vadd.f32 %v179_v11, %v123_v10 }
  0xf6   :  { %v126_v13 = vpop.f32.mrb[2].mxu0 }
  0xf7   :  { %v208_v15 = vpop.f32.mrb[3].mxu0  ;;  %v143_v16 = vrot.slane %v142_v14, 4  ;;  %v149_v17 = vmul.f32 %v142_v14, %v142_v14  ;;  %158 = vst [vmem:[%s293_s3] sm:$0xff] %v142_v14 }
  0xf9   :  { %v144_v18 = vadd.f32 %v143_v16, %v142_v14  ;;  %v150_v19 = vrot.slane %v149_v17, 4 }
  0xfb   :  { %v145_v20 = vrot.slane %v144_v18, 2  ;;  %v151_v21 = vadd.f32 %v150_v19, %v149_v17 }
  0xfd   :  { %v146_v22 = vadd.f32 %v145_v20, %v144_v18  ;;  %v152_v23 = vrot.slane %v151_v21, 2 }
  0xff   :  { %v147_v24 = vrot.slane %v146_v22, 1  ;;  %v153_v25 = vadd.f32 %v152_v23, %v151_v21 }
 0x101   :  { %v148_v26 = vadd.f32 %v147_v24, %v146_v22  ;;  %v154_v27 = vrot.slane %v153_v25, 1 }
 0x103   :  { %v155_v28 = vadd.f32 %v154_v27, %v153_v25  ;;  %156 = vst [vmem:[%s294_s4] sm:$0xff] %v148_v26 }
 0x105   :  { %157 = vst [vmem:[%s295_s5] sm:$0xff] %v155_v28 }

</bundles_post_ra>
